<compile_context>
chip_gen: v7x
topology: tpu7x:2x2x1
jax: 0.10.0
libtpu: 0.0.40
codegen_flags: <defaults>
</compile_context>

<pallas_src>
import functools
import math

import jax
import jax.numpy as jnp
import numpy as np
from jax.experimental import pallas as pl
from jax.experimental.pallas import tpu as pltpu


# ----------------------------------------------------------------------------
# In-kernel helpers
# ----------------------------------------------------------------------------
def _layernorm(x, gamma, beta, eps=1e-6):
    # Matches the PyTorch LayerNorm in the reference module:
    #   unbiased std (divides by n-1), eps added to std (not variance).
    d = x.shape[-1]
    mean = jnp.mean(x, axis=-1, keepdims=True)
    var = jnp.sum((x - mean) ** 2, axis=-1, keepdims=True) / (d - 1)
    return gamma * (x - mean) / (jnp.sqrt(var) + eps) + beta


def _split_heads(x, num_heads, dk):
    # (S, H*dk) f32 -> (H, S, dk) bf16, layout-aware transpose via einshape.
    s = x.shape[0]
    x3 = x.reshape(s, num_heads, dk)
    return pltpu.einshape("shd->hsd", x3).astype(jnp.bfloat16)


def _mha(q_in_b, kv_b, mask, wq, bq, wk, bk, wv, bv, wo, bo, *, num_heads):
    """Multi-head attention for one batch element.

    q_in_b: (Sq, D)  bf16, already layer-normalized query input.
    kv_b:   (Skv, D) bf16 key/value input (normalized for self-attn, raw
            memory for source-attn -- matches the reference module).
    mask:   (Sq, Skv) f32, 0 == masked.
    """
    Sq, D = q_in_b.shape
    dk = D // num_heads

    # Full-width projections: one MXU-friendly (S,D)@(D,D) bf16 matmul each,
    # accumulated in f32.
    q = jnp.dot(q_in_b, wq[...], preferred_element_type=jnp.float32) + bq[...]
    k = jnp.dot(kv_b, wk[...], preferred_element_type=jnp.float32) + bk[...]
    v = jnp.dot(kv_b, wv[...], preferred_element_type=jnp.float32) + bv[...]

    # Fold 1/sqrt(d_k) into q (touches Sq*D elements instead of H*Sq*Skv).
    q = q * (1.0 / math.sqrt(dk))

    qh = _split_heads(q, num_heads, dk)   # (H, Sq,  dk) bf16
    kh = _split_heads(k, num_heads, dk)   # (H, Skv, dk) bf16
    vh = _split_heads(v, num_heads, dk)   # (H, Skv, dk) bf16

    # Single batched MXU matmul over all heads: (H, Sq, Skv), f32 accumulate.
    scores = jnp.einsum("hqd,hkd->hqk", qh, kh,
                        preferred_element_type=jnp.float32)

    # Additive mask computed once (hoisted out of any per-head work).
    scores = scores + jnp.where(mask == 0.0, -1e9, 0.0)[None]

    # Numerically stable softmax; the divide goes to the EUP.
    m = jnp.max(scores, axis=-1, keepdims=True)
    e = jnp.exp(scores - m)
    p = e * pl.reciprocal(jnp.sum(e, axis=-1, keepdims=True), approx=True)

    # Second batched matmul over all heads, then merge heads back to (Sq, D).
    ctx = jnp.einsum("hqk,hkd->hqd", p.astype(jnp.bfloat16), vh,
                     preferred_element_type=jnp.float32)
    concat = pltpu.einshape("hsd->shd", ctx).reshape(Sq, D).astype(jnp.bfloat16)

    return jnp.dot(concat, wo[...], preferred_element_type=jnp.float32) + bo[...]


# ----------------------------------------------------------------------------
# Fused decoder-layer kernel: self-attn + src-attn + FFN in one call.
# ----------------------------------------------------------------------------
def decoder_layer_kernel(
        x_ref, mem_ref, tgt_mask_ref, src_mask_ref,
        # self-attention sublayer params
        sa_g, sa_b, sa_wq, sa_bq, sa_wk, sa_bk, sa_wv, sa_bv, sa_wo, sa_bo,
        # source-attention sublayer params
        ca_g, ca_b, ca_wq, ca_bq, ca_wk, ca_bk, ca_wv, ca_bv, ca_wo, ca_bo,
        # feed-forward sublayer params
        ff_g, ff_b, ff_w1, ff_b1, ff_w2, ff_b2,
        o_ref, *, num_heads):
    # x stays resident in VMEM/vregs across all three sublayers.
    x = x_ref[0]                                # (Sq, D) f32
    mem_b = mem_ref[0].astype(jnp.bfloat16)     # (Skv, D) bf16

    # -- sublayer 0: self-attention (q, k, v all from LN(x)) -----------------
    xn_b = _layernorm(x, sa_g[...], sa_b[...]).astype(jnp.bfloat16)
    x = x + _mha(xn_b, xn_b, tgt_mask_ref[...],
                 sa_wq, sa_bq, sa_wk, sa_bk, sa_wv, sa_bv, sa_wo, sa_bo,
                 num_heads=num_heads)

    # -- sublayer 1: source-attention (k, v from raw memory) -----------------
    xn_b = _layernorm(x, ca_g[...], ca_b[...]).astype(jnp.bfloat16)
    x = x + _mha(xn_b, mem_b, src_mask_ref[...],
                 ca_wq, ca_bq, ca_wk, ca_bk, ca_wv, ca_bv, ca_wo, ca_bo,
                 num_heads=num_heads)

    # -- sublayer 2: position-wise feed forward -------------------------------
    xn_b = _layernorm(x, ff_g[...], ff_b[...]).astype(jnp.bfloat16)
    h = jnp.dot(xn_b, ff_w1[...], preferred_element_type=jnp.float32) + ff_b1[...]
    h = jnp.maximum(h, 0.0).astype(jnp.bfloat16)
    y = jnp.dot(h, ff_w2[...], preferred_element_type=jnp.float32) + ff_b2[...]

    o_ref[0] = (x + y).astype(o_ref.dtype)


# ----------------------------------------------------------------------------
# Wrapper
# ----------------------------------------------------------------------------
def decoder_layer_forward(x, memory, src_mask, tgt_mask, params, *, num_heads):
    B, Sq, D = x.shape
    Skv = memory.shape[1]
    Dff = params["ff"]["w1"].shape[1]

    def rep(shape):
        # Replicated (non-batched) operand: constant block index.
        nd = len(shape)
        return pl.BlockSpec(shape, lambda *_: (0,) * nd)

    attn_specs = [rep((1, D)), rep((1, D)),                     # ln gamma/beta
                  rep((D, D)), rep((1, D)), rep((D, D)), rep((1, D)),
                  rep((D, D)), rep((1, D)), rep((D, D)), rep((1, D))]
    in_specs = (
        [pl.BlockSpec((1, Sq, D), lambda b: (b, 0, 0)),         # x
         pl.BlockSpec((1, Skv, D), lambda b: (b, 0, 0)),        # memory
         rep((Sq, Sq)),                                         # tgt_mask
         rep((Sq, Skv))]                                        # src_mask
        + attn_specs + attn_specs
        + [rep((1, D)), rep((1, D)),
           rep((D, Dff)), rep((1, Dff)), rep((Dff, D)), rep((1, D))])

    def attn_args(p):
        bf = lambda w: w.astype(jnp.bfloat16)   # ship matmul weights as bf16
        return [p["ln_g"], p["ln_b"],
                bf(p["wq"]), p["bq"], bf(p["wk"]), p["bk"],
                bf(p["wv"]), p["bv"], bf(p["wo"]), p["bo"]]

    pf = params["ff"]
    args = ([x, memory, tgt_mask, src_mask]
            + attn_args(params["self_attn"]) + attn_args(params["src_attn"])
            + [pf["ln_g"], pf["ln_b"],
               pf["w1"].astype(jnp.bfloat16), pf["b1"],
               pf["w2"].astype(jnp.bfloat16), pf["b2"]])

    kernel = functools.partial(decoder_layer_kernel, num_heads=num_heads)
    return pl.pallas_call(
        kernel,
        out_shape=jax.ShapeDtypeStruct((B, Sq, D), x.dtype),
        grid=(B,),
        in_specs=in_specs,
        out_specs=pl.BlockSpec((1, Sq, D), lambda b: (b, 0, 0)),
        compiler_params=pltpu.CompilerParams(
            dimension_semantics=("parallel",)),
    )(*args)


# ----------------------------------------------------------------------------
# Deterministic parameter init + pure-JAX f32 reference for verification
# ----------------------------------------------------------------------------
def init_params(key, d_model, d_ff):
    keys = jax.random.split(key, 12)

    def lin(k, din, dout):
        return (0.02 * jax.random.normal(k, (din, dout), jnp.float32),
                jnp.zeros((1, dout), jnp.float32))

    def attn_params(ks):
        wq, bq = lin(ks[0], d_model, d_model)
        wk, bk = lin(ks[1], d_model, d_model)
        wv, bv = lin(ks[2], d_model, d_model)
        wo, bo = lin(ks[3], d_model, d_model)
        return dict(ln_g=jnp.ones((1, d_model), jnp.float32),
                    ln_b=jnp.zeros((1, d_model), jnp.float32),
                    wq=wq, bq=bq, wk=wk, bk=bk, wv=wv, bv=bv, wo=wo, bo=bo)

    w1, b1 = lin(keys[8], d_model, d_ff)
    w2, b2 = lin(keys[9], d_ff, d_model)
    return dict(
        self_attn=attn_params(keys[0:4]),
        src_attn=attn_params(keys[4:8]),
        ff=dict(ln_g=jnp.ones((1, d_model), jnp.float32),
                ln_b=jnp.zeros((1, d_model), jnp.float32),
                w1=w1, b1=b1, w2=w2, b2=b2),
    )


def _ln_ref(x, g, b, eps=1e-6):
    d = x.shape[-1]
    mean = x.mean(-1, keepdims=True)
    var = ((x - mean) ** 2).sum(-1, keepdims=True) / (d - 1)
    return g * (x - mean) / (jnp.sqrt(var) + eps) + b


def _mha_ref(q_in, kv_in, mask, p, h):
    D = q_in.shape[-1]
    dk = D // h
    q = q_in @ p["wq"] + p["bq"]
    k = kv_in @ p["wk"] + p["bk"]
    v = kv_in @ p["wv"] + p["bv"]
    B, Sq, _ = q.shape
    Skv = k.shape[1]
    qh = q.reshape(B, Sq, h, dk).transpose(0, 2, 1, 3)
    kh = k.reshape(B, Skv, h, dk).transpose(0, 2, 1, 3)
    vh = v.reshape(B, Skv, h, dk).transpose(0, 2, 1, 3)
    scores = jnp.einsum("bhqd,bhkd->bhqk", qh, kh) / math.sqrt(dk)
    scores = jnp.where(mask[None, None] == 0, -1e9, scores)
    attn = jax.nn.softmax(scores, axis=-1)
    out = jnp.einsum("bhqk,bhkd->bhqd", attn, vh)
    out = out.transpose(0, 2, 1, 3).reshape(B, Sq, D)
    return out @ p["wo"] + p["bo"]


def decoder_layer_ref(x, memory, src_mask, tgt_mask, params, *, num_heads):
    p0 = params["self_attn"]
    xn = _ln_ref(x, p0["ln_g"], p0["ln_b"])
    x = x + _mha_ref(xn, xn, tgt_mask, p0, num_heads)
    p1 = params["src_attn"]
    xn = _ln_ref(x, p1["ln_g"], p1["ln_b"])
    x = x + _mha_ref(xn, memory, src_mask, p1, num_heads)
    pf = params["ff"]
    xn = _ln_ref(x, pf["ln_g"], pf["ln_b"])
    h = jnp.maximum(xn @ pf["w1"] + pf["b1"], 0.0)
    return x + (h @ pf["w2"] + pf["b2"])


# ----------------------------------------------------------------------------
if __name__ == "__main__":
    # Small demo shapes consistent with the module (src length 10 as in spec);
    # d_model chosen lane-dense (128) so matmuls / stores are unmasked.
    B, Sq, Skv, D, H, Dff = 2, 8, 10, 128, 4, 256

    key = jax.random.PRNGKey(0)
    k_x, k_m, k_p = jax.random.split(key, 3)
    x = jax.random.normal(k_x, (B, Sq, D), jnp.float32)
    memory = jax.random.normal(k_m, (B, Skv, D), jnp.float32)
    params = init_params(k_p, D, Dff)

    # tgt_mask: causal (lower-triangular); src_mask: all ones (like ones(1,1,Skv))
    tgt_mask = jnp.tril(jnp.ones((Sq, Sq), jnp.float32))
    src_mask = jnp.ones((Sq, Skv), jnp.float32)

    out = decoder_layer_forward(x, memory, src_mask, tgt_mask, params,
                                num_heads=H)
    out = jax.block_until_ready(out)

    ref = decoder_layer_ref(x, memory, src_mask, tgt_mask, params,
                            num_heads=H)
    # bf16 matmul inputs + approx reciprocal => loosened tolerance vs f32 ref.
    np.testing.assert_allclose(np.asarray(out), np.asarray(ref),
                               rtol=2e-2, atol=2e-2)
    print("KERNEL_OK")
</pallas_src>

<mosaic_0001>
module attributes {stable_mosaic.version = 11 : i64} {
  func.func @decoder_layer_kernel(%arg0: i32, %arg1: memref<1x8x128xf32, #tpu.memory_space<vmem>>, %arg2: memref<1x10x128xf32, #tpu.memory_space<vmem>>, %arg3: memref<8x8xf32, #tpu.memory_space<vmem>>, %arg4: memref<8x10xf32, #tpu.memory_space<vmem>>, %arg5: memref<1x128xf32, #tpu.memory_space<vmem>>, %arg6: memref<1x128xf32, #tpu.memory_space<vmem>>, %arg7: memref<128x128xbf16, #tpu.memory_space<vmem>>, %arg8: memref<1x128xf32, #tpu.memory_space<vmem>>, %arg9: memref<128x128xbf16, #tpu.memory_space<vmem>>, %arg10: memref<1x128xf32, #tpu.memory_space<vmem>>, %arg11: memref<128x128xbf16, #tpu.memory_space<vmem>>, %arg12: memref<1x128xf32, #tpu.memory_space<vmem>>, %arg13: memref<128x128xbf16, #tpu.memory_space<vmem>>, %arg14: memref<1x128xf32, #tpu.memory_space<vmem>>, %arg15: memref<1x128xf32, #tpu.memory_space<vmem>>, %arg16: memref<1x128xf32, #tpu.memory_space<vmem>>, %arg17: memref<128x128xbf16, #tpu.memory_space<vmem>>, %arg18: memref<1x128xf32, #tpu.memory_space<vmem>>, %arg19: memref<128x128xbf16, #tpu.memory_space<vmem>>, %arg20: memref<1x128xf32, #tpu.memory_space<vmem>>, %arg21: memref<128x128xbf16, #tpu.memory_space<vmem>>, %arg22: memref<1x128xf32, #tpu.memory_space<vmem>>, %arg23: memref<128x128xbf16, #tpu.memory_space<vmem>>, %arg24: memref<1x128xf32, #tpu.memory_space<vmem>>, %arg25: memref<1x128xf32, #tpu.memory_space<vmem>>, %arg26: memref<1x128xf32, #tpu.memory_space<vmem>>, %arg27: memref<128x256xbf16, #tpu.memory_space<vmem>>, %arg28: memref<1x256xf32, #tpu.memory_space<vmem>>, %arg29: memref<256x128xbf16, #tpu.memory_space<vmem>>, %arg30: memref<1x128xf32, #tpu.memory_space<vmem>>, %arg31: memref<1x8x128xf32, #tpu.memory_space<vmem>>) attributes {dimension_semantics = [#tpu.dimension_semantics<parallel>], iteration_bounds = array<i64: 2>, scalar_prefetch = 0 : i64, scratch_operands = 0 : i64, tpu.core_type = #tpu.core_type<tc>, window_params = [{transform_indices = @transform_0, window_bounds = array<i64: 1, 8, 128>}, {transform_indices = @transform_1, window_bounds = array<i64: 1, 10, 128>}, {pipeline_mode = #tpu.pipeline_mode<synchronous>, transform_indices = @transform_2, window_bounds = array<i64: 8, 8>}, {pipeline_mode = #tpu.pipeline_mode<synchronous>, transform_indices = @transform_3, window_bounds = array<i64: 8, 10>}, {pipeline_mode = #tpu.pipeline_mode<synchronous>, transform_indices = @transform_4, window_bounds = array<i64: 1, 128>}, {pipeline_mode = #tpu.pipeline_mode<synchronous>, transform_indices = @transform_5, window_bounds = array<i64: 1, 128>}, {pipeline_mode = #tpu.pipeline_mode<synchronous>, transform_indices = @transform_6, window_bounds = array<i64: 128, 128>}, {pipeline_mode = #tpu.pipeline_mode<synchronous>, transform_indices = @transform_7, window_bounds = array<i64: 1, 128>}, {pipeline_mode = #tpu.pipeline_mode<synchronous>, transform_indices = @transform_8, window_bounds = array<i64: 128, 128>}, {pipeline_mode = #tpu.pipeline_mode<synchronous>, transform_indices = @transform_9, window_bounds = array<i64: 1, 128>}, {pipeline_mode = #tpu.pipeline_mode<synchronous>, transform_indices = @transform_10, window_bounds = array<i64: 128, 128>}, {pipeline_mode = #tpu.pipeline_mode<synchronous>, transform_indices = @transform_11, window_bounds = array<i64: 1, 128>}, {pipeline_mode = #tpu.pipeline_mode<synchronous>, transform_indices = @transform_12, window_bounds = array<i64: 128, 128>}, {pipeline_mode = #tpu.pipeline_mode<synchronous>, transform_indices = @transform_13, window_bounds = array<i64: 1, 128>}, {pipeline_mode = #tpu.pipeline_mode<synchronous>, transform_indices = @transform_14, window_bounds = array<i64: 1, 128>}, {pipeline_mode = #tpu.pipeline_mode<synchronous>, transform_indices = @transform_15, window_bounds = array<i64: 1, 128>}, {pipeline_mode = #tpu.pipeline_mode<synchronous>, transform_indices = @transform_16, window_bounds = array<i64: 128, 128>}, {pipeline_mode = #tpu.pipeline_mode<synchronous>, transform_indices = @transform_17, window_bounds = array<i64: 1, 128>}, {pipeline_mode = #tpu.pipeline_mode<synchronous>, transform_indices = @transform_18, window_bounds = array<i64: 128, 128>}, {pipeline_mode = #tpu.pipeline_mode<synchronous>, transform_indices = @transform_19, window_bounds = array<i64: 1, 128>}, {pipeline_mode = #tpu.pipeline_mode<synchronous>, transform_indices = @transform_20, window_bounds = array<i64: 128, 128>}, {pipeline_mode = #tpu.pipeline_mode<synchronous>, transform_indices = @transform_21, window_bounds = array<i64: 1, 128>}, {pipeline_mode = #tpu.pipeline_mode<synchronous>, transform_indices = @transform_22, window_bounds = array<i64: 128, 128>}, {pipeline_mode = #tpu.pipeline_mode<synchronous>, transform_indices = @transform_23, window_bounds = array<i64: 1, 128>}, {pipeline_mode = #tpu.pipeline_mode<synchronous>, transform_indices = @transform_24, window_bounds = array<i64: 1, 128>}, {pipeline_mode = #tpu.pipeline_mode<synchronous>, transform_indices = @transform_25, window_bounds = array<i64: 1, 128>}, {pipeline_mode = #tpu.pipeline_mode<synchronous>, transform_indices = @transform_26, window_bounds = array<i64: 128, 256>}, {pipeline_mode = #tpu.pipeline_mode<synchronous>, transform_indices = @transform_27, window_bounds = array<i64: 1, 256>}, {pipeline_mode = #tpu.pipeline_mode<synchronous>, transform_indices = @transform_28, window_bounds = array<i64: 256, 128>}, {pipeline_mode = #tpu.pipeline_mode<synchronous>, transform_indices = @transform_29, window_bounds = array<i64: 1, 128>}, {transform_indices = @transform_30, window_bounds = array<i64: 1, 8, 128>}]} {
    %c0 = arith.constant 0 : index
    %c0_0 = arith.constant 0 : index
    %c0_1 = arith.constant 0 : index
    %0 = vector.load %arg1[%c0, %c0_0, %c0_1] : memref<1x8x128xf32, #tpu.memory_space<vmem>>, vector<1x8x128xf32>
    %1 = vector.shape_cast %0 : vector<1x8x128xf32> to vector<8x128xf32>
    %c0_2 = arith.constant 0 : index
    %c0_3 = arith.constant 0 : index
    %c0_4 = arith.constant 0 : index
    %2 = vector.load %arg2[%c0_2, %c0_3, %c0_4] : memref<1x10x128xf32, #tpu.memory_space<vmem>>, vector<1x10x128xf32>
    %3 = vector.shape_cast %2 : vector<1x10x128xf32> to vector<10x128xf32>
    %4 = arith.truncf %3 : vector<10x128xf32> to vector<10x128xbf16>
    %c0_5 = arith.constant 0 : index
    %c0_6 = arith.constant 0 : index
    %5 = vector.load %arg5[%c0_5, %c0_6] : memref<1x128xf32, #tpu.memory_space<vmem>>, vector<1x128xf32>
    %c0_7 = arith.constant 0 : index
    %c0_8 = arith.constant 0 : index
    %6 = vector.load %arg6[%c0_7, %c0_8] : memref<1x128xf32, #tpu.memory_space<vmem>>, vector<1x128xf32>
    %cst = arith.constant dense<0.000000e+00> : vector<8xf32>
    %7 = vector.multi_reduction <add>, %1, %cst [1] : vector<8x128xf32> to vector<8xf32>
    %8 = vector.shape_cast %7 : vector<8xf32> to vector<8x1xf32>
    %cst_9 = arith.constant 1.280000e+02 : f32
    %9 = vector.broadcast %cst_9 : f32 to vector<8x1xf32>
    %10 = arith.divf %8, %9 : vector<8x1xf32>
    %11 = vector.broadcast %10 : vector<8x1xf32> to vector<8x128xf32>
    %12 = arith.subf %1, %11 : vector<8x128xf32>
    %13 = arith.mulf %12, %12 : vector<8x128xf32>
    %cst_10 = arith.constant dense<0.000000e+00> : vector<8xf32>
    %14 = vector.multi_reduction <add>, %13, %cst_10 [1] : vector<8x128xf32> to vector<8xf32>
    %15 = vector.shape_cast %14 : vector<8xf32> to vector<8x1xf32>
    %cst_11 = arith.constant 1.270000e+02 : f32
    %16 = vector.broadcast %cst_11 : f32 to vector<8x1xf32>
    %17 = arith.divf %15, %16 : vector<8x1xf32>
    %18 = vector.broadcast %10 : vector<8x1xf32> to vector<8x128xf32>
    %19 = arith.subf %1, %18 : vector<8x128xf32>
    %20 = vector.broadcast %5 : vector<1x128xf32> to vector<8x128xf32>
    %21 = arith.mulf %20, %19 : vector<8x128xf32>
    %22 = math.sqrt %17 : vector<8x1xf32>
    %cst_12 = arith.constant 9.99999997E-7 : f32
    %23 = vector.broadcast %cst_12 : f32 to vector<8x1xf32>
    %24 = arith.addf %22, %23 : vector<8x1xf32>
    %25 = vector.broadcast %24 : vector<8x1xf32> to vector<8x128xf32>
    %26 = arith.divf %21, %25 : vector<8x128xf32>
    %27 = vector.broadcast %6 : vector<1x128xf32> to vector<8x128xf32>
    %28 = arith.addf %26, %27 : vector<8x128xf32>
    %29 = arith.truncf %28 : vector<8x128xf32> to vector<8x128xbf16>
    %c0_13 = arith.constant 0 : index
    %c0_14 = arith.constant 0 : index
    %30 = vector.load %arg3[%c0_13, %c0_14] : memref<8x8xf32, #tpu.memory_space<vmem>>, vector<8x8xf32>
    %c0_15 = arith.constant 0 : index
    %c0_16 = arith.constant 0 : index
    %31 = vector.load %arg7[%c0_15, %c0_16] : memref<128x128xbf16, #tpu.memory_space<vmem>>, vector<128x128xbf16>
    %cst_17 = arith.constant dense<0.000000e+00> : vector<8x128xf32>
    %32 = tpu.matmul %29, %31, %cst_17 {dimension_numbers = #tpu.dot_dimension_numbers<[1], [0], [0], [1], [0, 0, 1, 1], [], []>} : vector<8x128xbf16>, vector<128x128xbf16>, vector<8x128xf32> -> vector<8x128xf32>
    %c0_18 = arith.constant 0 : index
    %c0_19 = arith.constant 0 : index
    %33 = vector.load %arg8[%c0_18, %c0_19] : memref<1x128xf32, #tpu.memory_space<vmem>>, vector<1x128xf32>
    %34 = vector.broadcast %33 : vector<1x128xf32> to vector<8x128xf32>
    %35 = arith.addf %32, %34 : vector<8x128xf32>
    %c0_20 = arith.constant 0 : index
    %c0_21 = arith.constant 0 : index
    %36 = vector.load %arg9[%c0_20, %c0_21] : memref<128x128xbf16, #tpu.memory_space<vmem>>, vector<128x128xbf16>
    %cst_22 = arith.constant dense<0.000000e+00> : vector<8x128xf32>
    %37 = tpu.matmul %29, %36, %cst_22 {dimension_numbers = #tpu.dot_dimension_numbers<[1], [0], [0], [1], [0, 0, 1, 1], [], []>} : vector<8x128xbf16>, vector<128x128xbf16>, vector<8x128xf32> -> vector<8x128xf32>
    %c0_23 = arith.constant 0 : index
    %c0_24 = arith.constant 0 : index
    %38 = vector.load %arg10[%c0_23, %c0_24] : memref<1x128xf32, #tpu.memory_space<vmem>>, vector<1x128xf32>
    %39 = vector.broadcast %38 : vector<1x128xf32> to vector<8x128xf32>
    %40 = arith.addf %37, %39 : vector<8x128xf32>
    %c0_25 = arith.constant 0 : index
    %c0_26 = arith.constant 0 : index
    %41 = vector.load %arg11[%c0_25, %c0_26] : memref<128x128xbf16, #tpu.memory_space<vmem>>, vector<128x128xbf16>
    %cst_27 = arith.constant dense<0.000000e+00> : vector<8x128xf32>
    %42 = tpu.matmul %29, %41, %cst_27 {dimension_numbers = #tpu.dot_dimension_numbers<[1], [0], [0], [1], [0, 0, 1, 1], [], []>} : vector<8x128xbf16>, vector<128x128xbf16>, vector<8x128xf32> -> vector<8x128xf32>
    %c0_28 = arith.constant 0 : index
    %c0_29 = arith.constant 0 : index
    %43 = vector.load %arg12[%c0_28, %c0_29] : memref<1x128xf32, #tpu.memory_space<vmem>>, vector<1x128xf32>
    %44 = vector.broadcast %43 : vector<1x128xf32> to vector<8x128xf32>
    %45 = arith.addf %42, %44 : vector<8x128xf32>
    %cst_30 = arith.constant 0.176776692 : f32
    %46 = vector.broadcast %cst_30 : f32 to vector<8x128xf32>
    %47 = arith.mulf %35, %46 : vector<8x128xf32>
    %48 = vector.shape_cast %47 : vector<8x128xf32> to vector<8x4x32xf32>
    %49 = tpu.transpose %48, [1, 0, 2] : vector<8x4x32xf32> -> vector<4x8x32xf32>
    %50 = arith.truncf %49 : vector<4x8x32xf32> to vector<4x8x32xbf16>
    %51 = vector.shape_cast %40 : vector<8x128xf32> to vector<8x4x32xf32>
    %52 = tpu.transpose %51, [1, 0, 2] : vector<8x4x32xf32> -> vector<4x8x32xf32>
    %53 = arith.truncf %52 : vector<4x8x32xf32> to vector<4x8x32xbf16>
    %54 = vector.shape_cast %45 : vector<8x128xf32> to vector<8x4x32xf32>
    %55 = tpu.transpose %54, [1, 0, 2] : vector<8x4x32xf32> -> vector<4x8x32xf32>
    %56 = arith.truncf %55 : vector<4x8x32xf32> to vector<4x8x32xbf16>
    "tpu.trace_start"() <{level = 10 : i32, message = "hqd,hkd->hqk"}> : () -> ()
    %cst_31 = arith.constant dense<0.000000e+00> : vector<4x8x8xf32>
    %57 = tpu.matmul %50, %53, %cst_31 {dimension_numbers = #tpu.dot_dimension_numbers<[2], [2], [1], [1], [0, 0, 0, 1, 1, 1], [0], [0]>} : vector<4x8x32xbf16>, vector<4x8x32xbf16>, vector<4x8x8xf32> -> vector<4x8x8xf32>
    %cst_32 = arith.constant 0.000000e+00 : f32
    "tpu.trace_stop"() : () -> ()
    %58 = vector.broadcast %cst_32 : f32 to vector<8x8xf32>
    %59 = arith.cmpf oeq, %30, %58 : vector<8x8xf32>
    %cst_33 = arith.constant -1.000000e+09 : f32
    %cst_34 = arith.constant 0.000000e+00 : f32
    %60 = vector.broadcast %cst_33 : f32 to vector<8x8xf32>
    %61 = vector.broadcast %cst_34 : f32 to vector<8x8xf32>
    %62 = arith.select %59, %60, %61 : vector<8x8xi1>, vector<8x8xf32>
    %63 = vector.shape_cast %62 : vector<8x8xf32> to vector<1x8x8xf32>
    %64 = vector.broadcast %63 : vector<1x8x8xf32> to vector<4x8x8xf32>
    %65 = arith.addf %57, %64 : vector<4x8x8xf32>
    %cst_35 = arith.constant dense<0xFF800000> : vector<4x8xf32>
    %66 = vector.multi_reduction <maximumf>, %65, %cst_35 [2] : vector<4x8x8xf32> to vector<4x8xf32>
    %67 = vector.shape_cast %66 : vector<4x8xf32> to vector<4x8x1xf32>
    %68 = vector.broadcast %67 : vector<4x8x1xf32> to vector<4x8x8xf32>
    %69 = arith.subf %65, %68 : vector<4x8x8xf32>
    %70 = math.exp %69 : vector<4x8x8xf32>
    %cst_36 = arith.constant dense<0.000000e+00> : vector<4x8xf32>
    %71 = vector.multi_reduction <add>, %70, %cst_36 [2] : vector<4x8x8xf32> to vector<4x8xf32>
    %72 = vector.shape_cast %71 : vector<4x8xf32> to vector<4x8x1xf32>
    %73 = tpu.reciprocal %72 {approx = true} : vector<4x8x1xf32> -> vector<4x8x1xf32>
    %74 = vector.broadcast %73 : vector<4x8x1xf32> to vector<4x8x8xf32>
    %75 = arith.mulf %70, %74 : vector<4x8x8xf32>
    %76 = arith.truncf %75 : vector<4x8x8xf32> to vector<4x8x8xbf16>
    "tpu.trace_start"() <{level = 10 : i32, message = "hqk,hkd->hqd"}> : () -> ()
    %cst_37 = arith.constant dense<0.000000e+00> : vector<4x8x32xf32>
    %77 = tpu.matmul %76, %56, %cst_37 {dimension_numbers = #tpu.dot_dimension_numbers<[2], [1], [1], [2], [0, 0, 0, 1, 1, 2], [0], [0]>} : vector<4x8x8xbf16>, vector<4x8x32xbf16>, vector<4x8x32xf32> -> vector<4x8x32xf32>
    "tpu.trace_stop"() : () -> ()
    %78 = tpu.transpose %77, [1, 0, 2] : vector<4x8x32xf32> -> vector<8x4x32xf32>
    %79 = vector.shape_cast %78 : vector<8x4x32xf32> to vector<8x128xf32>
    %80 = arith.truncf %79 : vector<8x128xf32> to vector<8x128xbf16>
    %c0_38 = arith.constant 0 : index
    %c0_39 = arith.constant 0 : index
    %81 = vector.load %arg13[%c0_38, %c0_39] : memref<128x128xbf16, #tpu.memory_space<vmem>>, vector<128x128xbf16>
    %cst_40 = arith.constant dense<0.000000e+00> : vector<8x128xf32>
    %82 = tpu.matmul %80, %81, %cst_40 {dimension_numbers = #tpu.dot_dimension_numbers<[1], [0], [0], [1], [0, 0, 1, 1], [], []>} : vector<8x128xbf16>, vector<128x128xbf16>, vector<8x128xf32> -> vector<8x128xf32>
    %c0_41 = arith.constant 0 : index
    %c0_42 = arith.constant 0 : index
    %83 = vector.load %arg14[%c0_41, %c0_42] : memref<1x128xf32, #tpu.memory_space<vmem>>, vector<1x128xf32>
    %84 = vector.broadcast %83 : vector<1x128xf32> to vector<8x128xf32>
    %85 = arith.addf %82, %84 : vector<8x128xf32>
    %86 = arith.addf %1, %85 : vector<8x128xf32>
    %c0_43 = arith.constant 0 : index
    %c0_44 = arith.constant 0 : index
    %87 = vector.load %arg15[%c0_43, %c0_44] : memref<1x128xf32, #tpu.memory_space<vmem>>, vector<1x128xf32>
    %c0_45 = arith.constant 0 : index
    %c0_46 = arith.constant 0 : index
    %88 = vector.load %arg16[%c0_45, %c0_46] : memref<1x128xf32, #tpu.memory_space<vmem>>, vector<1x128xf32>
    %cst_47 = arith.constant dense<0.000000e+00> : vector<8xf32>
    %89 = vector.multi_reduction <add>, %86, %cst_47 [1] : vector<8x128xf32> to vector<8xf32>
    %90 = vector.shape_cast %89 : vector<8xf32> to vector<8x1xf32>
    %cst_48 = arith.constant 1.280000e+02 : f32
    %91 = vector.broadcast %cst_48 : f32 to vector<8x1xf32>
    %92 = arith.divf %90, %91 : vector<8x1xf32>
    %93 = vector.broadcast %92 : vector<8x1xf32> to vector<8x128xf32>
    %94 = arith.subf %86, %93 : vector<8x128xf32>
    %95 = arith.mulf %94, %94 : vector<8x128xf32>
    %cst_49 = arith.constant dense<0.000000e+00> : vector<8xf32>
    %96 = vector.multi_reduction <add>, %95, %cst_49 [1] : vector<8x128xf32> to vector<8xf32>
    %97 = vector.shape_cast %96 : vector<8xf32> to vector<8x1xf32>
    %cst_50 = arith.constant 1.270000e+02 : f32
    %98 = vector.broadcast %cst_50 : f32 to vector<8x1xf32>
    %99 = arith.divf %97, %98 : vector<8x1xf32>
    %100 = vector.broadcast %92 : vector<8x1xf32> to vector<8x128xf32>
    %101 = arith.subf %86, %100 : vector<8x128xf32>
    %102 = vector.broadcast %87 : vector<1x128xf32> to vector<8x128xf32>
    %103 = arith.mulf %102, %101 : vector<8x128xf32>
    %104 = math.sqrt %99 : vector<8x1xf32>
    %cst_51 = arith.constant 9.99999997E-7 : f32
    %105 = vector.broadcast %cst_51 : f32 to vector<8x1xf32>
    %106 = arith.addf %104, %105 : vector<8x1xf32>
    %107 = vector.broadcast %106 : vector<8x1xf32> to vector<8x128xf32>
    %108 = arith.divf %103, %107 : vector<8x128xf32>
    %109 = vector.broadcast %88 : vector<1x128xf32> to vector<8x128xf32>
    %110 = arith.addf %108, %109 : vector<8x128xf32>
    %111 = arith.truncf %110 : vector<8x128xf32> to vector<8x128xbf16>
    %c0_52 = arith.constant 0 : index
    %c0_53 = arith.constant 0 : index
    %112 = vector.load %arg4[%c0_52, %c0_53] : memref<8x10xf32, #tpu.memory_space<vmem>>, vector<8x10xf32>
    %c0_54 = arith.constant 0 : index
    %c0_55 = arith.constant 0 : index
    %113 = vector.load %arg17[%c0_54, %c0_55] : memref<128x128xbf16, #tpu.memory_space<vmem>>, vector<128x128xbf16>
    %cst_56 = arith.constant dense<0.000000e+00> : vector<8x128xf32>
    %114 = tpu.matmul %111, %113, %cst_56 {dimension_numbers = #tpu.dot_dimension_numbers<[1], [0], [0], [1], [0, 0, 1, 1], [], []>} : vector<8x128xbf16>, vector<128x128xbf16>, vector<8x128xf32> -> vector<8x128xf32>
    %c0_57 = arith.constant 0 : index
    %c0_58 = arith.constant 0 : index
    %115 = vector.load %arg18[%c0_57, %c0_58] : memref<1x128xf32, #tpu.memory_space<vmem>>, vector<1x128xf32>
    %116 = vector.broadcast %115 : vector<1x128xf32> to vector<8x128xf32>
    %117 = arith.addf %114, %116 : vector<8x128xf32>
    %c0_59 = arith.constant 0 : index
    %c0_60 = arith.constant 0 : index
    %118 = vector.load %arg19[%c0_59, %c0_60] : memref<128x128xbf16, #tpu.memory_space<vmem>>, vector<128x128xbf16>
    %cst_61 = arith.constant dense<0.000000e+00> : vector<10x128xf32>
    %119 = tpu.matmul %4, %118, %cst_61 {dimension_numbers = #tpu.dot_dimension_numbers<[1], [0], [0], [1], [0, 0, 1, 1], [], []>} : vector<10x128xbf16>, vector<128x128xbf16>, vector<10x128xf32> -> vector<10x128xf32>
    %c0_62 = arith.constant 0 : index
    %c0_63 = arith.constant 0 : index
    %120 = vector.load %arg20[%c0_62, %c0_63] : memref<1x128xf32, #tpu.memory_space<vmem>>, vector<1x128xf32>
    %121 = vector.broadcast %120 : vector<1x128xf32> to vector<10x128xf32>
    %122 = arith.addf %119, %121 : vector<10x128xf32>
    %c0_64 = arith.constant 0 : index
    %c0_65 = arith.constant 0 : index
    %123 = vector.load %arg21[%c0_64, %c0_65] : memref<128x128xbf16, #tpu.memory_space<vmem>>, vector<128x128xbf16>
    %cst_66 = arith.constant dense<0.000000e+00> : vector<10x128xf32>
    %124 = tpu.matmul %4, %123, %cst_66 {dimension_numbers = #tpu.dot_dimension_numbers<[1], [0], [0], [1], [0, 0, 1, 1], [], []>} : vector<10x128xbf16>, vector<128x128xbf16>, vector<10x128xf32> -> vector<10x128xf32>
    %c0_67 = arith.constant 0 : index
    %c0_68 = arith.constant 0 : index
    %125 = vector.load %arg22[%c0_67, %c0_68] : memref<1x128xf32, #tpu.memory_space<vmem>>, vector<1x128xf32>
    %126 = vector.broadcast %125 : vector<1x128xf32> to vector<10x128xf32>
    %127 = arith.addf %124, %126 : vector<10x128xf32>
    %cst_69 = arith.constant 0.176776692 : f32
    %128 = vector.broadcast %cst_69 : f32 to vector<8x128xf32>
    %129 = arith.mulf %117, %128 : vector<8x128xf32>
    %130 = vector.shape_cast %129 : vector<8x128xf32> to vector<8x4x32xf32>
    %131 = tpu.transpose %130, [1, 0, 2] : vector<8x4x32xf32> -> vector<4x8x32xf32>
    %132 = arith.truncf %131 : vector<4x8x32xf32> to vector<4x8x32xbf16>
    %133 = vector.shape_cast %122 : vector<10x128xf32> to vector<10x4x32xf32>
    %134 = tpu.transpose %133, [1, 0, 2] : vector<10x4x32xf32> -> vector<4x10x32xf32>
    %135 = arith.truncf %134 : vector<4x10x32xf32> to vector<4x10x32xbf16>
    %136 = vector.shape_cast %127 : vector<10x128xf32> to vector<10x4x32xf32>
    %137 = tpu.transpose %136, [1, 0, 2] : vector<10x4x32xf32> -> vector<4x10x32xf32>
    %138 = arith.truncf %137 : vector<4x10x32xf32> to vector<4x10x32xbf16>
    "tpu.trace_start"() <{level = 10 : i32, message = "hqd,hkd->hqk"}> : () -> ()
    %cst_70 = arith.constant dense<0.000000e+00> : vector<4x8x10xf32>
    %139 = tpu.matmul %132, %135, %cst_70 {dimension_numbers = #tpu.dot_dimension_numbers<[2], [2], [1], [1], [0, 0, 0, 1, 1, 1], [0], [0]>} : vector<4x8x32xbf16>, vector<4x10x32xbf16>, vector<4x8x10xf32> -> vector<4x8x10xf32>
    %cst_71 = arith.constant 0.000000e+00 : f32
    "tpu.trace_stop"() : () -> ()
    %140 = vector.broadcast %cst_71 : f32 to vector<8x10xf32>
    %141 = arith.cmpf oeq, %112, %140 : vector<8x10xf32>
    %cst_72 = arith.constant -1.000000e+09 : f32
    %cst_73 = arith.constant 0.000000e+00 : f32
    %142 = vector.broadcast %cst_72 : f32 to vector<8x10xf32>
    %143 = vector.broadcast %cst_73 : f32 to vector<8x10xf32>
    %144 = arith.select %141, %142, %143 : vector<8x10xi1>, vector<8x10xf32>
    %145 = vector.shape_cast %144 : vector<8x10xf32> to vector<1x8x10xf32>
    %146 = vector.broadcast %145 : vector<1x8x10xf32> to vector<4x8x10xf32>
    %147 = arith.addf %139, %146 : vector<4x8x10xf32>
    %cst_74 = arith.constant dense<0xFF800000> : vector<4x8xf32>
    %148 = vector.multi_reduction <maximumf>, %147, %cst_74 [2] : vector<4x8x10xf32> to vector<4x8xf32>
    %149 = vector.shape_cast %148 : vector<4x8xf32> to vector<4x8x1xf32>
    %150 = vector.broadcast %149 : vector<4x8x1xf32> to vector<4x8x10xf32>
    %151 = arith.subf %147, %150 : vector<4x8x10xf32>
    %152 = math.exp %151 : vector<4x8x10xf32>
    %cst_75 = arith.constant dense<0.000000e+00> : vector<4x8xf32>
    %153 = vector.multi_reduction <add>, %152, %cst_75 [2] : vector<4x8x10xf32> to vector<4x8xf32>
    %154 = vector.shape_cast %153 : vector<4x8xf32> to vector<4x8x1xf32>
    %155 = tpu.reciprocal %154 {approx = true} : vector<4x8x1xf32> -> vector<4x8x1xf32>
    %156 = vector.broadcast %155 : vector<4x8x1xf32> to vector<4x8x10xf32>
    %157 = arith.mulf %152, %156 : vector<4x8x10xf32>
    %158 = arith.truncf %157 : vector<4x8x10xf32> to vector<4x8x10xbf16>
    "tpu.trace_start"() <{level = 10 : i32, message = "hqk,hkd->hqd"}> : () -> ()
    %cst_76 = arith.constant dense<0.000000e+00> : vector<4x8x32xf32>
    %159 = tpu.matmul %158, %138, %cst_76 {dimension_numbers = #tpu.dot_dimension_numbers<[2], [1], [1], [2], [0, 0, 0, 1, 1, 2], [0], [0]>} : vector<4x8x10xbf16>, vector<4x10x32xbf16>, vector<4x8x32xf32> -> vector<4x8x32xf32>
    "tpu.trace_stop"() : () -> ()
    %160 = tpu.transpose %159, [1, 0, 2] : vector<4x8x32xf32> -> vector<8x4x32xf32>
    %161 = vector.shape_cast %160 : vector<8x4x32xf32> to vector<8x128xf32>
    %162 = arith.truncf %161 : vector<8x128xf32> to vector<8x128xbf16>
    %c0_77 = arith.constant 0 : index
    %c0_78 = arith.constant 0 : index
    %163 = vector.load %arg23[%c0_77, %c0_78] : memref<128x128xbf16, #tpu.memory_space<vmem>>, vector<128x128xbf16>
    %cst_79 = arith.constant dense<0.000000e+00> : vector<8x128xf32>
    %164 = tpu.matmul %162, %163, %cst_79 {dimension_numbers = #tpu.dot_dimension_numbers<[1], [0], [0], [1], [0, 0, 1, 1], [], []>} : vector<8x128xbf16>, vector<128x128xbf16>, vector<8x128xf32> -> vector<8x128xf32>
    %c0_80 = arith.constant 0 : index
    %c0_81 = arith.constant 0 : index
    %165 = vector.load %arg24[%c0_80, %c0_81] : memref<1x128xf32, #tpu.memory_space<vmem>>, vector<1x128xf32>
    %166 = vector.broadcast %165 : vector<1x128xf32> to vector<8x128xf32>
    %167 = arith.addf %164, %166 : vector<8x128xf32>
    %168 = arith.addf %86, %167 : vector<8x128xf32>
    %c0_82 = arith.constant 0 : index
    %c0_83 = arith.constant 0 : index
    %169 = vector.load %arg25[%c0_82, %c0_83] : memref<1x128xf32, #tpu.memory_space<vmem>>, vector<1x128xf32>
    %c0_84 = arith.constant 0 : index
    %c0_85 = arith.constant 0 : index
    %170 = vector.load %arg26[%c0_84, %c0_85] : memref<1x128xf32, #tpu.memory_space<vmem>>, vector<1x128xf32>
    %cst_86 = arith.constant dense<0.000000e+00> : vector<8xf32>
    %171 = vector.multi_reduction <add>, %168, %cst_86 [1] : vector<8x128xf32> to vector<8xf32>
    %172 = vector.shape_cast %171 : vector<8xf32> to vector<8x1xf32>
    %cst_87 = arith.constant 1.280000e+02 : f32
    %173 = vector.broadcast %cst_87 : f32 to vector<8x1xf32>
    %174 = arith.divf %172, %173 : vector<8x1xf32>
    %175 = vector.broadcast %174 : vector<8x1xf32> to vector<8x128xf32>
    %176 = arith.subf %168, %175 : vector<8x128xf32>
    %177 = arith.mulf %176, %176 : vector<8x128xf32>
    %cst_88 = arith.constant dense<0.000000e+00> : vector<8xf32>
    %178 = vector.multi_reduction <add>, %177, %cst_88 [1] : vector<8x128xf32> to vector<8xf32>
    %179 = vector.shape_cast %178 : vector<8xf32> to vector<8x1xf32>
    %cst_89 = arith.constant 1.270000e+02 : f32
    %180 = vector.broadcast %cst_89 : f32 to vector<8x1xf32>
    %181 = arith.divf %179, %180 : vector<8x1xf32>
    %182 = vector.broadcast %174 : vector<8x1xf32> to vector<8x128xf32>
    %183 = arith.subf %168, %182 : vector<8x128xf32>
    %184 = vector.broadcast %169 : vector<1x128xf32> to vector<8x128xf32>
    %185 = arith.mulf %184, %183 : vector<8x128xf32>
    %186 = math.sqrt %181 : vector<8x1xf32>
    %cst_90 = arith.constant 9.99999997E-7 : f32
    %187 = vector.broadcast %cst_90 : f32 to vector<8x1xf32>
    %188 = arith.addf %186, %187 : vector<8x1xf32>
    %189 = vector.broadcast %188 : vector<8x1xf32> to vector<8x128xf32>
    %190 = arith.divf %185, %189 : vector<8x128xf32>
    %191 = vector.broadcast %170 : vector<1x128xf32> to vector<8x128xf32>
    %192 = arith.addf %190, %191 : vector<8x128xf32>
    %193 = arith.truncf %192 : vector<8x128xf32> to vector<8x128xbf16>
    %c0_91 = arith.constant 0 : index
    %c0_92 = arith.constant 0 : index
    %194 = vector.load %arg27[%c0_91, %c0_92] : memref<128x256xbf16, #tpu.memory_space<vmem>>, vector<128x256xbf16>
    %cst_93 = arith.constant dense<0.000000e+00> : vector<8x256xf32>
    %195 = tpu.matmul %193, %194, %cst_93 {dimension_numbers = #tpu.dot_dimension_numbers<[1], [0], [0], [1], [0, 0, 1, 1], [], []>} : vector<8x128xbf16>, vector<128x256xbf16>, vector<8x256xf32> -> vector<8x256xf32>
    %c0_94 = arith.constant 0 : index
    %c0_95 = arith.constant 0 : index
    %196 = vector.load %arg28[%c0_94, %c0_95] : memref<1x256xf32, #tpu.memory_space<vmem>>, vector<1x256xf32>
    %197 = vector.broadcast %196 : vector<1x256xf32> to vector<8x256xf32>
    %198 = arith.addf %195, %197 : vector<8x256xf32>
    %cst_96 = arith.constant 0.000000e+00 : f32
    %199 = vector.broadcast %cst_96 : f32 to vector<8x256xf32>
    %200 = arith.maximumf %198, %199 : vector<8x256xf32>
    %201 = arith.truncf %200 : vector<8x256xf32> to vector<8x256xbf16>
    %c0_97 = arith.constant 0 : index
    %c0_98 = arith.constant 0 : index
    %202 = vector.load %arg29[%c0_97, %c0_98] : memref<256x128xbf16, #tpu.memory_space<vmem>>, vector<256x128xbf16>
    %cst_99 = arith.constant dense<0.000000e+00> : vector<8x128xf32>
    %203 = tpu.matmul %201, %202, %cst_99 {dimension_numbers = #tpu.dot_dimension_numbers<[1], [0], [0], [1], [0, 0, 1, 1], [], []>} : vector<8x256xbf16>, vector<256x128xbf16>, vector<8x128xf32> -> vector<8x128xf32>
    %c0_100 = arith.constant 0 : index
    %c0_101 = arith.constant 0 : index
    %204 = vector.load %arg30[%c0_100, %c0_101] : memref<1x128xf32, #tpu.memory_space<vmem>>, vector<1x128xf32>
    %205 = vector.broadcast %204 : vector<1x128xf32> to vector<8x128xf32>
    %206 = arith.addf %203, %205 : vector<8x128xf32>
    %207 = arith.addf %168, %206 : vector<8x128xf32>
    %c0_102 = arith.constant 0 : index
    %c0_103 = arith.constant 0 : index
    %c0_104 = arith.constant 0 : index
    %208 = vector.load %arg31[%c0_102, %c0_103, %c0_104] : memref<1x8x128xf32, #tpu.memory_space<vmem>>, vector<1x8x128xf32>
    %209 = vector.shape_cast %208 : vector<1x8x128xf32> to vector<8x128xf32>
    %210 = vector.shape_cast %207 : vector<8x128xf32> to vector<1x8x128xf32>
    tpu.vector_store %arg31[%c0_102, %c0_103, %c0_104], %210 {strides = array<i32>} : memref<1x8x128xf32, #tpu.memory_space<vmem>>, vector<1x8x128xf32>,
    return
  }
  func.func @transform_0(%arg0: i32) -> (i32, i32, i32) {
    %c0_i32 = arith.constant 0 : i32
    %c0_i32_0 = arith.constant 0 : i32
    %c0_i32_1 = arith.constant 0 : i32
    return %arg0, %c0_i32, %c0_i32_0 : i32, i32, i32
  }
  func.func @transform_1(%arg0: i32) -> (i32, i32, i32) {
    %c0_i32 = arith.constant 0 : i32
    %c0_i32_0 = arith.constant 0 : i32
    %c0_i32_1 = arith.constant 0 : i32
    return %arg0, %c0_i32, %c0_i32_0 : i32, i32, i32
  }
  func.func @transform_2(%arg0: i32) -> (i32, i32) {
    %c0_i32 = arith.constant 0 : i32
    %c0_i32_0 = arith.constant 0 : i32
    %c0_i32_1 = arith.constant 0 : i32
    return %c0_i32, %c0_i32_0 : i32, i32
  }
  func.func @transform_3(%arg0: i32) -> (i32, i32) {
    %c0_i32 = arith.constant 0 : i32
    %c0_i32_0 = arith.constant 0 : i32
    %c0_i32_1 = arith.constant 0 : i32
    return %c0_i32, %c0_i32_0 : i32, i32
  }
  func.func @transform_4(%arg0: i32) -> (i32, i32) {
    %c0_i32 = arith.constant 0 : i32
    %c0_i32_0 = arith.constant 0 : i32
    %c0_i32_1 = arith.constant 0 : i32
    return %c0_i32, %c0_i32_0 : i32, i32
  }
  func.func @transform_5(%arg0: i32) -> (i32, i32) {
    %c0_i32 = arith.constant 0 : i32
    %c0_i32_0 = arith.constant 0 : i32
    %c0_i32_1 = arith.constant 0 : i32
    return %c0_i32, %c0_i32_0 : i32, i32
  }
  func.func @transform_6(%arg0: i32) -> (i32, i32) {
    %c0_i32 = arith.constant 0 : i32
    %c0_i32_0 = arith.constant 0 : i32
    %c0_i32_1 = arith.constant 0 : i32
    return %c0_i32, %c0_i32_0 : i32, i32
  }
  func.func @transform_7(%arg0: i32) -> (i32, i32) {
    %c0_i32 = arith.constant 0 : i32
    %c0_i32_0 = arith.constant 0 : i32
    %c0_i32_1 = arith.constant 0 : i32
    return %c0_i32, %c0_i32_0 : i32, i32
  }
  func.func @transform_8(%arg0: i32) -> (i32, i32) {
    %c0_i32 = arith.constant 0 : i32
    %c0_i32_0 = arith.constant 0 : i32
    %c0_i32_1 = arith.constant 0 : i32
    return %c0_i32, %c0_i32_0 : i32, i32
  }
  func.func @transform_9(%arg0: i32) -> (i32, i32) {
    %c0_i32 = arith.constant 0 : i32
    %c0_i32_0 = arith.constant 0 : i32
    %c0_i32_1 = arith.constant 0 : i32
    return %c0_i32, %c0_i32_0 : i32, i32
  }
  func.func @transform_10(%arg0: i32) -> (i32, i32) {
    %c0_i32 = arith.constant 0 : i32
    %c0_i32_0 = arith.constant 0 : i32
    %c0_i32_1 = arith.constant 0 : i32
    return %c0_i32, %c0_i32_0 : i32, i32
  }
  func.func @transform_11(%arg0: i32) -> (i32, i32) {
    %c0_i32 = arith.constant 0 : i32
    %c0_i32_0 = arith.constant 0 : i32
    %c0_i32_1 = arith.constant 0 : i32
    return %c0_i32, %c0_i32_0 : i32, i32
  }
  func.func @transform_12(%arg0: i32) -> (i32, i32) {
    %c0_i32 = arith.constant 0 : i32
    %c0_i32_0 = arith.constant 0 : i32
    %c0_i32_1 = arith.constant 0 : i32
    return %c0_i32, %c0_i32_0 : i32, i32
  }
  func.func @transform_13(%arg0: i32) -> (i32, i32) {
    %c0_i32 = arith.constant 0 : i32
    %c0_i32_0 = arith.constant 0 : i32
    %c0_i32_1 = arith.constant 0 : i32
    return %c0_i32, %c0_i32_0 : i32, i32
  }
  func.func @transform_14(%arg0: i32) -> (i32, i32) {
    %c0_i32 = arith.constant 0 : i32
    %c0_i32_0 = arith.constant 0 : i32
    %c0_i32_1 = arith.constant 0 : i32
    return %c0_i32, %c0_i32_0 : i32, i32
  }
  func.func @transform_15(%arg0: i32) -> (i32, i32) {
    %c0_i32 = arith.constant 0 : i32
    %c0_i32_0 = arith.constant 0 : i32
    %c0_i32_1 = arith.constant 0 : i32
    return %c0_i32, %c0_i32_0 : i32, i32
  }
  func.func @transform_16(%arg0: i32) -> (i32, i32) {
    %c0_i32 = arith.constant 0 : i32
    %c0_i32_0 = arith.constant 0 : i32
    %c0_i32_1 = arith.constant 0 : i32
    return %c0_i32, %c0_i32_0 : i32, i32
  }
  func.func @transform_17(%arg0: i32) -> (i32, i32) {
    %c0_i32 = arith.constant 0 : i32
    %c0_i32_0 = arith.constant 0 : i32
    %c0_i32_1 = arith.constant 0 : i32
    return %c0_i32, %c0_i32_0 : i32, i32
  }
  func.func @transform_18(%arg0: i32) -> (i32, i32) {
    %c0_i32 = arith.constant 0 : i32
    %c0_i32_0 = arith.constant 0 : i32
    %c0_i32_1 = arith.constant 0 : i32
    return %c0_i32, %c0_i32_0 : i32, i32
  }
  func.func @transform_19(%arg0: i32) -> (i32, i32) {
    %c0_i32 = arith.constant 0 : i32
    %c0_i32_0 = arith.constant 0 : i32
    %c0_i32_1 = arith.constant 0 : i32
    return %c0_i32, %c0_i32_0 : i32, i32
  }
  func.func @transform_20(%arg0: i32) -> (i32, i32) {
    %c0_i32 = arith.constant 0 : i32
    %c0_i32_0 = arith.constant 0 : i32
    %c0_i32_1 = arith.constant 0 : i32
    return %c0_i32, %c0_i32_0 : i32, i32
  }
  func.func @transform_21(%arg0: i32) -> (i32, i32) {
    %c0_i32 = arith.constant 0 : i32
    %c0_i32_0 = arith.constant 0 : i32
    %c0_i32_1 = arith.constant 0 : i32
    return %c0_i32, %c0_i32_0 : i32, i32
  }
  func.func @transform_22(%arg0: i32) -> (i32, i32) {
    %c0_i32 = arith.constant 0 : i32
    %c0_i32_0 = arith.constant 0 : i32
    %c0_i32_1 = arith.constant 0 : i32
    return %c0_i32, %c0_i32_0 : i32, i32
  }
  func.func @transform_23(%arg0: i32) -> (i32, i32) {
    %c0_i32 = arith.constant 0 : i32
    %c0_i32_0 = arith.constant 0 : i32
    %c0_i32_1 = arith.constant 0 : i32
    return %c0_i32, %c0_i32_0 : i32, i32
  }
  func.func @transform_24(%arg0: i32) -> (i32, i32) {
    %c0_i32 = arith.constant 0 : i32
    %c0_i32_0 = arith.constant 0 : i32
    %c0_i32_1 = arith.constant 0 : i32
    return %c0_i32, %c0_i32_0 : i32, i32
  }
  func.func @transform_25(%arg0: i32) -> (i32, i32) {
    %c0_i32 = arith.constant 0 : i32
    %c0_i32_0 = arith.constant 0 : i32
    %c0_i32_1 = arith.constant 0 : i32
    return %c0_i32, %c0_i32_0 : i32, i32
  }
  func.func @transform_26(%arg0: i32) -> (i32, i32) {
    %c0_i32 = arith.constant 0 : i32
    %c0_i32_0 = arith.constant 0 : i32
    %c0_i32_1 = arith.constant 0 : i32
    return %c0_i32, %c0_i32_0 : i32, i32
  }
  func.func @transform_27(%arg0: i32) -> (i32, i32) {
    %c0_i32 = arith.constant 0 : i32
    %c0_i32_0 = arith.constant 0 : i32
    %c0_i32_1 = arith.constant 0 : i32
    return %c0_i32, %c0_i32_0 : i32, i32
  }
  func.func @transform_28(%arg0: i32) -> (i32, i32) {
    %c0_i32 = arith.constant 0 : i32
    %c0_i32_0 = arith.constant 0 : i32
    %c0_i32_1 = arith.constant 0 : i32
    return %c0_i32, %c0_i32_0 : i32, i32
  }
  func.func @transform_29(%arg0: i32) -> (i32, i32) {
    %c0_i32 = arith.constant 0 : i32
    %c0_i32_0 = arith.constant 0 : i32
    %c0_i32_1 = arith.constant 0 : i32
    return %c0_i32, %c0_i32_0 : i32, i32
  }
  func.func @transform_30(%arg0: i32) -> (i32, i32, i32) {
    %c0_i32 = arith.constant 0 : i32
    %c0_i32_0 = arith.constant 0 : i32
    %c0_i32_1 = arith.constant 0 : i32
    return %arg0, %c0_i32, %c0_i32_0 : i32, i32, i32
  }
}

</mosaic_0001>

<bundles_post_ra>
// kernel: tpu_custom_call.1
= control target key start
LH: loop header
LB: loop body
LE: loop exit
PB: predicated region body
PF: predicated region fallthrough
CT: control target
= control target key end

     0   :  { %s6778_s6 = smov 1   ;;  %s6779_s10 = smov 2   ;;  %s7888_s0 = inlined_call_operand.smem [shape: u32[31], index: -1, kind: input, shape index: {}] }
   0x1   :  { %s6848_s5 = sld [smem:[%s7888_s0]]   ;;  %s6780_s14 = smov 3  }
   0x2   :  { %s6853_s9 = sld [smem:[%s7888_s0 + %s6778_s6]]   ;;  %s6781_s18 = smov 4  }
   0x3   :  { %s6858_s13 = sld [smem:[%s7888_s0 + %s6779_s10]]   ;;  %s6782_s22 = smov 5  }
   0x4   :  { %s6863_s17 = sld [smem:[%s7888_s0 + %s6780_s14]]   ;;  %s6783_s26 = smov 6  }
   0x5   :  { %s6868_s21 = sld [smem:[%s7888_s0 + %s6781_s18]]   ;;  %s6784_s30 = smov 7  }
   0x6   :  { %s6873_s25 = sld [smem:[%s7888_s0 + %s6782_s22]]   ;;  %s6785_s4 = smov 8  }
   0x7   :  { %7918 = sst [smem:[#allocation48_spill]] %s6848_s5  ;;  %s6786_s10 = smov 9  }
   0x8   :  { %7919 = sst [smem:[#allocation49_spill]] %s6853_s9  ;;  %s6787_s15 = smov 10  }
   0x9   :  { %7920 = sst [smem:[#allocation50_spill]] %s6858_s13  ;;  %s6788_s20 = smov 11  }
   0xa   :  { %7921 = sst [smem:[#allocation51_spill]] %s6863_s17  ;;  %s6790_s1 = smov 13  }
   0xb   :  { %7922 = sst [smem:[#allocation52_spill]] %s6868_s21  ;;  %s6791_s7 = smov 14  }
   0xc   :  { %7923 = sst [smem:[#allocation53_spill]] %s6873_s25  ;;  %s6793_s22 = smov 16  }
   0xd   :  { %s6878_s29 = sld [smem:[%s7888_s0 + %s6783_s26]]   ;;  %s6789_s26 = smov 12  }
   0xe   :  { %s6883_s3 = sld [smem:[%s7888_s0 + %s6784_s30]]   ;;  %s6794_s28 = smov 17  }
   0xf   :  { %s6888_s8 = sld [smem:[%s7888_s0 + %s6785_s4]]  }
  0x10   :  { %s6893_s14 = sld [smem:[%s7888_s0 + %s6786_s10]]  }
  0x11   :  { %s6898_s19 = sld [smem:[%s7888_s0 + %s6787_s15]]   ;;  %s6792_s15 = smov 15  }
  0x12   :  { %s6903_s24 = sld [smem:[%s7888_s0 + %s6788_s20]]  }
  0x13   :  { %s6908_s30 = sld [smem:[%s7888_s0 + %s6789_s26]]  }
  0x14   :  { %7924 = sst [smem:[#allocation54_spill]] %s6883_s3 }
  0x15   :  { %7925 = sst [smem:[#allocation55_spill]] %s6888_s8 }
  0x16   :  { %7926 = sst [smem:[#allocation56_spill]] %s6893_s14 }
  0x17   :  { %s6913_s6 = sld [smem:[%s7888_s0 + %s6790_s1]]  }
  0x18   :  { %s6918_s12 = sld [smem:[%s7888_s0 + %s6791_s7]]   ;;  %s6795_s7 = smov 18  }
  0x19   :  { %s6923_s20 = sld [smem:[%s7888_s0 + %s6792_s15]]   ;;  %s6796_s15 = smov 19  }
  0x1a   :  { %s6928_s27 = sld [smem:[%s7888_s0 + %s6793_s22]]   ;;  %s6797_s22 = smov 20  }
  0x1b   :  { %s6933_s4 = sld [smem:[%s7888_s0 + %s6794_s28]]   ;;  %s6798_s28 = smov 21  }
  0x1c   :  { %s6938_s9 = sld [smem:[%s7888_s0 + %s6795_s7]]   ;;  %s6799_s7 = smov 22  }
  0x1d   :  { %7927 = sst [smem:[#allocation57_spill]] %s6913_s6 }
  0x1e   :  { %7928 = sst [smem:[#allocation58_spill]] %s6918_s12 }
  0x1f   :  { %s6943_s3 = sld [smem:[%s7888_s0 + %s6796_s15]]   ;;  %s6800_s15 = smov 23  }
  0x20   :  { %7929 = sst [smem:[#allocation59_spill]] %s6928_s27 }
  0x21   :  { %7930 = sst [smem:[#allocation60_spill]] %s6933_s4 }
  0x22   :  { %7931 = sst [smem:[#allocation61_spill]] %s6938_s9 }
  0x23   :  { %s6948_s14 = sld [smem:[%s7888_s0 + %s6797_s22]]   ;;  %s6801_s22 = smov 24  }
  0x24   :  { %s6953_s25 = sld [smem:[%s7888_s0 + %s6798_s28]]   ;;  %s6802_s28 = smov 25  }
  0x25   :  { %7932 = sst [smem:[#allocation62_spill]] %s6943_s3 }
  0x26   :  { %s6958_s21 = sld [smem:[%s7888_s0 + %s6799_s7]]   ;;  %s6803_s7 = smov 26  }
  0x27   :  { %s6963_s5 = sld [smem:[%s7888_s0 + %s6800_s15]]   ;;  %s6804_s15 = smov 27  }
  0x28   :  { %s6973_s9 = sld [smem:[%s7888_s0 + %s6802_s28]]   ;;  %s6806_s28 = smov 29  }
  0x29   :  { %7933 = sst [smem:[#allocation63_spill]] %s6948_s14 }
  0x2a   :  { %s6968_s14 = sld [smem:[%s7888_s0 + %s6801_s22]]   ;;  %s6805_s22 = smov 28  }
  0x2b   :  { %s6983_s27 = sld [smem:[%s7888_s0 + %s6804_s15]]  }
  0x2c   :  { %7934 = sst [smem:[#allocation64_spill]] %s6958_s21 }
  0x2d   :  { %7935 = sst [smem:[#allocation65_spill]] %s6963_s5 }
  0x2e   :  { %7937 = sst [smem:[#allocation67_spill]] %s6973_s9 }
  0x2f   :  { %s6978_s21 = sld [smem:[%s7888_s0 + %s6803_s7]]   ;;  %s6807_s7 = smov 30  }
  0x30   :  { %7936 = sst [smem:[#allocation66_spill]] %s6968_s14 }
  0x31   :  { %s6988_s14 = sld [smem:[%s7888_s0 + %s6805_s22]]  }
  0x32   :  { %s6993_s12 = sld [smem:[%s7888_s0 + %s6806_s28]]  }
  0x35   :  { %7938 = sst [smem:[#allocation68_spill]] %s6978_s21 }
  0x36   :  { %s6998_s21 = sld [smem:[%s7888_s0 + %s6807_s7]]  }
  0x37   :  { %66 = vsyncpa [#allocation3], 0 }
  0x38   :  { %67 = vsyncpa [#allocation6], 0 }
  0x39   :  { %68 = vsyncpa [#allocation9], 0 }
  0x3a   :  { %69 = vsyncpa [#allocation12], 0 }
  0x3b   :  { %70 = vsyncpa [#allocation15], 0 }
  0x3c   :  { %71 = vsyncpa [#allocation18], 0 }
  0x3d   :  { %72 = vsyncpa [#allocation21], 0 }
  0x3e   :  { %73 = vsyncpa [#allocation24], 0 }
  0x3f   :  { %74 = vsyncpa [#allocation27], 0 }
  0x40   :  { %75 = vsyncpa [#allocation30], 0 }
  0x41   :  { %76 = vsyncpa [#allocation33], 0 }
  0x42   :  { %77 = vsyncpa [#allocation4], 0 }
  0x43   :  { %79 = vsyncpa [#allocation4 + $0x1], 0  ;;  %s7000_s15 = smov 0   ;;  %s7002_s16 = smov 0  }
  0x44   :  { %s7004_s18 = smov 0   ;;  %s7006_s0 = smov 0  }
  0x45 LB: > { %s7939_s13 = sld [smem:[#allocation50_spill]]  ;;  %s7940_s9 = sld [smem:[#allocation67_spill]]  ;;  %s6776_s0 = sphi %s7006_s0, %s8000_s0   ;;  %s6772_s18 = sphi %s7004_s18, %s8002_s18   ;;  %s6768_s16 = sphi %s7002_s16, %s8004_s16   ;;  %s6764_s15 = sphi %s7000_s15, %s8003_s15  }
  0x46   : > { %s7941_s6 = sld [smem:[#allocation57_spill]]  ;;  %s7943_s4 = sld [smem:[#allocation60_spill]] }
  0x47   : > { %s7942_s5 = sld [smem:[#allocation65_spill]]  ;;  %s7944_s3 = sld [smem:[#allocation62_spill]] }
  0x48   : > { %s7945_s8 = sld [smem:[#allocation55_spill]]  ;;  %s7946_s17 = sld [smem:[#allocation51_spill]] }
  0x49   : > { %7947 = sst [smem:[#allocation69_spill]] %s6764_s15  ;;  %s7021_s22 = sadd.s32 4294967295, %s6776_s0  }
  0x4a   : > { %7948 = sst [smem:[#allocation70_spill]] %s6772_s18  ;;  %s5063_s23 = sadd.s32 4294967294, %s6776_s0  }
  0x4b   : > { %s7025_s26 = sadd.s32 1, %s6776_s0   ;;  %s732_s28 = sadd.s32 1, %s6772_s18 }
  0x4c   : > { %7949 = sst [smem:[#allocation71_spill]] %s7025_s26  ;;  %s729_s1 = ssub.s32 %s6776_s0, %s7025_s26 }
  0x4d   : > { %p742_p0 = scmp.ne.s32.totalorder %s6772_s18, %s6768_s16  ;;  %p730_p1 = scmp.eq.s32.totalorder %s729_s1, 0 }
  0x4e   : > { %p743_p2 = scmp.eq.s32.totalorder %s7021_s22, 1  ;;  %p748_p3 = scmp.ne.s32.totalorder %s6768_s16, %s6764_s15 }
  0x4f   : > { %p749_p4 = scmp.eq.s32.totalorder %s5063_s23, 1  ;;  %p5064_p7 = scmp.ge.s32.totalorder %s6776_s0, 1 }
  0x50   : > { %s7036_s2 = scalar_select %p730_p1, %s6772_s18, %s732_s28  }
  0x51   : > { %p7038_p5 = por %p743_p2, %p742_p0  ;;  %p7042_p6 = por %p749_p4, %p748_p3 }
  0x52   : > { %7950 = sst [smem:[#allocation72_spill]] %s7036_s2  ;;  %p756_p8 = scmp.lt.s32.totalorder %s6776_s0, 3 }
  0x53   : > { %s7951_s7 = scalar_select %p7038_p5, 1, 0 }
  0x54   : > { %s7952_s10 = scalar_select %p7042_p6, 1, 0 }
  0x55   : > { %p7901_p9 = scmp.eq.s32.totalorder %s7021_s22, 0  ;;  %p7049_p10 = pnand %p5064_p7, %p756_p8 }
  0x56   : > { %7953 = sst [smem:[#allocation73_spill]] %s7952_s10  ;;  %s6808_s23 = smov [#allocation5]  }
  0x57   : > { %s7954_s11 = scalar_select %p7049_p10, 1, 0 }
  0x58   : > { %s780_s28 = sshll.u32 %s6808_s23, 4  ;;  %p5729_p11 = pneg %p7049_p10  ;;  %s781_s28 = int_to_ptr.vmem [resolvable:$true] %s780_s28 }
  0x59   : > { %s6809_s2 = smov [#allocation8]   ;;  %s6810_s26 = smov [#allocation11]  }
  0x5a   : > { %p7057_p12 = pnand %p7901_p9, %p5729_p11  ;;  %s812_s18 = sshll.u32 %s6809_s2, 4  ;;  %s7061_s18 = int_to_ptr.vmem [resolvable:$true] %s812_s18 }
  0x5b   : > { %s7063_s10 = sshll.u32 %s6810_s26, 4  ;;  %s6082_s15 = scalar_lea.hbm %s7946_s17, 128  ;;  %s843_s10 = int_to_ptr.vmem [resolvable:$true] %s7063_s10 }
  0x5c   : > { %p6083_p13 = scmp.ne.s32.totalorder %s7946_s17, %s6082_s15  ;;  %p7069_p0 = pneg %p7057_p12 }
  0x5d   : > { %p6089_p3 = scmp.lt.u32.totalorder %s6082_s15, %s7946_s17 }
  0x5e   : > { %p6085_p1 = pnand %p7069_p0, %p6083_p13 }
  0x60   : > { %p6086_p2 = pneg %p6085_p1 }
  0x62   : > { %p6091_p4 = pnand %p6089_p3, %p6086_p2 }
  0x64   : > { %6094 = shalt.err (!%p6091_p4)
}
  0x65   : > { %s6095_s2 = scalar_lea.vmem %s781_s28, 128  ;;  %p6103_p9 = scmp.lt.s32.totalorder %s781_s28, %s781_s28 }
  0x66   : > { %p6096_p7 = scmp.ne.s32.totalorder %s781_s28, %s6095_s2  ;;  %p6104_p6 = scmp.lt.s32.totalorder %s6095_s2, %s6095_s2 }
  0x68   : > { %p6098_p8 = pnand %p6096_p7, %p7069_p0  ;;  %p6105_p5 = por %p6104_p6, %p6103_p9 }
  0x6a   : > { %p6099_p11 = pneg %p6098_p8 }
  0x6c   : > { %p6106_p10 = pnand %p6105_p5, %p6099_p11 }
  0x6e   : > { %6109 = shalt.err (!%p6106_p10)
}
  0x6f   : > { %5735 = dma.hbm_to_vmem [thread:$0]  (!%p7057_p12), %s7946_s17, 128, %s781_s28, [#allocation6]  }
  0x70   : > { %s6110_s15 = scalar_lea.hbm %s7945_s8, 1024 }
  0x71   : > { %p6111_p13 = scmp.ne.s32.totalorder %s7945_s8, %s6110_s15  ;;  %p6117_p3 = scmp.lt.u32.totalorder %s6110_s15, %s7945_s8 }
  0x73   : > { %p6113_p1 = pnand %p6111_p13, %p7069_p0 }
  0x75   : > { %p6114_p2 = pneg %p6113_p1 }
  0x77   : > { %p6119_p4 = pnand %p6117_p3, %p6114_p2 }
  0x79   : > { %6122 = shalt.err (!%p6119_p4)
}
  0x7a   : > { %s6123_s26 = scalar_lea.vmem %s7061_s18, 1024  ;;  %p6131_p10 = scmp.lt.s32.totalorder %s7061_s18, %s7061_s18 }
  0x7b   : > { %p6124_p5 = scmp.ne.s32.totalorder %s7061_s18, %s6123_s26  ;;  %p6132_p7 = scmp.lt.s32.totalorder %s6123_s26, %s6123_s26 }
  0x7d   : > { %p6126_p6 = pnand %p6124_p5, %p7069_p0  ;;  %p6133_p8 = por %p6132_p7, %p6131_p10 }
  0x7f   : > { %p6127_p9 = pneg %p6126_p6 }
  0x81   : > { %p6134_p11 = pnand %p6133_p8, %p6127_p9 }
  0x83   : > { %6137 = shalt.err (!%p6134_p11)
}
  0x84   : > { %s7905_s28 = smov 64   ;;  %s7907_s2 = smov 4  }
  0x85   : > { %5741 = dma.hbm_to_vmem [thread:$0]  (!%p7057_p12), %s7945_s8, 1024, %s7061_s18, [#allocation9], %s7905_s28, %s7905_s28, %s7907_s2  }
  0x86   : > { %s6138_s15 = scalar_lea.hbm %s6903_s24, 16 }
  0x87   : > { %p6139_p13 = scmp.ne.s32.totalorder %s6903_s24, %s6138_s15  ;;  %p6145_p3 = scmp.lt.u32.totalorder %s6138_s15, %s6903_s24 }
  0x89   : > { %p6141_p1 = pnand %p6139_p13, %p7069_p0 }
  0x8b   : > { %p6142_p2 = pneg %p6141_p1 }
  0x8d   : > { %p6147_p4 = pnand %p6145_p3, %p6142_p2 }
  0x8f   : > { %6150 = shalt.err (!%p6147_p4)
}
  0x90   : > { %s6151_s26 = scalar_lea.vmem %s843_s10, 16  ;;  %s6158_s17 = scalar_lea.vmem %s843_s10, 32 }
  0x91   : > { %p6152_p5 = scmp.ne.s32.totalorder %s843_s10, %s6151_s26  ;;  %p6159_p10 = scmp.lt.s32.totalorder %s843_s10, %s843_s10 }
  0x92   : > { %p6160_p7 = scmp.lt.s32.totalorder %s6158_s17, %s6151_s26 }
  0x93   : > { %p6154_p6 = pnand %p6152_p5, %p7069_p0 }
  0x94   : > { %p6161_p8 = por %p6160_p7, %p6159_p10 }
  0x95   : > { %p6155_p9 = pneg %p6154_p6 }
  0x97   : > { %p6162_p11 = pnand %p6161_p8, %p6155_p9 }
  0x99   : > { %6165 = shalt.err (!%p6162_p11)
}
  0x9a   : > { %5747 = dma.hbm_to_vmem [thread:$0]  (!%p7057_p12), %s6903_s24, 16, %s843_s10, [#allocation12]  }
  0x9b   : > { %s6813_s18 = smov [#allocation14]   ;;  %s6814_s28 = smov [#allocation17]  }
  0x9c   : > { %s866_s15 = sshll.u32 %s6813_s18, 4  ;;  %s888_s2 = sshll.u32 %s6814_s28, 4  ;;  %s867_s15 = int_to_ptr.vmem [resolvable:$true] %s866_s15  ;;  %s889_s2 = int_to_ptr.vmem [resolvable:$true] %s888_s2 }
  0x9d   : > { %s6166_s8 = scalar_lea.hbm %s7941_s6, 16 }
  0x9e   : > { %p6167_p13 = scmp.ne.s32.totalorder %s7941_s6, %s6166_s8  ;;  %p6173_p3 = scmp.lt.u32.totalorder %s6166_s8, %s7941_s6 }
  0xa0   : > { %p6169_p1 = pnand %p6167_p13, %p7069_p0 }
  0xa2   : > { %p6170_p2 = pneg %p6169_p1 }
  0xa4   : > { %p6175_p4 = pnand %p6173_p3, %p6170_p2 }
  0xa6   : > { %6178 = shalt.err (!%p6175_p4)
}
  0xa7   : > { %s6179_s17 = scalar_lea.vmem %s867_s15, 16  ;;  %s6186_s10 = scalar_lea.vmem %s867_s15, 32 }
  0xa8   : > { %p6180_p5 = scmp.ne.s32.totalorder %s867_s15, %s6179_s17  ;;  %p6187_p10 = scmp.lt.s32.totalorder %s867_s15, %s867_s15 }
  0xa9   : > { %p6188_p7 = scmp.lt.s32.totalorder %s6186_s10, %s6179_s17 }
  0xaa   : > { %p6182_p6 = pnand %p6180_p5, %p7069_p0 }
  0xab   : > { %p6189_p8 = por %p6188_p7, %p6187_p10 }
  0xac   : > { %p6183_p9 = pneg %p6182_p6 }
  0xae   : > { %p6190_p11 = pnand %p6189_p8, %p6183_p9 }
  0xb0   : > { %6193 = shalt.err (!%p6190_p11)
}
  0xb1   : > { %5753 = dma.hbm_to_vmem [thread:$0]  (!%p7057_p12), %s7941_s6, 16, %s867_s15, [#allocation15]  }
  0xb2   : > { %s6194_s8 = scalar_lea.hbm %s6923_s20, 16 }
  0xb3   : > { %p6195_p13 = scmp.ne.s32.totalorder %s6923_s20, %s6194_s8  ;;  %p6201_p3 = scmp.lt.u32.totalorder %s6194_s8, %s6923_s20 }
  0xb5   : > { %p6197_p1 = pnand %p6195_p13, %p7069_p0 }
  0xb7   : > { %p6198_p2 = pneg %p6197_p1 }
  0xb9   : > { %p6203_p4 = pnand %p6201_p3, %p6198_p2 }
  0xbb   : > { %6206 = shalt.err (!%p6203_p4)
}
  0xbc   : > { %s6207_s28 = scalar_lea.vmem %s889_s2, 16  ;;  %s6214_s26 = scalar_lea.vmem %s889_s2, 32 }
  0xbd   : > { %p6208_p5 = scmp.ne.s32.totalorder %s889_s2, %s6207_s28  ;;  %p6215_p10 = scmp.lt.s32.totalorder %s889_s2, %s889_s2 }
  0xbe   : > { %p6216_p7 = scmp.lt.s32.totalorder %s6214_s26, %s6207_s28 }
  0xbf   : > { %p6210_p6 = pnand %p6208_p5, %p7069_p0 }
  0xc0   : > { %p6217_p8 = por %p6216_p7, %p6215_p10 }
  0xc1   : > { %p6211_p9 = pneg %p6210_p6 }
  0xc3   : > { %p6218_p11 = pnand %p6217_p8, %p6211_p9 }
  0xc5   : > { %6221 = shalt.err (!%p6218_p11)
}
  0xc6   : > { %5759 = dma.hbm_to_vmem [thread:$0]  (!%p7057_p12), %s6923_s20, 16, %s889_s2, [#allocation18]  }
  0xc7   : > { %s6815_s18 = smov [#allocation20]   ;;  %s6816_s17 = smov [#allocation23]  }
  0xc8   : > { %s912_s15 = sshll.u32 %s6815_s18, 4  ;;  %s936_s10 = sshll.u32 %s6816_s17, 4  ;;  %s913_s15 = int_to_ptr.vmem [resolvable:$true] %s912_s15  ;;  %s937_s10 = int_to_ptr.vmem [resolvable:$true] %s936_s10 }
  0xc9   : > { %s6222_s8 = scalar_lea.hbm %s7943_s4, 16 }
  0xca   : > { %p6223_p13 = scmp.ne.s32.totalorder %s7943_s4, %s6222_s8  ;;  %p6229_p3 = scmp.lt.u32.totalorder %s6222_s8, %s7943_s4 }
  0xcc   : > { %p6225_p1 = pnand %p6223_p13, %p7069_p0 }
  0xce   : > { %p6226_p2 = pneg %p6225_p1 }
  0xd0   : > { %p6231_p4 = pnand %p6229_p3, %p6226_p2 }
  0xd2   : > { %6234 = shalt.err (!%p6231_p4)
}
  0xd3   : > { %s6235_s28 = scalar_lea.vmem %s913_s15, 16  ;;  %s6242_s2 = scalar_lea.vmem %s913_s15, 32 }
  0xd4   : > { %p6236_p5 = scmp.ne.s32.totalorder %s913_s15, %s6235_s28  ;;  %p6243_p10 = scmp.lt.s32.totalorder %s913_s15, %s913_s15 }
  0xd5   : > { %p6244_p7 = scmp.lt.s32.totalorder %s6242_s2, %s6235_s28 }
  0xd6   : > { %p6238_p6 = pnand %p6236_p5, %p7069_p0 }
  0xd7   : > { %p6245_p8 = por %p6244_p7, %p6243_p10 }
  0xd8   : > { %p6239_p9 = pneg %p6238_p6 }
  0xda   : > { %p6246_p11 = pnand %p6245_p8, %p6239_p9 }
  0xdc   : > { %6249 = shalt.err (!%p6246_p11)
}
  0xdd   : > { %5765 = dma.hbm_to_vmem [thread:$0]  (!%p7057_p12), %s7943_s4, 16, %s913_s15, [#allocation21]  }
  0xde   : > { %s6250_s26 = scalar_lea.hbm %s7944_s3, 16 }
  0xdf   : > { %p6251_p13 = scmp.ne.s32.totalorder %s7944_s3, %s6250_s26  ;;  %p6257_p3 = scmp.lt.u32.totalorder %s6250_s26, %s7944_s3 }
  0xe1   : > { %p6253_p1 = pnand %p6251_p13, %p7069_p0 }
  0xe3   : > { %p6254_p2 = pneg %p6253_p1 }
  0xe5   : > { %p6259_p4 = pnand %p6257_p3, %p6254_p2 }
  0xe7   : > { %6262 = shalt.err (!%p6259_p4)
}
  0xe8   : > { %s6263_s18 = scalar_lea.vmem %s937_s10, 16  ;;  %s6270_s17 = scalar_lea.vmem %s937_s10, 32 }
  0xe9   : > { %p6264_p5 = scmp.ne.s32.totalorder %s937_s10, %s6263_s18  ;;  %p6271_p10 = scmp.lt.s32.totalorder %s937_s10, %s937_s10 }
  0xea   : > { %p6272_p7 = scmp.lt.s32.totalorder %s6270_s17, %s6263_s18 }
  0xeb   : > { %p6266_p6 = pnand %p6264_p5, %p7069_p0 }
  0xec   : > { %p6273_p8 = por %p6272_p7, %p6271_p10 }
  0xed   : > { %p6267_p9 = pneg %p6266_p6 }
  0xef   : > { %p6274_p11 = pnand %p6273_p8, %p6267_p9 }
  0xf1   : > { %6277 = shalt.err (!%p6274_p11)
}
  0xf2   : > { %5771 = dma.hbm_to_vmem [thread:$0]  (!%p7057_p12), %s7944_s3, 16, %s937_s10, [#allocation24]  }
  0xf3   : > { %s6817_s15 = smov [#allocation26]   ;;  %s6818_s28 = smov [#allocation29]  }
  0xf4   : > { %s960_s8 = sshll.u32 %s6817_s15, 4  ;;  %s984_s2 = sshll.u32 %s6818_s28, 4  ;;  %s961_s8 = int_to_ptr.vmem [resolvable:$true] %s960_s8  ;;  %s985_s2 = int_to_ptr.vmem [resolvable:$true] %s984_s2 }
  0xf5   : > { %s6278_s26 = scalar_lea.hbm %s6953_s25, 16 }
  0xf6   : > { %p6279_p13 = scmp.ne.s32.totalorder %s6953_s25, %s6278_s26  ;;  %p6285_p3 = scmp.lt.u32.totalorder %s6278_s26, %s6953_s25 }
  0xf8   : > { %p6281_p1 = pnand %p6279_p13, %p7069_p0 }
  0xfa   : > { %p6282_p2 = pneg %p6281_p1 }
  0xfc   : > { %p6287_p4 = pnand %p6285_p3, %p6282_p2 }
  0xfe   : > { %6290 = shalt.err (!%p6287_p4)
}
  0xff   : > { %s6291_s18 = scalar_lea.vmem %s961_s8, 16  ;;  %s6298_s10 = scalar_lea.vmem %s961_s8, 32 }
 0x100   : > { %p6292_p5 = scmp.ne.s32.totalorder %s961_s8, %s6291_s18  ;;  %p6299_p10 = scmp.lt.s32.totalorder %s961_s8, %s961_s8 }
 0x101   : > { %p6300_p7 = scmp.lt.s32.totalorder %s6298_s10, %s6291_s18 }
 0x102   : > { %p6294_p6 = pnand %p6292_p5, %p7069_p0 }
 0x103   : > { %p6301_p8 = por %p6300_p7, %p6299_p10 }
 0x104   : > { %p6295_p9 = pneg %p6294_p6 }
 0x106   : > { %p6302_p11 = pnand %p6301_p8, %p6295_p9 }
 0x108   : > { %6305 = shalt.err (!%p6302_p11)
}
 0x109   : > { %5777 = dma.hbm_to_vmem [thread:$0]  (!%p7057_p12), %s6953_s25, 16, %s961_s8, [#allocation27]  }
 0x10a   : > { %s6306_s17 = scalar_lea.hbm %s7942_s5, 16 }
 0x10b   : > { %p6307_p13 = scmp.ne.s32.totalorder %s7942_s5, %s6306_s17  ;;  %p6313_p3 = scmp.lt.u32.totalorder %s6306_s17, %s7942_s5 }
 0x10d   : > { %p6309_p1 = pnand %p6307_p13, %p7069_p0 }
 0x10f   : > { %p6310_p2 = pneg %p6309_p1 }
 0x111   : > { %p6315_p4 = pnand %p6313_p3, %p6310_p2 }
 0x113   : > { %6318 = shalt.err (!%p6315_p4)
}
 0x114   : > { %s6319_s15 = scalar_lea.vmem %s985_s2, 16  ;;  %s6326_s28 = scalar_lea.vmem %s985_s2, 32 }
 0x115   : > { %p6320_p5 = scmp.ne.s32.totalorder %s985_s2, %s6319_s15  ;;  %p6327_p10 = scmp.lt.s32.totalorder %s985_s2, %s985_s2 }
 0x116   : > { %p6328_p7 = scmp.lt.s32.totalorder %s6326_s28, %s6319_s15 }
 0x117   : > { %p6322_p6 = pnand %p6320_p5, %p7069_p0 }
 0x118   : > { %p6329_p8 = por %p6328_p7, %p6327_p10 }
 0x119   : > { %p6323_p9 = pneg %p6322_p6 }
 0x11b   : > { %p6330_p11 = pnand %p6329_p8, %p6323_p9 }
 0x11d   : > { %6333 = shalt.err (!%p6330_p11)
}
 0x11e   : > { %5783 = dma.hbm_to_vmem [thread:$0]  (!%p7057_p12), %s7942_s5, 16, %s985_s2, [#allocation30]  }
 0x11f   : > { %s6819_s8 = smov [#allocation32]   ;;  %s6820_s18 = smov [#allocation2]  }
 0x120   : > { %s1006_s26 = sshll.u32 %s6819_s8, 4  ;;  %s769_s10 = sshll.u32 %s6820_s18, 4  ;;  %s1007_s26 = int_to_ptr.vmem [resolvable:$true] %s1006_s26  ;;  %s770_s10 = int_to_ptr.vmem [resolvable:$true] %s769_s10 }
 0x121   : > { %s6334_s17 = scalar_lea.hbm %s7940_s9, 16 }
 0x122   : > { %p6335_p13 = scmp.ne.s32.totalorder %s7940_s9, %s6334_s17  ;;  %p6341_p3 = scmp.lt.u32.totalorder %s6334_s17, %s7940_s9 }
 0x124   : > { %p6337_p1 = pnand %p6335_p13, %p7069_p0 }
 0x126   : > { %p6338_p2 = pneg %p6337_p1 }
 0x128   : > { %p6343_p4 = pnand %p6341_p3, %p6338_p2 }
 0x12a   : > { %6346 = shalt.err (!%p6343_p4)
}
 0x12b   : > { %s6347_s15 = scalar_lea.vmem %s1007_s26, 16  ;;  %s6354_s2 = scalar_lea.vmem %s1007_s26, 32 }
 0x12c   : > { %p6348_p5 = scmp.ne.s32.totalorder %s1007_s26, %s6347_s15  ;;  %p6355_p10 = scmp.lt.s32.totalorder %s1007_s26, %s1007_s26 }
 0x12d   : > { %p6356_p7 = scmp.lt.s32.totalorder %s6354_s2, %s6347_s15 }
 0x12e   : > { %p6350_p6 = pnand %p6348_p5, %p7069_p0 }
 0x12f   : > { %p6357_p8 = por %p6356_p7, %p6355_p10 }
 0x130   : > { %p6351_p9 = pneg %p6350_p6 }
 0x132   : > { %p6358_p11 = pnand %p6357_p8, %p6351_p9 }
 0x134   : > { %6361 = shalt.err (!%p6358_p11)
}
 0x135   : > { %5789 = dma.hbm_to_vmem [thread:$0]  (!%p7057_p12), %s7940_s9, 16, %s1007_s26, [#allocation33]  }
 0x136   : > { %s6362_s28 = scalar_lea.hbm %s7939_s13, 128 }
 0x137   : > { %p6363_p13 = scmp.ne.s32.totalorder %s7939_s13, %s6362_s28  ;;  %p6369_p3 = scmp.lt.u32.totalorder %s6362_s28, %s7939_s13 }
 0x139   : > { %p6365_p1 = pnand %p6363_p13, %p7069_p0 }
 0x13b   : > { %p6366_p2 = pneg %p6365_p1 }
 0x13d   : > { %p6371_p4 = pnand %p6369_p3, %p6366_p2 }
 0x13f   : > { %6374 = shalt.err (!%p6371_p4)
}
 0x140   : > { %s6375_s8 = scalar_lea.vmem %s770_s10, 128  ;;  %p6383_p10 = scmp.lt.s32.totalorder %s770_s10, %s770_s10 }
 0x141   : > { %p6376_p5 = scmp.ne.s32.totalorder %s770_s10, %s6375_s8  ;;  %p6384_p7 = scmp.lt.s32.totalorder %s6375_s8, %s6375_s8 }
 0x143   : > { %p6378_p6 = pnand %p6376_p5, %p7069_p0  ;;  %p6385_p8 = por %p6384_p7, %p6383_p10 }
 0x145   : > { %p6379_p9 = pneg %p6378_p6 }
 0x147   : > { %p6386_p11 = pnand %p6385_p8, %p6379_p9 }
 0x149   : > { %6389 = shalt.err (!%p6386_p11)
}
 0x14a   : > { %5732 = dma.hbm_to_vmem [thread:$0]  (!%p7057_p12), %s7939_s13, 128, %s770_s10, [#allocation3]  }
 0x14b   : > { %s6821_s26 = smov [#allocation7]   ;;  %s6822_s17 = smov [#allocation10]  }
 0x14c   : > { %s796_s18 = sshll.u32 %s6821_s26, 4  ;;  %s828_s15 = sshll.u32 %s6822_s17, 4  ;;  %s797_s18 = int_to_ptr.vmem [resolvable:$true] %s796_s18  ;;  %s829_s15 = int_to_ptr.vmem [resolvable:$true] %s828_s15 }
 0x14d   : > { %s6390_s2 = scalar_lea.hbm %s6878_s29, 1024 }
 0x14e   : > { %p6391_p13 = scmp.ne.s32.totalorder %s6878_s29, %s6390_s2  ;;  %p6397_p3 = scmp.lt.u32.totalorder %s6390_s2, %s6878_s29 }
 0x150   : > { %p6393_p1 = pnand %p6391_p13, %p7069_p0 }
 0x152   : > { %p6394_p2 = pneg %p6393_p1 }
 0x154   : > { %p6399_p4 = pnand %p6397_p3, %p6394_p2 }
 0x156   : > { %6402 = shalt.err (!%p6399_p4)
}
 0x157   : > { %s6403_s28 = scalar_lea.vmem %s797_s18, 1024  ;;  %p6411_p10 = scmp.lt.s32.totalorder %s797_s18, %s797_s18 }
 0x158   : > { %p6404_p5 = scmp.ne.s32.totalorder %s797_s18, %s6403_s28  ;;  %p6412_p7 = scmp.lt.s32.totalorder %s6403_s28, %s6403_s28 }
 0x15a   : > { %p6406_p6 = pnand %p6404_p5, %p7069_p0  ;;  %p6413_p8 = por %p6412_p7, %p6411_p10 }
 0x15c   : > { %p6407_p9 = pneg %p6406_p6 }
 0x15e   : > { %p6414_p11 = pnand %p6413_p8, %p6407_p9 }
 0x160   : > { %6417 = shalt.err (!%p6414_p11)
}
 0x161   : > { %s7957_s10 = smov 4   ;;  %s7958_s8 = smov 64  }
 0x162   : > { %5738 = dma.hbm_to_vmem [thread:$0]  (!%p7057_p12), %s6878_s29, 1024, %s797_s18, [#allocation6], %s7958_s8, %s7958_s8, %s7957_s10  }
 0x163   : > { %s6418_s26 = scalar_lea.hbm %s6898_s19, 1024 }
 0x164   : > { %p6419_p13 = scmp.ne.s32.totalorder %s6898_s19, %s6418_s26  ;;  %p6425_p3 = scmp.lt.u32.totalorder %s6418_s26, %s6898_s19 }
 0x166   : > { %p6421_p1 = pnand %p6419_p13, %p7069_p0 }
 0x168   : > { %p6422_p2 = pneg %p6421_p1 }
 0x16a   : > { %p6427_p4 = pnand %p6425_p3, %p6422_p2 }
 0x16c   : > { %6430 = shalt.err (!%p6427_p4)
}
 0x16d   : > { %s6431_s17 = scalar_lea.vmem %s829_s15, 1024  ;;  %p6439_p10 = scmp.lt.s32.totalorder %s829_s15, %s829_s15 }
 0x16e   : > { %p6432_p5 = scmp.ne.s32.totalorder %s829_s15, %s6431_s17  ;;  %p6440_p7 = scmp.lt.s32.totalorder %s6431_s17, %s6431_s17 }
 0x170   : > { %p6434_p6 = pnand %p6432_p5, %p7069_p0  ;;  %p6441_p8 = por %p6440_p7, %p6439_p10 }
 0x172   : > { %p6435_p9 = pneg %p6434_p6 }
 0x174   : > { %p6442_p11 = pnand %p6441_p8, %p6435_p9 }
 0x176   : > { %6445 = shalt.err (!%p6442_p11)
}
 0x177   : > { %5744 = dma.hbm_to_vmem [thread:$0]  (!%p7057_p12), %s6898_s19, 1024, %s829_s15, [#allocation9], %s7958_s8, %s7958_s8, %s7957_s10  }
 0x178   : > { %s6823_s18 = smov [#allocation13]   ;;  %s6824_s28 = smov [#allocation16]  }
 0x179   : > { %s852_s2 = sshll.u32 %s6823_s18, 4  ;;  %s877_s26 = sshll.u32 %s6824_s28, 4  ;;  %s853_s2 = int_to_ptr.vmem [resolvable:$true] %s852_s2  ;;  %s878_s26 = int_to_ptr.vmem [resolvable:$true] %s877_s26 }
 0x17a   : > { %s6446_s17 = scalar_lea.hbm %s6908_s30, 1024 }
 0x17b   : > { %p6447_p13 = scmp.ne.s32.totalorder %s6908_s30, %s6446_s17  ;;  %p6453_p3 = scmp.lt.u32.totalorder %s6446_s17, %s6908_s30 }
 0x17d   : > { %p6449_p1 = pnand %p6447_p13, %p7069_p0 }
 0x17f   : > { %p6450_p2 = pneg %p6449_p1 }
 0x181   : > { %p6455_p4 = pnand %p6453_p3, %p6450_p2 }
 0x183   : > { %6458 = shalt.err (!%p6455_p4)
}
 0x184   : > { %s6459_s3 = scalar_lea.vmem %s853_s2, 1024  ;;  %p6467_p10 = scmp.lt.s32.totalorder %s853_s2, %s853_s2 }
 0x185   : > { %p6460_p5 = scmp.ne.s32.totalorder %s853_s2, %s6459_s3  ;;  %p6468_p7 = scmp.lt.s32.totalorder %s6459_s3, %s6459_s3 }
 0x187   : > { %p6462_p6 = pnand %p6460_p5, %p7069_p0  ;;  %p6469_p8 = por %p6468_p7, %p6467_p10 }
 0x189   : > { %p6463_p9 = pneg %p6462_p6 }
 0x18b   : > { %p6470_p11 = pnand %p6469_p8, %p6463_p9 }
 0x18d   : > { %6473 = shalt.err (!%p6470_p11)
}
 0x18e   : > { %s7959_s15 = sld [smem:[#allocation58_spill]] }
 0x18f   : > { %5750 = dma.hbm_to_vmem [thread:$0]  (!%p7057_p12), %s6908_s30, 1024, %s853_s2, [#allocation12], %s7958_s8, %s7958_s8, %s7957_s10  }
 0x194   : > { %s7960_s28 = smov %s7959_s15  ;;  %s6474_s18 = scalar_lea.hbm %s7959_s15, 16 }
 0x195   : > { %p6475_p13 = scmp.ne.s32.totalorder %s7960_s28, %s6474_s18  ;;  %p6481_p3 = scmp.lt.u32.totalorder %s6474_s18, %s7960_s28 }
 0x197   : > { %p6477_p1 = pnand %p6475_p13, %p7069_p0 }
 0x199   : > { %p6478_p2 = pneg %p6477_p1 }
 0x19b   : > { %p6483_p4 = pnand %p6481_p3, %p6478_p2 }
 0x19d   : > { %6486 = shalt.err (!%p6483_p4)
}
 0x19e   : > { %s6487_s3 = scalar_lea.vmem %s878_s26, 16  ;;  %s6494_s17 = scalar_lea.vmem %s878_s26, 32 }
 0x19f   : > { %p6488_p5 = scmp.ne.s32.totalorder %s878_s26, %s6487_s3  ;;  %p6495_p10 = scmp.lt.s32.totalorder %s878_s26, %s878_s26 }
 0x1a0   : > { %p6496_p7 = scmp.lt.s32.totalorder %s6494_s17, %s6487_s3 }
 0x1a1   : > { %p6490_p6 = pnand %p6488_p5, %p7069_p0 }
 0x1a2   : > { %p6497_p8 = por %p6496_p7, %p6495_p10 }
 0x1a3   : > { %p6491_p9 = pneg %p6490_p6 }
 0x1a5   : > { %p6498_p11 = pnand %p6497_p8, %p6491_p9 }
 0x1a7   : > { %6501 = shalt.err (!%p6498_p11)
}
 0x1a8   : > { %s7961_s2 = sld [smem:[#allocation59_spill]]  ;;  %s6825_s15 = smov [#allocation19]  }
 0x1a9   : > { %5756 = dma.hbm_to_vmem [thread:$0]  (!%p7057_p12), %s7960_s28, 16, %s878_s26, [#allocation15]  }
 0x1aa   : > { %s898_s18 = sshll.u32 %s6825_s15, 4  ;;  %s6826_s4 = smov [#allocation22]   ;;  %s899_s18 = int_to_ptr.vmem [resolvable:$true] %s898_s18 }
 0x1ab   : > { %s922_s5 = sshll.u32 %s6826_s4, 4  ;;  %s923_s5 = int_to_ptr.vmem [resolvable:$true] %s922_s5 }
 0x1ae   : > { %s6502_s6 = scalar_lea.hbm %s7961_s2, 1024 }
 0x1af   : > { %p6503_p13 = scmp.ne.s32.totalorder %s7961_s2, %s6502_s6  ;;  %p6509_p3 = scmp.lt.u32.totalorder %s6502_s6, %s7961_s2 }
 0x1b1   : > { %p6505_p1 = pnand %p6503_p13, %p7069_p0 }
 0x1b3   : > { %p6506_p2 = pneg %p6505_p1 }
 0x1b5   : > { %p6511_p4 = pnand %p6509_p3, %p6506_p2 }
 0x1b7   : > { %6514 = shalt.err (!%p6511_p4)
}
 0x1b8   : > { %s6515_s3 = scalar_lea.vmem %s899_s18, 1024  ;;  %p6523_p10 = scmp.lt.s32.totalorder %s899_s18, %s899_s18 }
 0x1b9   : > { %p6516_p5 = scmp.ne.s32.totalorder %s899_s18, %s6515_s3  ;;  %p6524_p7 = scmp.lt.s32.totalorder %s6515_s3, %s6515_s3 }
 0x1bb   : > { %p6518_p6 = pnand %p6516_p5, %p7069_p0  ;;  %p6525_p8 = por %p6524_p7, %p6523_p10 }
 0x1bd   : > { %p6519_p9 = pneg %p6518_p6 }
 0x1bf   : > { %p6526_p11 = pnand %p6525_p8, %p6519_p9 }
 0x1c1   : > { %6529 = shalt.err (!%p6526_p11)
}
 0x1c2   : > { %s7962_s6 = sld [smem:[#allocation61_spill]] }
 0x1c3   : > { %5762 = dma.hbm_to_vmem [thread:$0]  (!%p7057_p12), %s7961_s2, 1024, %s899_s18, [#allocation18], %s7958_s8, %s7958_s8, %s7957_s10  }
 0x1c8   : > { %s6530_s4 = scalar_lea.hbm %s7962_s6, 1024 }
 0x1c9   : > { %p6531_p13 = scmp.ne.s32.totalorder %s7962_s6, %s6530_s4  ;;  %p6537_p3 = scmp.lt.u32.totalorder %s6530_s4, %s7962_s6 }
 0x1cb   : > { %p6533_p1 = pnand %p6531_p13, %p7069_p0 }
 0x1cd   : > { %p6534_p2 = pneg %p6533_p1 }
 0x1cf   : > { %p6539_p4 = pnand %p6537_p3, %p6534_p2 }
 0x1d1   : > { %6542 = shalt.err (!%p6539_p4)
}
 0x1d2   : > { %s6543_s26 = scalar_lea.vmem %s923_s5, 1024  ;;  %p6551_p10 = scmp.lt.s32.totalorder %s923_s5, %s923_s5 }
 0x1d3   : > { %p6544_p5 = scmp.ne.s32.totalorder %s923_s5, %s6543_s26  ;;  %p6552_p7 = scmp.lt.s32.totalorder %s6543_s26, %s6543_s26 }
 0x1d5   : > { %p6546_p6 = pnand %p6544_p5, %p7069_p0  ;;  %p6553_p8 = por %p6552_p7, %p6551_p10 }
 0x1d7   : > { %p6547_p9 = pneg %p6546_p6 }
 0x1d9   : > { %p6554_p11 = pnand %p6553_p8, %p6547_p9 }
 0x1db   : > { %6557 = shalt.err (!%p6554_p11)
}
 0x1dc   : > { %s7963_s17 = sld [smem:[#allocation63_spill]]  ;;  %s6827_s15 = smov [#allocation25]  }
 0x1dd   : > { %5768 = dma.hbm_to_vmem [thread:$0]  (!%p7057_p12), %s7962_s6, 1024, %s923_s5, [#allocation21], %s7958_s8, %s7958_s8, %s7957_s10  }
 0x1de   : > { %s946_s18 = sshll.u32 %s6827_s15, 4  ;;  %s6828_s3 = smov [#allocation28]   ;;  %s947_s18 = int_to_ptr.vmem [resolvable:$true] %s946_s18 }
 0x1df   : > { %s970_s4 = sshll.u32 %s6828_s3, 4  ;;  %s971_s4 = int_to_ptr.vmem [resolvable:$true] %s970_s4 }
 0x1e2   : > { %s6558_s26 = scalar_lea.hbm %s7963_s17, 1024 }
 0x1e3   : > { %p6559_p13 = scmp.ne.s32.totalorder %s7963_s17, %s6558_s26  ;;  %p6565_p3 = scmp.lt.u32.totalorder %s6558_s26, %s7963_s17 }
 0x1e5   : > { %p6561_p1 = pnand %p6559_p13, %p7069_p0 }
 0x1e7   : > { %p6562_p2 = pneg %p6561_p1 }
 0x1e9   : > { %p6567_p4 = pnand %p6565_p3, %p6562_p2 }
 0x1eb   : > { %6570 = shalt.err (!%p6567_p4)
}
 0x1ec   : > { %s6571_s2 = scalar_lea.vmem %s947_s18, 1024  ;;  %p6579_p10 = scmp.lt.s32.totalorder %s947_s18, %s947_s18 }
 0x1ed   : > { %p6572_p5 = scmp.ne.s32.totalorder %s947_s18, %s6571_s2  ;;  %p6580_p7 = scmp.lt.s32.totalorder %s6571_s2, %s6571_s2 }
 0x1ef   : > { %p6574_p6 = pnand %p6572_p5, %p7069_p0  ;;  %p6581_p8 = por %p6580_p7, %p6579_p10 }
 0x1f1   : > { %p6575_p9 = pneg %p6574_p6 }
 0x1f3   : > { %p6582_p11 = pnand %p6581_p8, %p6575_p9 }
 0x1f5   : > { %6585 = shalt.err (!%p6582_p11)
}
 0x1f6   : > { %s7964_s5 = sld [smem:[#allocation64_spill]] }
 0x1f7   : > { %5774 = dma.hbm_to_vmem [thread:$0]  (!%p7057_p12), %s7963_s17, 1024, %s947_s18, [#allocation24], %s7958_s8, %s7958_s8, %s7957_s10  }
 0x1fc   : > { %s6586_s15 = scalar_lea.hbm %s7964_s5, 1024 }
 0x1fd   : > { %p6587_p13 = scmp.ne.s32.totalorder %s7964_s5, %s6586_s15  ;;  %p6593_p3 = scmp.lt.u32.totalorder %s6586_s15, %s7964_s5 }
 0x1ff   : > { %p6589_p1 = pnand %p6587_p13, %p7069_p0 }
 0x201   : > { %p6590_p2 = pneg %p6589_p1 }
 0x203   : > { %p6595_p4 = pnand %p6593_p3, %p6590_p2 }
 0x205   : > { %6598 = shalt.err (!%p6595_p4)
}
 0x206   : > { %s6599_s2 = scalar_lea.vmem %s971_s4, 1024  ;;  %p6607_p10 = scmp.lt.s32.totalorder %s971_s4, %s971_s4 }
 0x207   : > { %p6600_p5 = scmp.ne.s32.totalorder %s971_s4, %s6599_s2  ;;  %p6608_p7 = scmp.lt.s32.totalorder %s6599_s2, %s6599_s2 }
 0x209   : > { %p6602_p6 = pnand %p6600_p5, %p7069_p0  ;;  %p6609_p8 = por %p6608_p7, %p6607_p10 }
 0x20b   : > { %p6603_p9 = pneg %p6602_p6 }
 0x20d   : > { %p6610_p11 = pnand %p6609_p8, %p6603_p9 }
 0x20f   : > { %6613 = shalt.err (!%p6610_p11)
}
 0x210   : > { %s7965_s18 = sld [smem:[#allocation66_spill]]  ;;  %s6829_s26 = smov [#allocation31]  }
 0x211   : > { %5780 = dma.hbm_to_vmem [thread:$0]  (!%p7057_p12), %s7964_s5, 1024, %s971_s4, [#allocation27], %s7958_s8, %s7958_s8, %s7957_s10  }
 0x212   : > { %s995_s15 = sshll.u32 %s6829_s26, 4  ;;  %s6830_s6 = smov [#allocation34]   ;;  %s996_s15 = int_to_ptr.vmem [resolvable:$true] %s995_s15 }
 0x213   : > { %s1022_s9 = sshll.u32 %s6830_s6, 4  ;;  %s1023_s9 = int_to_ptr.vmem [resolvable:$true] %s1022_s9 }
 0x216   : > { %s7966_s3 = smov %s7965_s18  ;;  %s6614_s2 = scalar_lea.hbm %s7965_s18, 16 }
 0x217   : > { %p6615_p13 = scmp.ne.s32.totalorder %s7966_s3, %s6614_s2  ;;  %p6621_p3 = scmp.lt.u32.totalorder %s6614_s2, %s7966_s3 }
 0x219   : > { %p6617_p1 = pnand %p6615_p13, %p7069_p0 }
 0x21b   : > { %p6618_p2 = pneg %p6617_p1 }
 0x21d   : > { %p6623_p4 = pnand %p6621_p3, %p6618_p2 }
 0x21f   : > { %6626 = shalt.err (!%p6623_p4)
}
 0x220   : > { %s6627_s13 = scalar_lea.vmem %s996_s15, 16  ;;  %s6634_s4 = scalar_lea.vmem %s996_s15, 32 }
 0x221   : > { %p6628_p5 = scmp.ne.s32.totalorder %s996_s15, %s6627_s13  ;;  %p6635_p10 = scmp.lt.s32.totalorder %s996_s15, %s996_s15 }
 0x222   : > { %p6636_p7 = scmp.lt.s32.totalorder %s6634_s4, %s6627_s13 }
 0x223   : > { %p6630_p6 = pnand %p6628_p5, %p7069_p0 }
 0x224   : > { %p6637_p8 = por %p6636_p7, %p6635_p10 }
 0x225   : > { %p6631_p9 = pneg %p6630_p6 }
 0x227   : > { %p6638_p11 = pnand %p6637_p8, %p6631_p9 }
 0x229   : > { %6641 = shalt.err (!%p6638_p11)
}
 0x22a   : > { %5786 = dma.hbm_to_vmem [thread:$0]  (!%p7057_p12), %s7966_s3, 16, %s996_s15, [#allocation30]  }
 0x22b   : > { %s6642_s6 = scalar_lea.hbm %s6988_s14, 2048 }
 0x22c   : > { %p6643_p13 = scmp.ne.s32.totalorder %s6988_s14, %s6642_s6  ;;  %p6649_p3 = scmp.lt.u32.totalorder %s6642_s6, %s6988_s14 }
 0x22e   : > { %p6645_p1 = pnand %p6643_p13, %p7069_p0 }
 0x230   : > { %p6646_p2 = pneg %p6645_p1 }
 0x232   : > { %p6651_p4 = pnand %p6649_p3, %p6646_p2 }
 0x234   : > { %6654 = shalt.err (!%p6651_p4)
}
 0x235   : > { %s6655_s13 = scalar_lea.vmem %s1023_s9, 2048  ;;  %p6663_p10 = scmp.lt.s32.totalorder %s1023_s9, %s1023_s9 }
 0x236   : > { %p6656_p5 = scmp.ne.s32.totalorder %s1023_s9, %s6655_s13  ;;  %p6664_p7 = scmp.lt.s32.totalorder %s6655_s13, %s6655_s13 }
 0x238   : > { %p6658_p6 = pnand %p6656_p5, %p7069_p0  ;;  %p6665_p8 = por %p6664_p7, %p6663_p10 }
 0x23a   : > { %p6659_p9 = pneg %p6658_p6 }
 0x23c   : > { %p6666_p11 = pnand %p6665_p8, %p6659_p9 }
 0x23e   : > { %6669 = shalt.err (!%p6666_p11)
}
 0x23f   : > { %5792 = dma.hbm_to_vmem [thread:$0]  (!%p7057_p12), %s6988_s14, 2048, %s1023_s9, [#allocation33], %s7958_s8, %s7958_s8, %s7957_s10  }
 0x240   : > { %p7967_p13 = scmp.ne.s32.totalorder %s7954_s11, 0 }
 0x241   : > { %p7968_p1 = scmp.eq.s32.totalorder (!%p7967_p13), %s7021_s22, 0 }
 0x242   : > { %1056 = sbr.rel (%p7967_p13) target bundleno = 5087 (0x13df), region = 140 }
 0x249   : > { %6715 = dma.done.wait (%p7968_p1), [#allocation3], 128   ;;  %p7969_p0 = pmov %p7968_p1 }
 0x24b   : > { %6717 = vsyncadd (%p7969_p0), [#allocation3], 4294967168  ;;  %p7970_p2 = pmov %p7969_p0 }
 0x24c   : > { %p7971_p3 = pmov %p7969_p0 }
 0x24d   : > { %6719 = dma.done.wait (%p7970_p2), [#allocation6], 1152  }
 0x24e   : > { %6721 = vsyncadd (%p7971_p3), [#allocation6], 4294966144  ;;  %p7972_p4 = pmov %p7969_p0 }
 0x24f   : > { %p7973_p12 = pmov %p7969_p0 }
 0x250   : > { %6723 = dma.done.wait (%p7972_p4), [#allocation9], 2048  }
 0x251   : > { %6725 = vsyncadd (%p7973_p12), [#allocation9], 4294965248  ;;  %p7974_p5 = pmov %p7969_p0 }
 0x252   : > { %p7975_p6 = pmov %p7969_p0 }
 0x253   : > { %6727 = dma.done.wait (%p7974_p5), [#allocation12], 1040  }
 0x254   : > { %6729 = vsyncadd (%p7975_p6), [#allocation12], 4294966256  ;;  %p7976_p9 = pmov %p7969_p0 }
 0x255   : > { %p7977_p10 = pmov %p7969_p0 }
 0x256   : > { %6731 = dma.done.wait (%p7976_p9), [#allocation15], 32  }
 0x257   : > { %6733 = vsyncadd (%p7977_p10), [#allocation15], 4294967264  ;;  %p7978_p7 = pmov %p7969_p0 }
 0x258   : > { %p7979_p8 = pmov %p7969_p0 }
 0x259   : > { %6735 = dma.done.wait (%p7978_p7), [#allocation18], 1040  }
 0x25a   : > { %6737 = vsyncadd (%p7979_p8), [#allocation18], 4294966256  ;;  %p7980_p11 = pmov %p7969_p0 }
 0x25b   : > { %p7981_p13 = pmov %p7969_p0 }
 0x25c   : > { %6739 = dma.done.wait (%p7980_p11), [#allocation21], 1040  }
 0x25d   : > { %6741 = vsyncadd (%p7981_p13), [#allocation21], 4294966256  ;;  %p7982_p1 = pmov %p7969_p0 }
 0x25f   : > { %6743 = dma.done.wait (%p7982_p1), [#allocation24], 1040  }
 0x260   : > { %6745 = vsyncadd (%p7969_p0), [#allocation24], 4294966256  ;;  %p7983_p2 = pmov %p7969_p0 }
 0x261   : > { %p7984_p3 = pmov %p7969_p0 }
 0x262   : > { %6747 = dma.done.wait (%p7983_p2), [#allocation27], 1040  }
 0x263   : > { %6749 = vsyncadd (%p7984_p3), [#allocation27], 4294966256  ;;  %p7985_p4 = pmov %p7969_p0 }
 0x264   : > { %p7986_p12 = pmov %p7969_p0 }
 0x265   : > { %6751 = dma.done.wait (%p7985_p4), [#allocation30], 32  }
 0x266   : > { %6753 = vsyncadd (%p7986_p12), [#allocation30], 4294967264  ;;  %p7987_p5 = pmov %p7969_p0 }
 0x267   : > { %p7988_p6 = pmov %p7969_p0 }
 0x268   : > { %6755 = dma.done.wait (%p7987_p5), [#allocation33], 2064  }
 0x269   : > { %6757 = vsyncadd (%p7988_p6), [#allocation33], 4294965232  ;;  %s7989_s9 = sld [smem:[#allocation48_spill]]  ;;  %p1218_p9 = scmp.lt.s32.totalorder %s7021_s22, 1  ;;  %v5933_v5 = vld [vmem:[#allocation7] sm:$0xff]   ;;  %v6831_v6 = vmov 0.0  }
 0x26a   : > { %5387 = vmatprep.subr.bf16.mxu0 %v6831_v6  ;;  %5407 = vmatprep.subr.bf16.mxu1 %v6831_v6  ;;  %v5934_v7 = vld [vmem:[#allocation8] sm:$0xff]   ;;  %v5935_v8 = vld [vmem:[#allocation7 + $0x8] sm:$0xff]   ;;  %v5937_v10 = vld [vmem:[#allocation7 + $0x10] sm:$0xff]   ;;  %vm6832_vm0 = vmmov 0   ;;  %s7990_s10 = sld [smem:[#allocation52_spill]]  ;;  %s7991_s8 = sld [smem:[#allocation53_spill]] }
 0x26b   : > { %s7362_s11 = scalar_select %p1218_p9, %s7021_s22, 1  ;;  %5388 = vmatpush3.bf16.msra.mxu0 %v5933_v5  ;;  %5408 = vmatpush3.bf16.msra.mxu1 %v5934_v7  ;;  %v5936_v9 = vld [vmem:[#allocation8 + $0x8] sm:$0xff]   ;;  %v5938_v11 = vld [vmem:[#allocation8 + $0x10] sm:$0xff]   ;;  %v5939_v12 = vld [vmem:[#allocation7 + $0x18] sm:$0xff]   ;;  %v6836_v62 = vmov 1983009808  }
 0x26c   : > { %5389 = vmatprep.subr.bf16.mxu0 %v6831_v6  ;;  %5409 = vmatprep.subr.bf16.mxu1 %v6831_v6  ;;  %v5940_v13 = vld [vmem:[#allocation8 + $0x18] sm:$0xff]   ;;  %v5941_v14 = vld [vmem:[#allocation7 + $0x20] sm:$0xff]   ;;  %v5943_v16 = vld [vmem:[#allocation7 + $0x28] sm:$0xff]   ;;  %s7992_s18 = sld [smem:[#allocation56_spill]]  ;;  %s7993_s26 = sld [smem:[#allocation54_spill]]  ;;  %v1617_v63 = vunpack.c.l.s4 %v6836_v62  ;;  %vm2056_vm3 = vcmask 261120  }
 0x26d   : > { %s5110_s1 = sshll.u32 %s7362_s11, 3  ;;  %5403 = vmatprep.mubr.msk.bf16.mxu0 %vm6832_vm0, %v6831_v6  ;;  %v5942_v15 = vld [vmem:[#allocation8 + $0x20] sm:$0xff]   ;;  %5423 = vmatprep.mubr.msk.bf16.mxu1 %vm6832_vm0, %v6831_v6  ;;  %v5944_v17 = vld [vmem:[#allocation8 + $0x28] sm:$0xff]   ;;  %v5945_v18 = vld [vmem:[#allocation7 + $0x30] sm:$0xff]   ;;  %s6833_s15 = smov 32   ;;  %vm2241_vm5 = vcmask 64512  }
 0x26e   : > { %v5946_v19 = vld [vmem:[#allocation8 + $0x30] sm:$0xff]   ;;  %v5947_v20 = vld [vmem:[#allocation7 + $0x38] sm:$0xff]   ;;  %v5949_v36 = vld [vmem:[#allocation10] sm:$0xff]   ;;  %s6834_s2 = smov 96   ;;  %s6835_s4 = smov 64   ;;  %vm2293_vm6 = vcmask 1043456  }
 0x26f   : > { %s7366_s23 = scalar_lea.vmem %s7989_s9, %s5110_s1  ;;  %5390 = vmatpush3.bf16.msra.mxu0 %v5935_v8  ;;  %5410 = vmatpush3.bf16.msra.mxu1 %v5936_v9  ;;  %v5948_v21 = vld [vmem:[#allocation8 + $0x38] sm:$0xff]   ;;  %v5950_v38 = vld [vmem:[#allocation10 + $0x8] sm:$0xff]   ;;  %v5951_v39 = vld [vmem:[#allocation10 + $0x10] sm:$0xff]   ;;  %vm2624_vm7 = vcmask 523264   ;;  %vm2626_vm8 = vcmask 785408   ;;  %s7994_s6 = sld [smem:[#allocation49_spill]] }
 0x270   : > { %v1228_v0 = vld [vmem:[%s7366_s23] sm:$0xff]  ;;  %5391 = vmatprep.subr.bf16.mxu0 %v6831_v6  ;;  %5411 = vmatprep.subr.bf16.mxu1 %v6831_v6  ;;  %v5952_v40 = vld [vmem:[#allocation10 + $0x18] sm:$0xff]   ;;  %v5953_v41 = vld [vmem:[#allocation10 + $0x20] sm:$0xff]   ;;  %s5260_s13 = sshll.u32 %s7362_s11, 4  ;;  %vm3883_vm12 = vcmask 80896   ;;  %vm3935_vm13 = vcmask 1044480  }
 0x271   : > { %1234 = vadd.xlane.f32.xlu0 %v1228_v0  ;;  %v5113_v30 = vld [vmem:[%s7990_s10] ss:$0 sm:$0xff]  ;;  %v5954_v42 = vld [vmem:[#allocation10 + $0x28] sm:$0xff]   ;;  %v5956_v44 = vld [vmem:[#allocation10 + $0x38] sm:$0xff]   ;;  %s7995_s11 = sld [smem:[#allocation68_spill]]  ;;  %s1215_s1 = sand.u32 1, %s6768_s16  }
 0x272   : > { %v5114_v33 = vld [vmem:[%s7991_s8] ss:$0 sm:$0xff]  ;;  %s5257_s10 = sshll.u32 %s7021_s22, 7  ;;  %p7996_p7 = scmp.ne.s32.totalorder %s7951_s7, 0 }
 0x273   : > { %5392 = vmatpush3.bf16.msra.mxu0 %v5937_v10  ;;  %5412 = vmatpush3.bf16.msra.mxu1 %v5938_v11  ;;  %v5955_v43 = vld [vmem:[#allocation10 + $0x30] sm:$0xff]   ;;  %s6839_s22 = smov [#allocation35]  }
 0x274   : > { %5393 = vmatprep.subr.bf16.mxu0 %v6831_v6  ;;  %5413 = vmatprep.subr.bf16.mxu1 %v6831_v6  ;;  %v5124_v45 = vld [vmem:[%s7992_s18] ss:$0 sm:$0xff] }
 0x275   : > { %v5115_v51 = vld [vmem:[%s7993_s26] ss:$0 sm:$0xff]  ;;  %s1226_s9 = scalar_lea.vmem %s7994_s6, %s5260_s13  ;;  %s7850_s26 = scalar_lea.hbm %s6998_s21, %s5257_s10 }
 0x277   : > { %5394 = vmatpush3.bf16.msra.mxu0 %v5939_v12  ;;  %5414 = vmatpush3.bf16.msra.mxu1 %v5940_v13 }
 0x278   : > { %5395 = vmatprep.subr.bf16.mxu0 %v6831_v6  ;;  %5415 = vmatprep.subr.bf16.mxu1 %v6831_v6 }
 0x27b   : > { %5396 = vmatpush3.bf16.msra.mxu0 %v5941_v14  ;;  %5416 = vmatpush3.bf16.msra.mxu1 %v5942_v15 }
 0x27c   : > { %5397 = vmatprep.subr.bf16.mxu0 %v6831_v6  ;;  %5417 = vmatprep.subr.bf16.mxu1 %v6831_v6 }
 0x27f   : > { %5398 = vmatpush3.bf16.msra.mxu0 %v5943_v16  ;;  %5418 = vmatpush3.bf16.msra.mxu1 %v5944_v17 }
 0x280   : > { %5399 = vmatprep.subr.bf16.mxu0 %v6831_v6  ;;  %5419 = vmatprep.subr.bf16.mxu1 %v6831_v6 }
 0x283   : > { %5400 = vmatpush3.bf16.msra.mxu0 %v5945_v18  ;;  %5420 = vmatpush3.bf16.msra.mxu1 %v5946_v19 }
 0x284   : > { %5401 = vmatprep.subr.bf16.mxu0 %v6831_v6  ;;  %5421 = vmatprep.subr.bf16.mxu1 %v6831_v6 }
 0x287   : > { %5402 = vmatpush3.bf16.msra.mxu0 %v5947_v20  ;;  %5422 = vmatpush3.bf16.msra.mxu1 %v5948_v21 }
 0x288   : > { %5427 = vmatprep.subr.bf16.mxu0 %v6831_v6  ;;  %5447 = vmatprep.subr.bf16.mxu1 %v6831_v6 }
 0x2fe   : > { %v1235_v1 = vpop.xlane.xlu0 %1234 }
 0x2ff   : > { %v1237_v2 = vmul.f32 0.0078125, %v1235_v1  ;;  %v6837_v1 = vmov 1934713408  }
 0x301   : > { %v7369_v3 = vsub.f32 %v1228_v0, %v1237_v2  ;;  %v1619_v0 = vlaneseq  ;;  %v1649_v2 = vunpack.c.l.s4 %v6837_v1 }
 0x303   : > { %v1239_v4 = vmul.f32 %v7369_v3, %v7369_v3  ;;  %v1250_v31 = vmul.f32 %v5113_v30, %v7369_v3  ;;  %v1618_v3 = vunpack.c.0.s8 %v1617_v63  ;;  %v1650_v8 = vunpack.c.0.s8 %v1649_v2 }
 0x305   : > { %1240 = vadd.xlane.f32.xlu0 %v1239_v4  ;;  %v7422_v4 = vshrl.u32 %v1619_v0, 7 }
 0x307   : > { %v7425_v9 = vsub.s32 %v1618_v3, %v7422_v4  ;;  %v7428_v15 = vsub.s32 %v1650_v8, %v7422_v4 }
 0x392   : > { %v1241_v22 = vpop.xlane.xlu0 %1240 }
 0x393   : > { %v1243_v23 = vmul.f32 0.007874016, %v1241_v22 }
 0x395   : > { %6037 = vrsqrt.f32 %v1243_v23  ;;  %vm1253_vm1 = vcmp.eq.f32.partialorder %v1243_v23, inf  ;;  %v1256_v26 = vand.u32 2147483648, %v1243_v23  ;;  %vm1255_vm2 = vcmp.eq.f32.partialorder %v1243_v23, 0.0 }
 0x39f   : > { %v6038_v24 = vpop.eup %6037 }
 0x3a0   : > { %v1252_v25 = vmul.f32 %v6038_v24, %v1243_v23 }
 0x3a2   : > { %v1254_v27 = vsel %vm1253_vm1, %v1243_v23, %v1252_v25 }
 0x3a3   : > { %v1257_v28 = vsel %vm1255_vm2, %v1256_v26, %v1254_v27 }
 0x3a4   : > { %v1258_v29 = vadd.f32 1e-06, %v1257_v28 }
 0x3a6   : > { %6039 = vrcp.f32 %v1258_v29 }
 0x3b0   : > { %v6040_v32 = vpop.eup %6039 }
 0x3b1   : > { %v1260_v34 = vmul.f32 %v6040_v32, %v1250_v31 }
 0x3b3   : > { %v1267_v35 = vadd.f32 %v5114_v33, %v1260_v34 }
 0x3b5   : > { %v1268_v37 = vpack.c.bf16 %v1267_v35, %v1267_v35 }
 0x3b7   : > { %5404 = vmatmul.mubr.bf16.vlgmr.msra.gmra.mrb[0].mxu0 %v1268_v37  ;;  %5424 = vmatmul.mubr.bf16.vlgmr.msra.gmra.mrb[0].mxu1 %v1268_v37 }
 0x3b8   : > { %5428 = vmatpush3.bf16.msra.mxu0 %v5949_v36  ;;  %5443 = vmatprep.mubr.msk.bf16.mxu0 %vm6832_vm0, %v6831_v6 }
 0x3b9   : > { %5429 = vmatprep.subr.bf16.mxu0 %v6831_v6  ;;  %5449 = vmatprep.mubr.msk.bf16.mxu1 %vm6832_vm0, %v6831_v6 }
 0x3bc   : > { %5430 = vmatpush3.bf16.msra.mxu0 %v5950_v38 }
 0x3bd   : > { %5431 = vmatprep.subr.bf16.mxu0 %v6831_v6 }
 0x3c0   : > { %5432 = vmatpush3.bf16.msra.mxu0 %v5951_v39 }
 0x3c1   : > { %5433 = vmatprep.subr.bf16.mxu0 %v6831_v6 }
 0x3c4   : > { %5434 = vmatpush3.bf16.msra.mxu0 %v5952_v40 }
 0x3c5   : > { %5435 = vmatprep.subr.bf16.mxu0 %v6831_v6 }
 0x3c8   : > { %5436 = vmatpush3.bf16.msra.mxu0 %v5953_v41 }
 0x3c9   : > { %5437 = vmatprep.subr.bf16.mxu0 %v6831_v6 }
 0x3cc   : > { %5438 = vmatpush3.bf16.msra.mxu0 %v5954_v42 }
 0x3cd   : > { %5439 = vmatprep.subr.bf16.mxu0 %v6831_v6 }
 0x3d0   : > { %5440 = vmatpush3.bf16.msra.mxu0 %v5955_v43 }
 0x3d1   : > { %5441 = vmatprep.subr.bf16.mxu0 %v6831_v6 }
 0x3d4   : > { %5442 = vmatpush3.bf16.msra.mxu0 %v5956_v44 }
 0x3d5   : > { %5495 = vmatprep.subr.bf16.mxu0 %v6831_v6 }
 0x3d7   : > { %5444 = vmatmul.mubr.bf16.vlgmr.msra.gmra.mrb[4].mxu0 %v1268_v37 }
 0x3d8   : > { %5511 = vmatprep.mubr.msk.bf16.mxu0 %vm6832_vm0, %v6831_v6 }
 0x48a   : > { %v1375_v46 = vpop.f32.mrb[0].mxu0  ;;  %v1486_v47 = vpop.f32.mrb[0].mxu1 }
 0x48b   : > { %v1487_v48 = vadd.f32 %v5124_v45, %v1486_v47  ;;  %v5405_v49 = vpop.f32.mrb[1].mxu0  ;;  %v5425_v50 = vpop.f32.mrb[1].mxu1  ;;  %v1376_v56 = vadd.f32 %v5115_v51, %v1375_v46 }
 0x48c   : > { %v1378_v52 = vpop.f32.mrb[2].mxu0  ;;  %v1489_v53 = vpop.f32.mrb[2].mxu1 }
 0x48d   : > { %1761 = vrot.lane.b32.xlu0 %v1487_v48, %s6833_s15  ;;  %1755 = vrot.lane.b32.xlu1 %v1487_v48, %s6834_s2  ;;  %v5406_v54 = vpop.f32.mrb[3].mxu0  ;;  %v5426_v55 = vpop.f32.mrb[3].mxu1  ;;  %v1603_v57 = vmul.f32 0.17677669, %v1376_v56 }
 0x491   : > { %1758 = vrot.lane.b32.xlu1 %v1487_v48, %s6835_s4 }
 0x495   : > { %1605 = vrot.lane.b32.xlu1 %v1603_v57, %s6834_s2 }
 0x499   : > { %1608 = vrot.lane.b32.xlu1 %v1603_v57, %s6835_s4 }
 0x49d   : > { %1611 = vrot.lane.b32.xlu1 %v1603_v57, %s6833_s15 }
 0x4aa   : > { %v7420_v58 = vpop.f32.mrb[4].mxu0 }
 0x4ab   : > { %v5445_v59 = vpop.f32.mrb[5].mxu0 }
 0x4ac   : > { %v1600_v60 = vpop.f32.mrb[6].mxu0 }
 0x4ad   : > { %v5446_v61 = vpop.f32.mrb[7].mxu0 }
 0x4ff   : > { %v1762_v5 = vpop.permute.xlu0 %1761  ;;  %v1756_v7 = vpop.permute.xlu1 %1755 }
 0x500   : > { %v1780_v10 = vcombine.low %v1756_v7, %v1762_v5  ;;  %v1781_v11 = vcombine.high %v1756_v7, %v1762_v5 }
 0x502   : > { %v1788_v16 = vrot.slane %v1780_v10, %v7425_v9  ;;  %v1795_v17 = vrot.slane %v1781_v11, %v7425_v9 }
 0x503   : > { %v1759_v12 = vpop.permute.xlu1 %1758 }
 0x504   : > { %v1764_v13 = vcombine.low %v1487_v48, %v1759_v12  ;;  %v1765_v14 = vcombine.high %v1487_v48, %v1759_v12 }
 0x506   : > { %v1772_v18 = vrot.slane %v1764_v13, %v7425_v9  ;;  %v1779_v19 = vrot.slane %v1765_v14, %v7425_v9 }
 0x507   : > { %v1606_v20 = vpop.permute.xlu1 %1605 }
 0x508   : > { %v1796_v21 = vcombine.low %v1772_v18, %v1788_v16  ;;  %v1797_v22 = vcombine.high %v1772_v18, %v1788_v16  ;;  %v1812_v23 = vcombine.low %v1779_v19, %v1795_v17  ;;  %v1813_v24 = vcombine.high %v1779_v19, %v1795_v17 }
 0x50a   : > { %v1804_v25 = vrot.slane %v1796_v21, %v7428_v15  ;;  %v1811_v26 = vrot.slane %v1797_v22, %v7428_v15  ;;  %v1820_v27 = vrot.slane %v1812_v23, %v7428_v15  ;;  %v1827_v28 = vrot.slane %v1813_v24, %v7428_v15 }
 0x50b   : > { %v1609_v29 = vpop.permute.xlu1 %1608 }
 0x50c   : > { %v1832_v30 = vcombine.low %v1804_v25, %v1811_v26  ;;  %v5144_v31 = vcombine.high %v1804_v25, %v1811_v26  ;;  %v1848_v32 = vcombine.low %v1820_v27, %v1827_v28  ;;  %v5145_v33 = vcombine.high %v1820_v27, %v1827_v28 }
 0x50d   : > { %v1614_v34 = vcombine.low %v1603_v57, %v1609_v29  ;;  %v1615_v35 = vcombine.high %v1603_v57, %v1609_v29 }
 0x50e   : > { %v1839_v36 = vrot.slane %v1832_v30, %v7425_v9  ;;  %v1847_v37 = vrot.slane %v5144_v31, %v7425_v9  ;;  %v1855_v38 = vrot.slane %v1848_v32, %v7425_v9  ;;  %v1863_v39 = vrot.slane %v5145_v33, %v7425_v9 }
 0x50f   : > { %v1612_v40 = vpop.permute.xlu1 %1611  ;;  %v1622_v45 = vrot.slane %v1614_v34, %v7425_v9  ;;  %v1629_v46 = vrot.slane %v1615_v35, %v7425_v9 }
 0x510   : > { %v1630_v41 = vcombine.low %v1606_v20, %v1612_v40  ;;  %v1631_v42 = vcombine.high %v1606_v20, %v1612_v40  ;;  %v1864_v43 = vcombine.low %v1839_v36, %v1847_v37  ;;  %v1880_v44 = vcombine.low %v1855_v38, %v1863_v39  ;;  %v1269_v40 = vld [vmem:[#allocation2] sm:$0xff] }
 0x511   : > { %v1865_v10 = vcombine.high %v1839_v36, %v1847_v37  ;;  %v1881_v14 = vcombine.high %v1855_v38, %v1863_v39  ;;  %vm2054_vm4 = vcmp.eq.f32.partialorder %v1269_v40, 0.0 }
 0x512   : > { %v1638_v47 = vrot.slane %v1630_v41, %v7425_v9  ;;  %v1645_v48 = vrot.slane %v1631_v42, %v7425_v9  ;;  %v1872_v49 = vrot.slane %v1864_v43, %v7428_v15  ;;  %v1888_v50 = vrot.slane %v1880_v44, %v7428_v15 }
 0x513   : > { %v1879_v20 = vrot.slane %v1865_v10, %v7428_v15  ;;  %v1895_v21 = vrot.slane %v1881_v14, %v7428_v15  ;;  %v2055_v41 = vsel %vm2054_vm4, -1e+09, %v6831_v6 }
 0x514   : > { %v1646_v51 = vcombine.low %v1622_v45, %v1638_v47  ;;  %v1647_v52 = vcombine.high %v1622_v45, %v1638_v47  ;;  %v1662_v53 = vcombine.low %v1629_v46, %v1645_v48  ;;  %v1663_v54 = vcombine.high %v1629_v46, %v1645_v48 }
 0x515   : > { %v1896_v55 = vcombine.low %v1872_v49, %v1888_v50  ;;  %v1897_v13 = vcombine.high %v1872_v49, %v1888_v50  ;;  %v1898_v24 = vcombine.low %v1879_v20, %v1895_v21  ;;  %v1899_v33 = vcombine.high %v1879_v20, %v1895_v21 }
 0x516   : > { %v1654_v56 = vrot.slane %v1646_v51, %v7428_v15  ;;  %v1661_v57 = vrot.slane %v1647_v52, %v7428_v15  ;;  %v1670_v59 = vrot.slane %v1662_v53, %v7428_v15  ;;  %v1677_v60 = vrot.slane %v1663_v54, %v7428_v15 }
 0x517   : > { %v1900_v61 = vpack.c.bf16 %v1896_v55, %v1896_v55  ;;  %v1901_v19 = vpack.c.bf16 %v1897_v13, %v1897_v13  ;;  %v1902_v28 = vpack.c.bf16 %v1898_v24, %v1898_v24  ;;  %v1903_v35 = vpack.c.bf16 %v1899_v33, %v1899_v33 }
 0x518   : > { %v1682_v62 = vcombine.low %v1654_v56, %v1661_v57  ;;  %v5142_v63 = vcombine.high %v1654_v56, %v1661_v57  ;;  %v1698_v0 = vcombine.low %v1670_v59, %v1677_v60  ;;  %v5143_v1 = vcombine.high %v1670_v59, %v1677_v60 }
 0x519   : > { %v2061_v2 = vsel %vm2056_vm3, %v1900_v61, 0  ;;  %v2107_v23 = vsel %vm2056_vm3, %v1901_v19, 0  ;;  %v2153_v32 = vsel %vm2056_vm3, %v1902_v28, 0  ;;  %v2199_v37 = vsel %vm2056_vm3, %v1903_v35, 0 }
 0x51a   : > { %v1689_v3 = vrot.slane %v1682_v62, %v7425_v9  ;;  %v1697_v5 = vrot.slane %v5142_v63, %v7425_v9  ;;  %v1705_v7 = vrot.slane %v1698_v0, %v7425_v9  ;;  %v1713_v8 = vrot.slane %v5143_v1, %v7425_v9  ;;  %5448 = vmatpush3.bf16.xpose.msra.mxu1 %v2061_v2 }
 0x51b   : > { %5453 = vmatprep.subr.bf16.mxu1 %v6831_v6 }
 0x51c   : > { %v1714_v11 = vcombine.low %v1689_v3, %v1697_v5  ;;  %v1730_v12 = vcombine.low %v1705_v7, %v1713_v8  ;;  %v1715_v25 = vcombine.high %v1689_v3, %v1697_v5  ;;  %v1731_v26 = vcombine.high %v1705_v7, %v1713_v8  ;;  %v5133_v3 = vld [vmem:[#allocation11] ss:$0 sm:$0xff] }
 0x51d   : > { %v1598_v5 = vadd.f32 %v5133_v3, %v7420_v58 }
 0x51e   : > { %v1722_v16 = vrot.slane %v1714_v11, %v7428_v15  ;;  %v1738_v17 = vrot.slane %v1730_v12, %v7428_v15  ;;  %v1729_v30 = vrot.slane %v1715_v25, %v7428_v15  ;;  %v1745_v31 = vrot.slane %v1731_v26, %v7428_v15 }
 0x520   : > { %v1746_v18 = vcombine.low %v1722_v16, %v1738_v17  ;;  %v1747_v27 = vcombine.high %v1722_v16, %v1738_v17  ;;  %v1748_v34 = vcombine.low %v1729_v30, %v1745_v31  ;;  %v1749_v38 = vcombine.high %v1729_v30, %v1745_v31 }
 0x522   : > { %v1750_v22 = vpack.c.bf16 %v1746_v18, %v1746_v18  ;;  %v1751_v29 = vpack.c.bf16 %v1747_v27, %v1747_v27  ;;  %v1752_v36 = vpack.c.bf16 %v1748_v34, %v1748_v34  ;;  %v1753_v39 = vpack.c.bf16 %v1749_v38, %v1749_v38 }
 0x524   : > { %5450 = vmatmul.mubr.msk.bf16.vlgmr.msra.gmra.mrb[4].mxu1 %vm2056_vm3, %v1750_v22 }
 0x525   : > { %5454 = vmatpush3.bf16.xpose.msra.mxu1 %v2107_v23  ;;  %5455 = vmatprep.mubr.msk.bf16.mxu1 %vm6832_vm0, %v6831_v6 }
 0x526   : > { %5459 = vmatprep.subr.bf16.mxu1 %v6831_v6 }
 0x52c   : > { %5456 = vmatmul.mubr.msk.bf16.vlgmr.msra.gmra.mrb[8].mxu1 %vm2056_vm3, %v1751_v29 }
 0x52d   : > { %5460 = vmatpush3.bf16.xpose.msra.mxu1 %v2153_v32  ;;  %5461 = vmatprep.mubr.msk.bf16.mxu1 %vm6832_vm0, %v6831_v6 }
 0x52e   : > { %5465 = vmatprep.subr.bf16.mxu1 %v6831_v6 }
 0x534   : > { %5462 = vmatmul.mubr.msk.bf16.vlgmr.msra.gmra.mrb[12].mxu1 %vm2056_vm3, %v1752_v36 }
 0x535   : > { %5466 = vmatpush3.bf16.xpose.msra.mxu1 %v2199_v37  ;;  %5467 = vmatprep.mubr.msk.bf16.mxu1 %vm6832_vm0, %v6831_v6 }
 0x536   : > { %5471 = vmatprep.subr.bf16.mxu1 %v6831_v6 }
 0x53c   : > { %5468 = vmatmul.mubr.msk.bf16.vlgmr.msra.gmra.mrb[16].mxu1 %vm2056_vm3, %v1753_v39 }
 0x53d   : > { %5473 = vmatprep.mubr.msk.bf16.mxu1 %vm6832_vm0, %v6831_v6 }
 0x5f7   : > { %v2097_v42 = vpop.f32.mrb[4].mxu1 }
 0x5f8   : > { %v2098_v43 = vadd.f32 %v2097_v42, %v2055_v41  ;;  %v5451_v44 = vpop.f32.mrb[5].mxu1 }
 0x5f9   : > { %v2100_v45 = vpop.f32.mrb[6].mxu1 }
 0x5fa   : > { %v5452_v46 = vpop.f32.mrb[7].mxu1  ;;  %v2242_v47 = vsel %vm2241_vm5, %v2098_v43, -inf }
 0x5fb   : > { %2243 = vmax.xlane.f32.xlu1 %v2242_v47 }
 0x5ff   : > { %v2143_v48 = vpop.f32.mrb[8].mxu1 }
 0x600   : > { %v2144_v49 = vadd.f32 %v2143_v48, %v2055_v41  ;;  %v5457_v50 = vpop.f32.mrb[9].mxu1 }
 0x601   : > { %v2146_v51 = vpop.f32.mrb[10].mxu1 }
 0x602   : > { %v5458_v52 = vpop.f32.mrb[11].mxu1  ;;  %v2245_v53 = vsel %vm2241_vm5, %v2144_v49, -inf }
 0x603   : > { %2246 = vmax.xlane.f32.xlu0 %v2245_v53 }
 0x607   : > { %v2189_v54 = vpop.f32.mrb[12].mxu1 }
 0x608   : > { %v2190_v55 = vadd.f32 %v2189_v54, %v2055_v41  ;;  %v5463_v56 = vpop.f32.mrb[13].mxu1 }
 0x609   : > { %v2192_v57 = vpop.f32.mrb[14].mxu1 }
 0x60a   : > { %v5464_v59 = vpop.f32.mrb[15].mxu1  ;;  %v2248_v60 = vsel %vm2241_vm5, %v2190_v55, -inf }
 0x60b   : > { %2249 = vmax.xlane.f32.xlu1 %v2248_v60 }
 0x60f   : > { %v2235_v61 = vpop.f32.mrb[16].mxu1 }
 0x610   : > { %v2236_v62 = vadd.f32 %v2235_v61, %v2055_v41  ;;  %v5469_v63 = vpop.f32.mrb[17].mxu1 }
 0x611   : > { %v2238_v0 = vpop.f32.mrb[18].mxu1 }
 0x612   : > { %v5470_v1 = vpop.f32.mrb[19].mxu1  ;;  %v2251_v2 = vsel %vm2241_vm5, %v2236_v62, -inf }
 0x613   : > { %2252 = vmax.xlane.f32.xlu1 %v2251_v2 }
 0x624   : > { %1905 = vrot.lane.b32.xlu1 %v1598_v5, %s6834_s2 }
 0x628   : > { %1911 = vrot.lane.b32.xlu1 %v1598_v5, %s6833_s15 }
 0x688   : > { %v2244_v7 = vpop.xlane.xlu1 %2243 }
 0x689   : > { %v2254_v8 = vsub.f32 %v2098_v43, %v2244_v7 }
 0x68b   : > { %v2258_v10 = vmul.f32 1.442695, %v2254_v8 }
 0x68d   : > { %6041 = vpow2.f32 %v2258_v10 }
 0x690   : > { %v2247_v11 = vpop.xlane.xlu0 %2246 }
 0x691   : > { %v2255_v12 = vsub.f32 %v2144_v49, %v2247_v11 }
 0x693   : > { %v2260_v13 = vmul.f32 1.442695, %v2255_v12 }
 0x695   : > { %6043 = vpow2.f32 %v2260_v13 }
 0x697   : > { %v6042_v14 = vpop.eup %6041 }
 0x698   : > { %v2266_v16 = vsel %vm2241_vm5, %v6042_v14, 0.0  ;;  %v2250_v18 = vpop.xlane.xlu1 %2249 }
 0x699   : > { %2267 = vadd.xlane.f32.xlu0 %v2266_v16  ;;  %v2256_v19 = vsub.f32 %v2190_v55, %v2250_v18 }
 0x69b   : > { %v2262_v21 = vmul.f32 1.442695, %v2256_v19 }
 0x69d   : > { %6045 = vpow2.f32 %v2262_v21 }
 0x69f   : > { %v7491_v17 = vpop.eup %6043 }
 0x6a0   : > { %v2269_v58 = vsel %vm2241_vm5, %v7491_v17, 0.0  ;;  %v2253_v20 = vpop.xlane.xlu1 %2252 }
 0x6a1   : > { %2270 = vadd.xlane.f32.xlu1 %v2269_v58  ;;  %v2257_v22 = vsub.f32 %v2236_v62, %v2253_v20 }
 0x6a3   : > { %v2264_v23 = vmul.f32 1.442695, %v2257_v22 }
 0x6a4   : > { %v1906_v28 = vpop.permute.xlu1 %1905 }
 0x6a5   : > { %6047 = vpow2.f32 %v2264_v23 }
 0x6a7   : > { %v7496_v24 = vpop.eup %6045 }
 0x6a8   : > { %v2272_v25 = vsel %vm2241_vm5, %v7496_v24, 0.0  ;;  %v1912_v29 = vpop.permute.xlu1 %1911 }
 0x6a9   : > { %v1930_v31 = vcombine.low %v1906_v28, %v1912_v29  ;;  %v1931_v32 = vcombine.high %v1906_v28, %v1912_v29 }
 0x6ab   : > { %v1938_v36 = vrot.slane %v1930_v31, %v7425_v9  ;;  %v1945_v37 = vrot.slane %v1931_v32, %v7425_v9 }
 0x6af   : > { %1908 = vrot.lane.b32.xlu0 %v1598_v5, %s6835_s4  ;;  %v7500_v26 = vpop.eup %6047 }
 0x6b0   : > { %v2275_v27 = vsel %vm2241_vm5, %v7500_v26, 0.0 }
 0x6ce   : > { %2273 = vadd.xlane.f32.xlu0 %v2272_v25 }
 0x6d2   : > { %2276 = vadd.xlane.f32.xlu0 %v2275_v27 }
 0x726   : > { %v2268_v30 = vpop.xlane.xlu0 %2267 }
 0x727   : > { %6049 = vrcp.f32 %v2268_v30 }
 0x72a   : > { %v1909_v33 = vpop.permute.xlu0 %1908 }
 0x72b   : > { %v1914_v34 = vcombine.low %v1598_v5, %v1909_v33  ;;  %v1915_v35 = vcombine.high %v1598_v5, %v1909_v33  ;;  %v5958_v33 = vld [vmem:[#allocation13 + $0x8] sm:$0xff]  }
 0x72d   : > { %v1922_v38 = vrot.slane %v1914_v34, %v7425_v9  ;;  %v1929_v39 = vrot.slane %v1915_v35, %v7425_v9  ;;  %v5959_v34 = vld [vmem:[#allocation13 + $0x10] sm:$0xff]   ;;  %v5960_v35 = vld [vmem:[#allocation13 + $0x18] sm:$0xff]  }
 0x72e   : > { %v2271_v56 = vpop.xlane.xlu1 %2270 }
 0x72f   : > { %v1946_v40 = vcombine.low %v1922_v38, %v1938_v36  ;;  %v1947_v41 = vcombine.high %v1922_v38, %v1938_v36  ;;  %v1962_v42 = vcombine.low %v1929_v39, %v1945_v37  ;;  %v1963_v43 = vcombine.high %v1929_v39, %v1945_v37  ;;  %v5962_v36 = vld [vmem:[#allocation13 + $0x28] sm:$0xff]  }
 0x730   : > { %6051 = vrcp.f32 %v2271_v56 }
 0x731   : > { %v1954_v44 = vrot.slane %v1946_v40, %v7428_v15  ;;  %v1961_v45 = vrot.slane %v1947_v41, %v7428_v15  ;;  %v1970_v46 = vrot.slane %v1962_v42, %v7428_v15  ;;  %v1977_v47 = vrot.slane %v1963_v43, %v7428_v15  ;;  %v6050_v62 = vpop.eup %6049 }
 0x732   : > { %v2282_v3 = vmul.f32 %v6050_v62, %v6042_v14 }
 0x733   : > { %v1982_v48 = vcombine.low %v1954_v44, %v1961_v45  ;;  %v5146_v49 = vcombine.high %v1954_v44, %v1961_v45  ;;  %v1998_v50 = vcombine.low %v1970_v46, %v1977_v47  ;;  %v5147_v51 = vcombine.high %v1970_v46, %v1977_v47 }
 0x734   : > { %v2286_v12 = vpack.c.bf16 %v2282_v3, %v2282_v3 }
 0x735   : > { %v1989_v52 = vrot.slane %v1982_v48, %v7425_v9  ;;  %v1997_v53 = vrot.slane %v5146_v49, %v7425_v9  ;;  %v2005_v54 = vrot.slane %v1998_v50, %v7425_v9  ;;  %v2013_v55 = vrot.slane %v5147_v51, %v7425_v9 }
 0x737   : > { %v2014_v57 = vcombine.low %v1989_v52, %v1997_v53  ;;  %v2030_v59 = vcombine.low %v2005_v54, %v2013_v55  ;;  %v2015_v1 = vcombine.high %v1989_v52, %v1997_v53  ;;  %v2031_v2 = vcombine.high %v2005_v54, %v2013_v55 }
 0x739   : > { %v2022_v60 = vrot.slane %v2014_v57, %v7428_v15  ;;  %v2038_v61 = vrot.slane %v2030_v59, %v7428_v15  ;;  %v2029_v10 = vrot.slane %v2015_v1, %v7428_v15  ;;  %v2045_v11 = vrot.slane %v2031_v2, %v7428_v15  ;;  %v5963_v2 = vld [vmem:[#allocation13 + $0x30] sm:$0xff]  }
 0x73a   : > { %v6052_v13 = vpop.eup %6051 }
 0x73b   : > { %v2046_v63 = vcombine.low %v2022_v60, %v2038_v61  ;;  %v2047_v0 = vcombine.high %v2022_v60, %v2038_v61  ;;  %v2048_v58 = vcombine.low %v2029_v10, %v2045_v11  ;;  %v2283_v14 = vmul.f32 %v6052_v13, %v7491_v17 }
 0x73c   : > { %v2049_v23 = vcombine.high %v2029_v10, %v2045_v11 }
 0x73d   : > { %v2050_v5 = vpack.c.bf16 %v2046_v63, %v2046_v63  ;;  %v2051_v8 = vpack.c.bf16 %v2047_v0, %v2047_v0  ;;  %v2052_v18 = vpack.c.bf16 %v2048_v58, %v2048_v58  ;;  %v2287_v19 = vpack.c.bf16 %v2283_v14, %v2283_v14 }
 0x73e   : > { %v2053_v27 = vpack.c.bf16 %v2049_v23, %v2049_v23 }
 0x73f   : > { %v2295_v7 = vsel %vm2293_vm6, %v2050_v5, 0  ;;  %v2341_v16 = vsel %vm2293_vm6, %v2051_v8, 0  ;;  %v2387_v20 = vsel %vm2293_vm6, %v2052_v18, 0 }
 0x740   : > { %5472 = vmatpush3.bf16.msra.mxu1 %v2295_v7  ;;  %v2433_v30 = vsel %vm2293_vm6, %v2053_v27, 0 }
 0x741   : > { %5477 = vmatprep.subr.bf16.mxu1 %v6831_v6 }
 0x743   : > { %5474 = vmatmul.mubr.msk.bf16.vlgmr.msra.gmra.mrb[20].mxu1 %vm2241_vm5, %v2286_v12 }
 0x744   : > { %5478 = vmatpush3.bf16.msra.mxu1 %v2341_v16  ;;  %5479 = vmatprep.mubr.msk.bf16.mxu1 %vm6832_vm0, %v6831_v6  ;;  %v5964_v16 = vld [vmem:[#allocation13 + $0x38] sm:$0xff]  }
 0x745   : > { %5483 = vmatprep.subr.bf16.mxu1 %v6831_v6 }
 0x74b   : > { %5480 = vmatmul.mubr.msk.bf16.vlgmr.msra.gmra.mrb[24].mxu1 %vm2241_vm5, %v2287_v19 }
 0x74c   : > { %5484 = vmatpush3.bf16.msra.mxu1 %v2387_v20  ;;  %5485 = vmatprep.mubr.msk.bf16.mxu1 %vm6832_vm0, %v6831_v6 }
 0x74d   : > { %5489 = vmatprep.subr.bf16.mxu1 %v6831_v6 }
 0x75b   : > { %v2274_v21 = vpop.xlane.xlu0 %2273 }
 0x75c   : > { %6053 = vrcp.f32 %v2274_v21 }
 0x75f   : > { %v2277_v22 = vpop.xlane.xlu0 %2276 }
 0x760   : > { %6055 = vrcp.f32 %v2277_v22 }
 0x766   : > { %v6054_v17 = vpop.eup %6053 }
 0x767   : > { %v2284_v25 = vmul.f32 %v6054_v17, %v7496_v24  ;;  %v5957_v24 = vld [vmem:[#allocation13] sm:$0xff]  }
 0x768   : > { %5496 = vmatpush3.bf16.msra.mxu0 %v5957_v24 }
 0x769   : > { %v2288_v28 = vpack.c.bf16 %v2284_v25, %v2284_v25  ;;  %5497 = vmatprep.subr.bf16.mxu0 %v6831_v6 }
 0x76a   : > { %v6056_v29 = vpop.eup %6055 }
 0x76b   : > { %5486 = vmatmul.mubr.msk.bf16.vlgmr.msra.gmra.mrb[28].mxu1 %vm2241_vm5, %v2288_v28  ;;  %v2285_v31 = vmul.f32 %v6056_v29, %v7500_v26  ;;  %v5961_v26 = vld [vmem:[#allocation13 + $0x20] sm:$0xff]  }
 0x76c   : > { %5490 = vmatpush3.bf16.msra.mxu1 %v2433_v30  ;;  %5491 = vmatprep.mubr.msk.bf16.mxu1 %vm6832_vm0, %v6831_v6 }
 0x76d   : > { %5515 = vmatprep.subr.bf16.mxu1 %v6831_v6  ;;  %v2289_v32 = vpack.c.bf16 %v2285_v31, %v2285_v31  ;;  %5498 = vmatpush3.bf16.msra.mxu0 %v5958_v33 }
 0x76e   : > { %5499 = vmatprep.subr.bf16.mxu0 %v6831_v6 }
 0x771   : > { %5500 = vmatpush3.bf16.msra.mxu0 %v5959_v34 }
 0x772   : > { %5501 = vmatprep.subr.bf16.mxu0 %v6831_v6 }
 0x773   : > { %5492 = vmatmul.mubr.msk.bf16.vlgmr.msra.gmra.mrb[32].mxu1 %vm2241_vm5, %v2289_v32 }
 0x774   : > { %5531 = vmatprep.mubr.msk.bf16.mxu1 %vm6832_vm0, %v6831_v6 }
 0x775   : > { %5502 = vmatpush3.bf16.msra.mxu0 %v5960_v35 }
 0x776   : > { %5503 = vmatprep.subr.bf16.mxu0 %v6831_v6 }
 0x779   : > { %5504 = vmatpush3.bf16.msra.mxu0 %v5961_v26 }
 0x77a   : > { %5505 = vmatprep.subr.bf16.mxu0 %v6831_v6 }
 0x77d   : > { %5506 = vmatpush3.bf16.msra.mxu0 %v5962_v36 }
 0x77e   : > { %5507 = vmatprep.subr.bf16.mxu0 %v6831_v6 }
 0x781   : > { %5508 = vmatpush3.bf16.msra.mxu0 %v5963_v2  ;;  %v5977_v2 = vld [vmem:[#allocation19 + $0x20] sm:$0xff]  }
 0x782   : > { %5509 = vmatprep.subr.bf16.mxu0 %v6831_v6 }
 0x785   : > { %5510 = vmatpush3.bf16.msra.mxu0 %v5964_v16 }
 0x786   : > { %5535 = vmatprep.subr.bf16.mxu0 %v6831_v6 }
 0x816   : > { %v2331_v37 = vpop.f32.mrb[20].mxu1 }
 0x817   : > { %v5475_v38 = vpop.f32.mrb[21].mxu1 }
 0x818   : > { %v2334_v39 = vpop.f32.mrb[22].mxu1  ;;  %v5158_v38 = vld [vmem:[#allocation14] ss:$0 sm:$0xff] }
 0x819   : > { %v5476_v40 = vpop.f32.mrb[23].mxu1 }
 0x81e   : > { %v2377_v41 = vpop.f32.mrb[24].mxu1 }
 0x81f   : > { %v5481_v42 = vpop.f32.mrb[25].mxu1 }
 0x820   : > { %v2380_v43 = vpop.f32.mrb[26].mxu1 }
 0x821   : > { %v5482_v44 = vpop.f32.mrb[27].mxu1  ;;  %v6081_v43 = vld [vmem:[%s7366_s23] sm:$0xff]  ;;  %s5109_s23 = sshll.u32 %s1215_s1, 3 }
 0x822   : > { %s1217_s8 = scalar_lea.vmem [#allocation35], %s5109_s23 }
 0x823   : > { %s4760_s18 = sshll.u32 %s1217_s8, 4  ;;  %s7852_s18 = int_to_ptr.vmem [resolvable:$true] %s4760_s18 }
 0x83e   : > { %v2423_v45 = vpop.f32.mrb[28].mxu1 }
 0x83f   : > { %v2475_v46 = vcombine.low %v2331_v37, %v2423_v45  ;;  %v2476_v47 = vcombine.high %v2331_v37, %v2423_v45  ;;  %v5487_v48 = vpop.f32.mrb[29].mxu1 }
 0x840   : > { %v2426_v49 = vpop.f32.mrb[30].mxu1  ;;  %v5967_v48 = vld [vmem:[#allocation22 + $0x10] sm:$0xff]  }
 0x841   : > { %v5488_v50 = vpop.f32.mrb[31].mxu1  ;;  %v2483_v56 = vrot.slane %v2475_v46, %v7425_v9  ;;  %v2490_v57 = vrot.slane %v2476_v47, %v7425_v9  ;;  %v5965_v46 = vld [vmem:[#allocation22] sm:$0xff]   ;;  %v5966_v47 = vld [vmem:[#allocation22 + $0x8] sm:$0xff]   ;;  %v5968_v49 = vld [vmem:[#allocation22 + $0x18] sm:$0xff]  }
 0x842   : > { %v5969_v50 = vld [vmem:[#allocation22 + $0x20] sm:$0xff]  }
 0x846   : > { %v2469_v51 = vpop.f32.mrb[32].mxu1 }
 0x847   : > { %v2491_v52 = vcombine.low %v2377_v41, %v2469_v51  ;;  %v2492_v53 = vcombine.high %v2377_v41, %v2469_v51  ;;  %v5493_v54 = vpop.f32.mrb[33].mxu1  ;;  %v5970_v51 = vld [vmem:[#allocation22 + $0x28] sm:$0xff]  }
 0x848   : > { %v2472_v55 = vpop.f32.mrb[34].mxu1  ;;  %v1230_v54 = vld [vmem:[%s1226_s9 + $0x8] sm:$0x3] }
 0x849   : > { %v2499_v59 = vrot.slane %v2491_v52, %v7425_v9  ;;  %v2506_v60 = vrot.slane %v2492_v53, %v7425_v9  ;;  %v5494_v61 = vpop.f32.mrb[35].mxu1  ;;  %v5971_v52 = vld [vmem:[#allocation22 + $0x30] sm:$0xff]   ;;  %v1229_v53 = vld [vmem:[%s1226_s9] sm:$0xff]  ;;  %v5972_v55 = vld [vmem:[#allocation22 + $0x38] sm:$0xff]  }
 0x84b   : > { %v2507_v62 = vcombine.low %v2483_v56, %v2499_v59  ;;  %v2508_v63 = vcombine.high %v2483_v56, %v2499_v59  ;;  %v2523_v0 = vcombine.low %v2490_v57, %v2506_v60  ;;  %v2524_v1 = vcombine.high %v2490_v57, %v2506_v60 }
 0x84c   : > { %v7588_v56 = vpack.c.bf16 %v1230_v54, %v1229_v53 }
 0x84d   : > { %v2515_v3 = vrot.slane %v2507_v62, %v7428_v15  ;;  %v2522_v5 = vrot.slane %v2508_v63, %v7428_v15  ;;  %v2531_v7 = vrot.slane %v2523_v0, %v7428_v15  ;;  %v2538_v8 = vrot.slane %v2524_v1, %v7428_v15  ;;  %v5973_v62 = vld [vmem:[#allocation19] sm:$0xff]   ;;  %v5974_v63 = vld [vmem:[#allocation19 + $0x8] sm:$0xff]   ;;  %v5975_v0 = vld [vmem:[#allocation19 + $0x10] sm:$0xff]  }
 0x84e   : > { %5516 = vmatpush3.bf16.msra.mxu1 %v5973_v62  ;;  %v5976_v1 = vld [vmem:[#allocation19 + $0x18] sm:$0xff]  }
 0x84f   : > { %v2543_v10 = vcombine.low %v2515_v3, %v2522_v5  ;;  %v5156_v11 = vcombine.high %v2515_v3, %v2522_v5  ;;  %v2559_v12 = vcombine.low %v2531_v7, %v2538_v8  ;;  %v5157_v13 = vcombine.high %v2531_v7, %v2538_v8  ;;  %5517 = vmatprep.subr.bf16.mxu1 %v6831_v6  ;;  %v5978_v3 = vld [vmem:[#allocation19 + $0x28] sm:$0xff]   ;;  %v5979_v5 = vld [vmem:[#allocation19 + $0x30] sm:$0xff]   ;;  %v5980_v7 = vld [vmem:[#allocation19 + $0x38] sm:$0xff]  }
 0x850   : > { %v5178_v8 = vld [vmem:[#allocation23] ss:$0 sm:$0xff] }
 0x851   : > { %v2550_v58 = vrot.slane %v2543_v10, %v7425_v9  ;;  %v2558_v14 = vrot.slane %v5156_v11, %v7425_v9  ;;  %v2566_v18 = vrot.slane %v2559_v12, %v7425_v9  ;;  %v2574_v19 = vrot.slane %v5157_v13, %v7425_v9 }
 0x852   : > { %5518 = vmatpush3.bf16.msra.mxu1 %v5974_v63 }
 0x853   : > { %v2576_v20 = vcombine.high %v2550_v58, %v2558_v14  ;;  %v2592_v21 = vcombine.high %v2566_v18, %v2574_v19  ;;  %v2575_v22 = vcombine.low %v2550_v58, %v2558_v14  ;;  %v2591_v23 = vcombine.low %v2566_v18, %v2574_v19  ;;  %5519 = vmatprep.subr.bf16.mxu1 %v6831_v6 }
 0x855   : > { %v2590_v17 = vrot.slane %v2576_v20, %v7428_v15  ;;  %v2606_v25 = vrot.slane %v2592_v21, %v7428_v15  ;;  %v2583_v27 = vrot.slane %v2575_v22, %v7428_v15  ;;  %v2599_v28 = vrot.slane %v2591_v23, %v7428_v15 }
 0x856   : > { %5520 = vmatpush3.bf16.msra.mxu1 %v5975_v0 }
 0x857   : > { %v2609_v29 = vcombine.low %v2590_v17, %v2606_v25  ;;  %v2608_v30 = vcombine.high %v2583_v27, %v2599_v28  ;;  %v2610_v31 = vcombine.high %v2590_v17, %v2606_v25  ;;  %v2607_v32 = vcombine.low %v2583_v27, %v2599_v28  ;;  %5521 = vmatprep.subr.bf16.mxu1 %v6831_v6  ;;  %v5167_v25 = vld [vmem:[#allocation16] ss:$0 sm:$0xff] }
 0x859   : > { %2616 = vrot.lane.b32.xlu0 %v2609_v29, %s6835_s4  ;;  %2612 = vrot.lane.b32.xlu1 %v2608_v30, %s6833_s15  ;;  %v5168_v29 = vld [vmem:[#allocation17] ss:$0 sm:$0xff] }
 0x85a   : > { %5522 = vmatpush3.bf16.msra.mxu1 %v5976_v1 }
 0x85b   : > { %5523 = vmatprep.subr.bf16.mxu1 %v6831_v6 }
 0x85d   : > { %2620 = vrot.lane.b32.xlu1 %v2610_v31, %s6834_s2 }
 0x85e   : > { %5524 = vmatpush3.bf16.msra.mxu1 %v5977_v2 }
 0x85f   : > { %5525 = vmatprep.subr.bf16.mxu1 %v6831_v6 }
 0x862   : > { %5526 = vmatpush3.bf16.msra.mxu1 %v5978_v3 }
 0x863   : > { %5527 = vmatprep.subr.bf16.mxu1 %v6831_v6 }
 0x866   : > { %5528 = vmatpush3.bf16.msra.mxu1 %v5979_v5 }
 0x867   : > { %5529 = vmatprep.subr.bf16.mxu1 %v6831_v6 }
 0x86a   : > { %5530 = vmatpush3.bf16.msra.mxu1 %v5980_v7 }
 0x86b   : > { %5555 = vmatprep.subr.bf16.mxu1 %v6831_v6 }
 0x8cb   : > { %v2613_v24 = vpop.permute.xlu1 %2612  ;;  %v2617_v33 = vpop.permute.xlu0 %2616 }
 0x8cc   : > { %v2623_v34 = vsel %vm2056_vm3, %v2607_v32, %v2613_v24  ;;  %v5981_v32 = vld [vmem:[#allocation25] sm:$0xff]  }
 0x8cd   : > { %v2625_v26 = vsel %vm2624_vm7, %v2623_v34, %v2617_v33  ;;  %v5982_v33 = vld [vmem:[#allocation25 + $0x8] sm:$0xff]   ;;  %v5983_v34 = vld [vmem:[#allocation25 + $0x10] sm:$0xff]  }
 0x8cf   : > { %v2621_v35 = vpop.permute.xlu1 %2620 }
 0x8d0   : > { %v2627_v36 = vsel %vm2626_vm8, %v2625_v26, %v2621_v35  ;;  %v5984_v35 = vld [vmem:[#allocation25 + $0x18] sm:$0xff]   ;;  %v5985_v26 = vld [vmem:[#allocation25 + $0x20] sm:$0xff]  }
 0x8d1   : > { %v2628_v37 = vpack.c.bf16 %v2627_v36, %v2627_v36  ;;  %v5986_v36 = vld [vmem:[#allocation25 + $0x28] sm:$0xff]  }
 0x8d3   : > { %5512 = vmatmul.mubr.bf16.vlgmr.msra.gmra.mrb[8].mxu0 %v2628_v37  ;;  %v5987_v37 = vld [vmem:[#allocation25 + $0x30] sm:$0xff]  }
 0x8d4   : > { %5551 = vmatprep.mubr.msk.bf16.mxu0 %vm6832_vm0, %v6831_v6  ;;  %5536 = vmatpush3.bf16.msra.mxu0 %v5965_v46 }
 0x8d5   : > { %5537 = vmatprep.subr.bf16.mxu0 %v6831_v6 }
 0x8d8   : > { %5538 = vmatpush3.bf16.msra.mxu0 %v5966_v47 }
 0x8d9   : > { %5539 = vmatprep.subr.bf16.mxu0 %v6831_v6 }
 0x8dc   : > { %5540 = vmatpush3.bf16.msra.mxu0 %v5967_v48 }
 0x8dd   : > { %5541 = vmatprep.subr.bf16.mxu0 %v6831_v6 }
 0x8e0   : > { %5542 = vmatpush3.bf16.msra.mxu0 %v5968_v49 }
 0x8e1   : > { %5543 = vmatprep.subr.bf16.mxu0 %v6831_v6 }
 0x8e4   : > { %5544 = vmatpush3.bf16.msra.mxu0 %v5969_v50 }
 0x8e5   : > { %5545 = vmatprep.subr.bf16.mxu0 %v6831_v6 }
 0x8e8   : > { %5546 = vmatpush3.bf16.msra.mxu0 %v5970_v51 }
 0x8e9   : > { %5547 = vmatprep.subr.bf16.mxu0 %v6831_v6 }
 0x8ec   : > { %5548 = vmatpush3.bf16.msra.mxu0 %v5971_v52 }
 0x8ed   : > { %5549 = vmatprep.subr.bf16.mxu0 %v6831_v6 }
 0x8f0   : > { %5550 = vmatpush3.bf16.msra.mxu0 %v5972_v55 }
 0x8f1   : > { %5575 = vmatprep.subr.bf16.mxu0 %v6831_v6 }
 0x8f3   : > { %5552 = vmatmul.mubr.bf16.vlgmr.msra.gmra.mrb[12].mxu0 %v7588_v56 }
 0x8f4   : > { %5577 = vmatprep.mubr.msk.bf16.mxu0 %vm6832_vm0, %v6831_v6 }
 0x9a6   : > { %v2734_v39 = vpop.f32.mrb[8].mxu0 }
 0x9a7   : > { %v2735_v40 = vadd.f32 %v5158_v38, %v2734_v39  ;;  %v5513_v41 = vpop.f32.mrb[9].mxu0 }
 0x9a8   : > { %v2737_v42 = vpop.f32.mrb[10].mxu0 }
 0x9a9   : > { %v7576_v44 = vadd.f32 %v6081_v43, %v2735_v40  ;;  %v5514_v45 = vpop.f32.mrb[11].mxu0 }
 0x9ab   : > { %2743 = vadd.xlane.f32.xlu1 %v7576_v44 }
 0x9c6   : > { %v2993_v10 = vpop.f32.mrb[12].mxu0 }
 0x9c7   : > { %v7603_v11 = vadd.f32 %v5178_v8, %v2993_v10  ;;  %v5553_v12 = vpop.f32.mrb[13].mxu0 }
 0x9c8   : > { %v2996_v13 = vpop.f32.mrb[14].mxu0 }
 0x9c9   : > { %v2997_v16 = vadd.f32 %v5178_v8, %v2996_v13  ;;  %v5554_v58 = vpop.f32.mrb[15].mxu0 }
 0x9cb   : > { %3267 = vrot.lane.b32.xlu1 %v2997_v16, %s6834_s2 }
 0x9cf   : > { %3271 = vrot.lane.b32.xlu1 %v7603_v11, %s6835_s4 }
 0x9d3   : > { %3277 = vrot.lane.b32.xlu1 %v7603_v11, %s6833_s15 }
 0xa38   : > { %v2744_v57 = vpop.xlane.xlu1 %2743 }
 0xa39   : > { %v2745_v59 = vmul.f32 0.0078125, %v2744_v57 }
 0xa3b   : > { %v2746_v60 = vsub.f32 %v7576_v44, %v2745_v59 }
 0xa3d   : > { %v2747_v61 = vmul.f32 %v2746_v60, %v2746_v60  ;;  %v2757_v27 = vmul.f32 %v5167_v25, %v2746_v60  ;;  %v3268_v39 = vpop.permute.xlu1 %3267 }
 0xa3f   : > { %2748 = vadd.xlane.f32.xlu0 %v2747_v61 }
 0xa41   : > { %v3272_v41 = vpop.permute.xlu1 %3271 }
 0xa42   : > { %v3283_v43 = vcombine.low %v7603_v11, %v3272_v41  ;;  %v3284_v45 = vcombine.high %v7603_v11, %v3272_v41 }
 0xa44   : > { %v3291_v48 = vrot.slane %v3283_v43, %v7425_v9  ;;  %v3298_v51 = vrot.slane %v3284_v45, %v7425_v9  ;;  %v5169_v43 = vld [vmem:[#allocation20] ss:$0 sm:$0xff] }
 0xa45   : > { %v3278_v50 = vpop.permute.xlu1 %3277 }
 0xa55   : > { %3265 = vrot.lane.b32.xlu0 %v7603_v11, %s6834_s2 }
 0xa59   : > { %3273 = vrot.lane.b32.xlu0 %v2997_v16, %s6835_s4 }
 0xa5d   : > { %3279 = vrot.lane.b32.xlu0 %v2997_v16, %s6833_s15 }
 0xacc   : > { %v2749_v14 = vpop.xlane.xlu0 %2748 }
 0xacd   : > { %v2750_v18 = vmul.f32 0.007874016, %v2749_v14 }
 0xacf   : > { %6057 = vrsqrt.f32 %v2750_v18  ;;  %vm2760_vm9 = vcmp.eq.f32.partialorder %v2750_v18, inf  ;;  %v2763_v21 = vand.u32 2147483648, %v2750_v18  ;;  %vm2762_vm10 = vcmp.eq.f32.partialorder %v2750_v18, 0.0 }
 0xad0   : > { %v3266_v38 = vpop.permute.xlu0 %3265 }
 0xad1   : > { %v3299_v52 = vcombine.low %v3266_v38, %v3278_v50  ;;  %v3300_v53 = vcombine.high %v3266_v38, %v3278_v50 }
 0xad3   : > { %v3307_v55 = vrot.slane %v3299_v52, %v7425_v9  ;;  %v3314_v57 = vrot.slane %v3300_v53, %v7425_v9 }
 0xad4   : > { %v3274_v40 = vpop.permute.xlu0 %3273 }
 0xad5   : > { %v3351_v42 = vcombine.low %v2997_v16, %v3274_v40  ;;  %v3315_v60 = vcombine.low %v3291_v48, %v3307_v55  ;;  %v3316_v61 = vcombine.high %v3291_v48, %v3307_v55  ;;  %v3331_v62 = vcombine.low %v3298_v51, %v3314_v57 }
 0xad6   : > { %v3332_v63 = vcombine.high %v3298_v51, %v3314_v57  ;;  %v5187_v51 = vld [vmem:[#allocation26] ss:$0 sm:$0xff] }
 0xad7   : > { %v3358_v49 = vrot.slane %v3351_v42, %v7425_v9  ;;  %v3323_v0 = vrot.slane %v3315_v60, %v7428_v15  ;;  %v3330_v1 = vrot.slane %v3316_v61, %v7428_v15  ;;  %v3339_v2 = vrot.slane %v3331_v62, %v7428_v15 }
 0xad8   : > { %v3280_v46 = vpop.permute.xlu0 %3279  ;;  %v3346_v3 = vrot.slane %v3332_v63, %v7428_v15 }
 0xad9   : > { %v6058_v19 = vpop.eup %6057  ;;  %v3359_v47 = vcombine.low %v3268_v39, %v3280_v46  ;;  %v3375_v7 = vcombine.low %v3323_v0, %v3330_v1  ;;  %v5198_v8 = vcombine.high %v3323_v0, %v3330_v1 }
 0xada   : > { %v2759_v20 = vmul.f32 %v6058_v19, %v2750_v18  ;;  %v3391_v10 = vcombine.low %v3339_v2, %v3346_v3  ;;  %v5199_v11 = vcombine.high %v3339_v2, %v3346_v3 }
 0xadb   : > { %v3366_v54 = vrot.slane %v3359_v47, %v7425_v9  ;;  %v3382_v13 = vrot.slane %v3375_v7, %v7425_v9  ;;  %v3390_v16 = vrot.slane %v5198_v8, %v7425_v9 }
 0xadc   : > { %v2761_v22 = vsel %vm2760_vm9, %v2750_v18, %v2759_v20  ;;  %v3398_v58 = vrot.slane %v3391_v10, %v7425_v9  ;;  %v3406_v14 = vrot.slane %v5199_v11, %v7425_v9  ;;  %v5988_v20 = vld [vmem:[#allocation25 + $0x38] sm:$0xff]  }
 0xadd   : > { %v2764_v23 = vsel %vm2762_vm10, %v2763_v21, %v2761_v22  ;;  %v3367_v59 = vcombine.low %v3358_v49, %v3366_v54  ;;  %v3407_v21 = vcombine.low %v3382_v13, %v3390_v16 }
 0xade   : > { %v2765_v17 = vadd.f32 1e-06, %v2764_v23  ;;  %v3423_v22 = vcombine.low %v3398_v58, %v3406_v14  ;;  %v3408_v23 = vcombine.high %v3382_v13, %v3390_v16 }
 0xadf   : > { %v3374_v5 = vrot.slane %v3367_v59, %v7428_v15  ;;  %v3415_v25 = vrot.slane %v3407_v21, %v7428_v15 }
 0xae0   : > { %6059 = vrcp.f32 %v2765_v17  ;;  %v3424_v17 = vcombine.high %v3398_v58, %v3406_v14 }
 0xae1   : > { %v3450_v12 = vcombine.high %v3374_v5, %v6831_v6  ;;  %v3449_v18 = vrot.slane %v3374_v5, %v7425_v9 }
 0xae3   : > { %v3457_v19 = vrot.slane %v3450_v12, %v7425_v9 }
 0xaea   : > { %v6060_v28 = vpop.eup %6059 }
 0xaeb   : > { %v2767_v30 = vmul.f32 %v6060_v28, %v2757_v27  ;;  %v3431_v27 = vrot.slane %v3423_v22, %v7428_v15  ;;  %v3458_v28 = vcombine.low %v3449_v18, %v3457_v19 }
 0xaed   : > { %v2774_v31 = vadd.f32 %v5168_v29, %v2767_v30  ;;  %v3422_v29 = vrot.slane %v3408_v23, %v7428_v15  ;;  %v3438_v30 = vrot.slane %v3424_v17, %v7428_v15 }
 0xaef   : > { %v2775_v24 = vpack.c.bf16 %v2774_v31, %v2774_v31  ;;  %v3459_v31 = vcombine.high %v3449_v18, %v3457_v19 }
 0xaf1   : > { %5532 = vmatmul.mubr.bf16.vlgmr.msra.gmra.mrb[36].mxu1 %v2775_v24  ;;  %v3466_v24 = vrot.slane %v3458_v28, %v7428_v15 }
 0xaf2   : > { %5556 = vmatpush3.bf16.msra.mxu1 %v5981_v32  ;;  %5571 = vmatprep.mubr.msk.bf16.mxu1 %vm6832_vm0, %v6831_v6  ;;  %v3439_v32 = vcombine.low %v3415_v25, %v3431_v27 }
 0xaf3   : > { %5557 = vmatprep.subr.bf16.mxu1 %v6831_v6 }
 0xaf6   : > { %5558 = vmatpush3.bf16.msra.mxu1 %v5982_v33  ;;  %v3441_v33 = vcombine.low %v3422_v29, %v3438_v30 }
 0xaf7   : > { %5559 = vmatprep.subr.bf16.mxu1 %v6831_v6 }
 0xafa   : > { %5560 = vmatpush3.bf16.msra.mxu1 %v5983_v34  ;;  %v3473_v34 = vrot.slane %v3459_v31, %v7428_v15 }
 0xafb   : > { %5561 = vmatprep.subr.bf16.mxu1 %v6831_v6 }
 0xafc   : > { %v7654_v38 = vpack.c.bf16 %v3473_v34, %v3441_v33  ;;  %v3475_v39 = vcombine.high %v3473_v34, %v6831_v6 }
 0xafe   : > { %5562 = vmatpush3.bf16.msra.mxu1 %v5984_v35  ;;  %v3476_v35 = vpack.c.bf16 %v3466_v24, %v3439_v32 }
 0xaff   : > { %5563 = vmatprep.subr.bf16.mxu1 %v6831_v6 }
 0xb00   : > { %v3703_v40 = vsel %vm2056_vm3, %v3476_v35, 0 }
 0xb01   : > { %5576 = vmatpush3.bf16.xpose.msra.mxu0 %v3703_v40 }
 0xb02   : > { %5564 = vmatpush3.bf16.msra.mxu1 %v5985_v26  ;;  %v3440_v26 = vcombine.high %v3415_v25, %v3431_v27  ;;  %5587 = vmatprep.subr.bf16.mxu0 %v6831_v6 }
 0xb03   : > { %5565 = vmatprep.subr.bf16.mxu1 %v6831_v6 }
 0xb06   : > { %5566 = vmatpush3.bf16.msra.mxu1 %v5986_v36  ;;  %v3474_v36 = vcombine.high %v3466_v24, %v6831_v6 }
 0xb07   : > { %5567 = vmatprep.subr.bf16.mxu1 %v6831_v6 }
 0xb08   : > { %v3477_v41 = vpack.c.bf16 %v3474_v36, %v3440_v26 }
 0xb0a   : > { %5568 = vmatpush3.bf16.msra.mxu1 %v5987_v37  ;;  %v3442_v37 = vcombine.high %v3422_v29, %v3438_v30  ;;  %v3749_v42 = vsel %vm2056_vm3, %v3477_v41, 0 }
 0xb0b   : > { %5569 = vmatprep.subr.bf16.mxu1 %v6831_v6 }
 0xb0e   : > { %5570 = vmatpush3.bf16.msra.mxu1 %v5988_v20 }
 0xb0f   : > { %5581 = vmatprep.subr.bf16.mxu1 %v6831_v6 }
 0xb11   : > { %5572 = vmatmul.mubr.bf16.vlgmr.msra.gmra.mrb[40].mxu1 %v7588_v56  ;;  %v7658_v56 = vpack.c.bf16 %v3475_v39, %v3442_v37  ;;  %v3795_v39 = vsel %vm2056_vm3, %v7654_v38, 0  ;;  %v2776_v38 = vld [vmem:[#allocation5] sm:$0xff] }
 0xb12   : > { %5583 = vmatprep.mubr.msk.bf16.mxu1 %vm6832_vm0, %v6831_v6  ;;  %vm3697_vm11 = vcmp.eq.f32.partialorder %v2776_v38, 0.0 }
 0xb13   : > { %v3841_v40 = vsel %vm2056_vm3, %v7658_v56, 0  ;;  %v3698_v56 = vsel %vm3697_vm11, -1e+09, %v6831_v6 }
 0xb17   : > { %5582 = vmatpush3.bf16.xpose.msra.mxu1 %v3749_v42 }
 0xb18   : > { %5593 = vmatprep.subr.bf16.mxu1 %v6831_v6 }
 0xbc4   : > { %v2882_v45 = vpop.f32.mrb[36].mxu1 }
 0xbc5   : > { %v2883_v46 = vadd.f32 %v5169_v43, %v2882_v45  ;;  %v5533_v47 = vpop.f32.mrb[37].mxu1 }
 0xbc6   : > { %v2885_v48 = vpop.f32.mrb[38].mxu1 }
 0xbc7   : > { %v3112_v49 = vmul.f32 0.17677669, %v2883_v46  ;;  %v5534_v50 = vpop.f32.mrb[39].mxu1 }
 0xbc9   : > { %3117 = vrot.lane.b32.xlu0 %v3112_v49, %s6835_s4  ;;  %3114 = vrot.lane.b32.xlu1 %v3112_v49, %s6834_s2 }
 0xbcd   : > { %3120 = vrot.lane.b32.xlu1 %v3112_v49, %s6833_s15 }
 0xbe4   : > { %v3105_v52 = vpop.f32.mrb[40].mxu1 }
 0xbe5   : > { %v7666_v53 = vadd.f32 %v5187_v51, %v3105_v52  ;;  %v5573_v54 = vpop.f32.mrb[41].mxu1 }
 0xbe6   : > { %v3108_v55 = vpop.f32.mrb[42].mxu1 }
 0xbe7   : > { %v7668_v57 = vadd.f32 %v5187_v51, %v3108_v55  ;;  %v5574_v59 = vpop.f32.mrb[43].mxu1  ;;  %3482 = vrot.lane.b32.xlu1 %v7666_v53, %s6834_s2 }
 0xc3b   : > { %v3118_v60 = vpop.permute.xlu0 %3117  ;;  %v3115_v61 = vpop.permute.xlu1 %3114 }
 0xc3c   : > { %v3123_v62 = vcombine.low %v3112_v49, %v3118_v60  ;;  %v3124_v63 = vcombine.high %v3112_v49, %v3118_v60 }
 0xc3e   : > { %v3131_v3 = vrot.slane %v3123_v62, %v7425_v9  ;;  %v3138_v5 = vrot.slane %v3124_v63, %v7425_v9 }
 0xc3f   : > { %v3121_v0 = vpop.permute.xlu1 %3120 }
 0xc40   : > { %v3139_v1 = vcombine.low %v3115_v61, %v3121_v0  ;;  %v3140_v2 = vcombine.high %v3115_v61, %v3121_v0 }
 0xc42   : > { %v3147_v7 = vrot.slane %v3139_v1, %v7425_v9  ;;  %v3154_v8 = vrot.slane %v3140_v2, %v7425_v9 }
 0xc44   : > { %v3155_v10 = vcombine.low %v3131_v3, %v3147_v7  ;;  %v3156_v11 = vcombine.high %v3131_v3, %v3147_v7  ;;  %v3171_v12 = vcombine.low %v3138_v5, %v3154_v8  ;;  %v3172_v13 = vcombine.high %v3138_v5, %v3154_v8 }
 0xc46   : > { %v3163_v16 = vrot.slane %v3155_v10, %v7428_v15  ;;  %v3170_v58 = vrot.slane %v3156_v11, %v7428_v15  ;;  %v3179_v14 = vrot.slane %v3171_v12, %v7428_v15  ;;  %v3186_v18 = vrot.slane %v3172_v13, %v7428_v15 }
 0xc48   : > { %v3191_v19 = vcombine.low %v3163_v16, %v3170_v58  ;;  %v5196_v20 = vcombine.high %v3163_v16, %v3170_v58  ;;  %v3207_v21 = vcombine.low %v3179_v14, %v3186_v18  ;;  %v5197_v22 = vcombine.high %v3179_v14, %v3186_v18 }
 0xc4a   : > { %v3198_v23 = vrot.slane %v3191_v19, %v7425_v9  ;;  %v3206_v17 = vrot.slane %v5196_v20, %v7425_v9  ;;  %v3214_v25 = vrot.slane %v3207_v21, %v7425_v9  ;;  %v3222_v27 = vrot.slane %v5197_v22, %v7425_v9 }
 0xc4c   : > { %v3223_v28 = vcombine.low %v3198_v23, %v3206_v17  ;;  %v3239_v29 = vcombine.low %v3214_v25, %v3222_v27  ;;  %v3224_v30 = vcombine.high %v3198_v23, %v3206_v17  ;;  %v3240_v31 = vcombine.high %v3214_v25, %v3222_v27 }
 0xc4e   : > { %v3231_v32 = vrot.slane %v3223_v28, %v7428_v15  ;;  %v3247_v24 = vrot.slane %v3239_v29, %v7428_v15  ;;  %v3238_v36 = vrot.slane %v3224_v30, %v7428_v15  ;;  %v3254_v37 = vrot.slane %v3240_v31, %v7428_v15 }
 0xc50   : > { %v3255_v33 = vcombine.low %v3231_v32, %v3247_v24  ;;  %v3256_v34 = vcombine.high %v3231_v32, %v3247_v24  ;;  %v3257_v41 = vcombine.low %v3238_v36, %v3254_v37  ;;  %v3258_v42 = vcombine.high %v3238_v36, %v3254_v37 }
 0xc52   : > { %v3259_v35 = vpack.c.bf16 %v3255_v33, %v3255_v33  ;;  %v3260_v26 = vpack.c.bf16 %v3256_v34, %v3256_v34  ;;  %v3261_v43 = vpack.c.bf16 %v3257_v41, %v3257_v41  ;;  %v3262_v45 = vpack.c.bf16 %v3258_v42, %v3258_v42 }
 0xc54   : > { %5578 = vmatmul.mubr.msk.bf16.vlgmr.msra.gmra.mrb[16].mxu0 %vm2056_vm3, %v3259_v35  ;;  %5584 = vmatmul.mubr.msk.bf16.vlgmr.msra.gmra.mrb[44].mxu1 %vm2056_vm3, %v3260_v26 }
 0xc55   : > { %5588 = vmatpush3.bf16.xpose.msra.mxu0 %v3795_v39  ;;  %5594 = vmatpush3.bf16.xpose.msra.mxu1 %v3841_v40 }
 0xc56   : > { %5589 = vmatprep.mubr.msk.bf16.mxu0 %vm6832_vm0, %v6831_v6  ;;  %5595 = vmatprep.mubr.msk.bf16.mxu1 %vm6832_vm0, %v6831_v6 }
 0xc57   : > { %5599 = vmatprep.subr.bf16.mxu0 %v6831_v6  ;;  %5605 = vmatprep.subr.bf16.mxu1 %v6831_v6 }
 0xc59   : > { %v3483_v13 = vpop.permute.xlu1 %3482 }
 0xc5c   : > { %5590 = vmatmul.mubr.msk.bf16.vlgmr.msra.gmra.mrb[20].mxu0 %vm2056_vm3, %v3261_v43  ;;  %5596 = vmatmul.mubr.msk.bf16.vlgmr.msra.gmra.mrb[48].mxu1 %vm2056_vm3, %v3262_v45 }
 0xc5d   : > { %5601 = vmatprep.mubr.msk.bf16.mxu0 %vm6832_vm0, %v6831_v6  ;;  %5607 = vmatprep.mubr.msk.bf16.mxu1 %vm6832_vm0, %v6831_v6 }
 0xd27   : > { %v3739_v46 = vpop.f32.mrb[16].mxu0  ;;  %v3785_v47 = vpop.f32.mrb[44].mxu1 }
 0xd28   : > { %v3740_v48 = vadd.f32 %v3739_v46, %v3698_v56  ;;  %v3786_v49 = vadd.f32 %v3785_v47, %v3698_v56  ;;  %v5579_v50 = vpop.f32.mrb[17].mxu0  ;;  %v5585_v51 = vpop.f32.mrb[45].mxu1 }
 0xd29   : > { %v3742_v52 = vpop.f32.mrb[18].mxu0  ;;  %v3788_v54 = vpop.f32.mrb[46].mxu1 }
 0xd2a   : > { %v5580_v55 = vpop.f32.mrb[19].mxu0  ;;  %v5586_v59 = vpop.f32.mrb[47].mxu1  ;;  %v3887_v60 = vsel %vm3883_vm12, %v3786_v49, -inf  ;;  %v3884_v61 = vsel %vm3883_vm12, %v3740_v48, -inf }
 0xd2b   : > { %3888 = vmax.xlane.f32.xlu1 %v3887_v60  ;;  %3885 = vmax.xlane.f32.xlu0 %v3884_v61 }
 0xd2f   : > { %v3831_v62 = vpop.f32.mrb[20].mxu0  ;;  %v3877_v63 = vpop.f32.mrb[48].mxu1 }
 0xd30   : > { %v3832_v0 = vadd.f32 %v3831_v62, %v3698_v56  ;;  %v5591_v1 = vpop.f32.mrb[21].mxu0  ;;  %v5597_v2 = vpop.f32.mrb[49].mxu1  ;;  %v3878_v7 = vadd.f32 %v3877_v63, %v3698_v56 }
 0xd31   : > { %v3834_v3 = vpop.f32.mrb[22].mxu0  ;;  %v3880_v5 = vpop.f32.mrb[50].mxu1 }
 0xd32   : > { %v5592_v8 = vpop.f32.mrb[23].mxu0  ;;  %v5598_v10 = vpop.f32.mrb[51].mxu1  ;;  %v3890_v11 = vsel %vm3883_vm12, %v3832_v0, -inf  ;;  %v3893_v12 = vsel %vm3883_vm12, %v3878_v7, -inf }
 0xd33   : > { %3891 = vmax.xlane.f32.xlu0 %v3890_v11 }
 0xd37   : > { %3894 = vmax.xlane.f32.xlu0 %v3893_v12 }
 0xd3c   : > { %3488 = vrot.lane.b32.xlu1 %v7666_v53, %s6835_s4 }
 0xd40   : > { %3490 = vrot.lane.b32.xlu1 %v7668_v57, %s6835_s4 }
 0xd4d   : > { %3484 = vrot.lane.b32.xlu0 %v7668_v57, %s6834_s2 }
 0xdb8   : > { %v3889_v16 = vpop.xlane.xlu1 %3888  ;;  %v3886_v58 = vpop.xlane.xlu0 %3885 }
 0xdb9   : > { %v3897_v14 = vsub.f32 %v3786_v49, %v3889_v16  ;;  %v3896_v18 = vsub.f32 %v3740_v48, %v3886_v58 }
 0xdbb   : > { %v3902_v19 = vmul.f32 1.442695, %v3897_v14  ;;  %v3900_v20 = vmul.f32 1.442695, %v3896_v18 }
 0xdbc   : > { %v3489_v35 = vpop.permute.xlu1 %3488 }
 0xdbd   : > { %6061 = vpow2.f32 %v3902_v19  ;;  %v3500_v40 = vcombine.low %v7666_v53, %v3489_v35  ;;  %v3501_v41 = vcombine.high %v7666_v53, %v3489_v35 }
 0xdbe   : > { %6063 = vpow2.f32 %v3900_v20 }
 0xdbf   : > { %v3508_v47 = vrot.slane %v3500_v40, %v7425_v9  ;;  %v3515_v48 = vrot.slane %v3501_v41, %v7425_v9 }
 0xdc0   : > { %v3892_v25 = vpop.xlane.xlu0 %3891  ;;  %v3491_v36 = vpop.permute.xlu1 %3490 }
 0xdc1   : > { %v3898_v28 = vsub.f32 %v3832_v0, %v3892_v25  ;;  %v3568_v42 = vcombine.low %v7668_v57, %v3491_v36 }
 0xdc3   : > { %v3904_v30 = vmul.f32 1.442695, %v3898_v28  ;;  %v3575_v51 = vrot.slane %v3568_v42, %v7425_v9 }
 0xdc4   : > { %v3895_v27 = vpop.xlane.xlu0 %3894 }
 0xdc5   : > { %v3899_v29 = vsub.f32 %v3878_v7, %v3895_v27  ;;  %6065 = vpow2.f32 %v3904_v30 }
 0xdc7   : > { %v7717_v21 = vpop.eup %6061  ;;  %v3906_v31 = vmul.f32 1.442695, %v3899_v29 }
 0xdc8   : > { %v7719_v22 = vpop.eup %6063  ;;  %v3911_v23 = vsel %vm3883_vm12, %v7717_v21, 0.0  ;;  %v3485_v26 = vpop.permute.xlu0 %3484 }
 0xdc9   : > { %v3908_v17 = vsel %vm3883_vm12, %v7719_v22, 0.0  ;;  %3912 = vadd.xlane.f32.xlu0 %v3911_v23  ;;  %6067 = vpow2.f32 %v3906_v31 }
 0xdca   : > { %3909 = vadd.xlane.f32.xlu1 %v3908_v17 }
 0xdcf   : > { %v7729_v32 = vpop.eup %6065 }
 0xdd0   : > { %v3914_v33 = vsel %vm3883_vm12, %v7729_v32, 0.0 }
 0xdd3   : > { %v7731_v24 = vpop.eup %6067 }
 0xdd4   : > { %v3917_v34 = vsel %vm3883_vm12, %v7731_v24, 0.0 }
 0xddb   : > { %3496 = vrot.lane.b32.xlu1 %v7668_v57, %s6833_s15 }
 0xddf   : > { %3494 = vrot.lane.b32.xlu0 %v7666_v53, %s6833_s15 }
 0xdfe   : > { %3915 = vadd.xlane.f32.xlu0 %v3914_v33 }
 0xdff   : > { %3918 = vadd.xlane.f32.xlu1 %v3917_v34 }
 0xe56   : > { %v3913_v37 = vpop.xlane.xlu0 %3912 }
 0xe57   : > { %v3910_v39 = vpop.xlane.xlu1 %3909  ;;  %6069 = vrcp.f32 %v3913_v37 }
 0xe58   : > { %6071 = vrcp.f32 %v3910_v39 }
 0xe5a   : > { %v3495_v43 = vpop.permute.xlu0 %3494 }
 0xe5b   : > { %v3497_v45 = vpop.permute.xlu1 %3496  ;;  %v3516_v38 = vcombine.low %v3483_v13, %v3495_v43  ;;  %v3517_v56 = vcombine.high %v3483_v13, %v3495_v43 }
 0xe5c   : > { %v3576_v46 = vcombine.low %v3485_v26, %v3497_v45 }
 0xe5d   : > { %v3524_v49 = vrot.slane %v3516_v38, %v7425_v9  ;;  %v3531_v50 = vrot.slane %v3517_v56, %v7425_v9 }
 0xe5e   : > { %v3583_v53 = vrot.slane %v3576_v46, %v7425_v9 }
 0xe5f   : > { %v3532_v52 = vcombine.low %v3508_v47, %v3524_v49  ;;  %v3533_v57 = vcombine.high %v3508_v47, %v3524_v49  ;;  %v3548_v54 = vcombine.low %v3515_v48, %v3531_v50  ;;  %v3549_v55 = vcombine.high %v3515_v48, %v3531_v50 }
 0xe60   : > { %v3584_v59 = vcombine.low %v3575_v51, %v3583_v53 }
 0xe61   : > { %v3540_v60 = vrot.slane %v3532_v52, %v7428_v15  ;;  %v3547_v61 = vrot.slane %v3533_v57, %v7428_v15  ;;  %v3556_v62 = vrot.slane %v3548_v54, %v7428_v15  ;;  %v3563_v63 = vrot.slane %v3549_v55, %v7428_v15  ;;  %v6070_v18 = vpop.eup %6069 }
 0xe62   : > { %v3591_v0 = vrot.slane %v3584_v59, %v7428_v15  ;;  %v6072_v28 = vpop.eup %6071  ;;  %v3925_v41 = vmul.f32 %v6070_v18, %v7717_v21  ;;  %v5989_v59 = vld [vmem:[#allocation28] sm:$0xff]  }
 0xe63   : > { %v3592_v1 = vcombine.low %v3540_v60, %v3547_v61  ;;  %v5200_v2 = vcombine.high %v3540_v60, %v3547_v61  ;;  %v3608_v3 = vcombine.low %v3556_v62, %v3563_v63  ;;  %v5201_v7 = vcombine.high %v3556_v62, %v3563_v63  ;;  %v5990_v60 = vld [vmem:[#allocation28 + $0x8] sm:$0xff]   ;;  %v5991_v61 = vld [vmem:[#allocation28 + $0x10] sm:$0xff]  }
 0xe64   : > { %v3667_v5 = vcombine.high %v3591_v0, %v6831_v6  ;;  %v3666_v12 = vrot.slane %v3591_v0, %v7425_v9  ;;  %v3924_v40 = vmul.f32 %v6072_v28, %v7719_v22  ;;  %v3929_v48 = vpack.c.bf16 %v3925_v41, %v3925_v41  ;;  %v5994_v62 = vld [vmem:[#allocation28 + $0x28] sm:$0xff]  }
 0xe65   : > { %v3599_v8 = vrot.slane %v3592_v1, %v7425_v9  ;;  %v3607_v10 = vrot.slane %v5200_v2, %v7425_v9  ;;  %v3615_v11 = vrot.slane %v3608_v3, %v7425_v9  ;;  %v3623_v16 = vrot.slane %v5201_v7, %v7425_v9 }
 0xe66   : > { %v3674_v13 = vrot.slane %v3667_v5, %v7425_v9  ;;  %v3928_v47 = vpack.c.bf16 %v3924_v40, %v3924_v40 }
 0xe67   : > { %v3624_v58 = vcombine.low %v3599_v8, %v3607_v10  ;;  %v3625_v14 = vcombine.high %v3599_v8, %v3607_v10  ;;  %v3640_v19 = vcombine.low %v3615_v11, %v3623_v16  ;;  %v3641_v23 = vcombine.high %v3615_v11, %v3623_v16 }
 0xe68   : > { %v3675_v20 = vcombine.low %v3666_v12, %v3674_v13  ;;  %v3676_v17 = vcombine.high %v3666_v12, %v3674_v13 }
 0xe69   : > { %v3632_v25 = vrot.slane %v3624_v58, %v7428_v15  ;;  %v3639_v27 = vrot.slane %v3625_v14, %v7428_v15  ;;  %v3648_v29 = vrot.slane %v3640_v19, %v7428_v15  ;;  %v3655_v31 = vrot.slane %v3641_v23, %v7428_v15 }
 0xe6a   : > { %v3683_v30 = vrot.slane %v3675_v20, %v7428_v15  ;;  %v3690_v33 = vrot.slane %v3676_v17, %v7428_v15 }
 0xe6b   : > { %v3656_v34 = vcombine.low %v3632_v25, %v3648_v29  ;;  %v3657_v35 = vcombine.high %v3632_v25, %v3648_v29  ;;  %v3658_v36 = vcombine.low %v3639_v27, %v3655_v31  ;;  %v3659_v37 = vcombine.high %v3639_v27, %v3655_v31 }
 0xe6c   : > { %v3691_v26 = vcombine.high %v3683_v30, %v6831_v6  ;;  %v3692_v39 = vcombine.high %v3690_v33, %v6831_v6 }
 0xe6d   : > { %v3693_v42 = vpack.c.bf16 %v3683_v30, %v3656_v34  ;;  %v3695_v56 = vpack.c.bf16 %v3690_v33, %v3658_v36 }
 0xe6e   : > { %v3694_v43 = vpack.c.bf16 %v3691_v26, %v3657_v35  ;;  %v3696_v46 = vpack.c.bf16 %v3692_v39, %v3659_v37  ;;  %v5995_v35 = vld [vmem:[#allocation28 + $0x30] sm:$0xff]  }
 0xe6f   : > { %v3937_v45 = vsel %vm3935_vm13, %v3693_v42, 0  ;;  %v4029_v21 = vsel %vm3935_vm13, %v3695_v56, 0 }
 0xe70   : > { %v3983_v38 = vsel %vm3935_vm13, %v3694_v43, 0  ;;  %5600 = vmatpush3.bf16.msra.mxu0 %v3937_v45  ;;  %v4075_v22 = vsel %vm3935_vm13, %v3696_v46, 0  ;;  %v5996_v45 = vld [vmem:[#allocation28 + $0x38] sm:$0xff]  }
 0xe71   : > { %5606 = vmatpush3.bf16.msra.mxu1 %v3983_v38  ;;  %5611 = vmatprep.subr.bf16.mxu0 %v6831_v6 }
 0xe72   : > { %5617 = vmatprep.subr.bf16.mxu1 %v6831_v6 }
 0xe73   : > { %5602 = vmatmul.mubr.msk.bf16.vlgmr.msra.gmra.mrb[24].mxu0 %vm3883_vm12, %v3928_v47 }
 0xe74   : > { %5608 = vmatmul.mubr.msk.bf16.vlgmr.msra.gmra.mrb[52].mxu1 %vm3883_vm12, %v3929_v48  ;;  %5612 = vmatpush3.bf16.msra.mxu0 %v4029_v21 }
 0xe75   : > { %5618 = vmatpush3.bf16.msra.mxu1 %v4075_v22  ;;  %5613 = vmatprep.mubr.msk.bf16.mxu0 %vm6832_vm0, %v6831_v6 }
 0xe76   : > { %5619 = vmatprep.mubr.msk.bf16.mxu1 %vm6832_vm0, %v6831_v6  ;;  %5623 = vmatprep.subr.bf16.mxu0 %v6831_v6 }
 0xe8b   : > { %v3916_v49 = vpop.xlane.xlu0 %3915 }
 0xe8c   : > { %v3919_v50 = vpop.xlane.xlu1 %3918  ;;  %6073 = vrcp.f32 %v3916_v49 }
 0xe8d   : > { %6075 = vrcp.f32 %v3919_v50 }
 0xe96   : > { %v6074_v51 = vpop.eup %6073 }
 0xe97   : > { %v6076_v53 = vpop.eup %6075  ;;  %v3926_v52 = vmul.f32 %v6074_v51, %v7729_v32  ;;  %v5992_v32 = vld [vmem:[#allocation28 + $0x18] sm:$0xff]  }
 0xe98   : > { %v3927_v57 = vmul.f32 %v6076_v53, %v7731_v24  ;;  %v5993_v24 = vld [vmem:[#allocation28 + $0x20] sm:$0xff]  }
 0xe99   : > { %v3930_v54 = vpack.c.bf16 %v3926_v52, %v3926_v52 }
 0xe9a   : > { %v3931_v55 = vpack.c.bf16 %v3927_v57, %v3927_v57 }
 0xe9b   : > { %5614 = vmatmul.mubr.msk.bf16.vlgmr.msra.gmra.mrb[28].mxu0 %vm3883_vm12, %v3930_v54 }
 0xe9c   : > { %5620 = vmatmul.mubr.msk.bf16.vlgmr.msra.gmra.mrb[56].mxu1 %vm3883_vm12, %v3931_v55  ;;  %5639 = vmatprep.mubr.msk.bf16.mxu0 %vm6832_vm0, %v6831_v6 }
 0xe9d   : > { %5624 = vmatpush3.bf16.msra.mxu0 %v5989_v59 }
 0xe9e   : > { %5625 = vmatprep.subr.bf16.mxu0 %v6831_v6 }
 0xea1   : > { %5626 = vmatpush3.bf16.msra.mxu0 %v5990_v60 }
 0xea2   : > { %5627 = vmatprep.subr.bf16.mxu0 %v6831_v6 }
 0xea5   : > { %5628 = vmatpush3.bf16.msra.mxu0 %v5991_v61 }
 0xea6   : > { %5629 = vmatprep.subr.bf16.mxu0 %v6831_v6 }
 0xea9   : > { %5630 = vmatpush3.bf16.msra.mxu0 %v5992_v32 }
 0xeaa   : > { %5631 = vmatprep.subr.bf16.mxu0 %v6831_v6 }
 0xead   : > { %5632 = vmatpush3.bf16.msra.mxu0 %v5993_v24 }
 0xeae   : > { %5633 = vmatprep.subr.bf16.mxu0 %v6831_v6 }
 0xeb1   : > { %5634 = vmatpush3.bf16.msra.mxu0 %v5994_v62  ;;  %v5212_v62 = vld [vmem:[#allocation29] ss:$0 sm:$0xff] }
 0xeb2   : > { %5635 = vmatprep.subr.bf16.mxu0 %v6831_v6 }
 0xeb5   : > { %5636 = vmatpush3.bf16.msra.mxu0 %v5995_v35  ;;  %v6023_v35 = vld [vmem:[#allocation34 + $0x48] sm:$0xff]  }
 0xeb6   : > { %5637 = vmatprep.subr.bf16.mxu0 %v6831_v6 }
 0xeb9   : > { %5638 = vmatpush3.bf16.msra.mxu0 %v5996_v45  ;;  %v6032_v45 = vld [vmem:[#allocation34 + $0x28] sm:$0xff]  }
 0xf46   : > { %v3973_v63 = vpop.f32.mrb[24].mxu0 }
 0xf47   : > { %v4019_v0 = vpop.f32.mrb[52].mxu1  ;;  %v5603_v1 = vpop.f32.mrb[25].mxu0 }
 0xf48   : > { %v5609_v2 = vpop.f32.mrb[53].mxu1  ;;  %v3976_v3 = vpop.f32.mrb[26].mxu0 }
 0xf49   : > { %v4022_v5 = vpop.f32.mrb[54].mxu1  ;;  %v5604_v7 = vpop.f32.mrb[27].mxu0 }
 0xf4a   : > { %v5610_v8 = vpop.f32.mrb[55].mxu1 }
 0xf6e   : > { %v4065_v10 = vpop.f32.mrb[28].mxu0 }
 0xf6f   : > { %v4117_v11 = vcombine.low %v3973_v63, %v4065_v10  ;;  %v4118_v12 = vcombine.high %v3973_v63, %v4065_v10  ;;  %v4111_v13 = vpop.f32.mrb[56].mxu1  ;;  %v5615_v16 = vpop.f32.mrb[29].mxu0 }
 0xf70   : > { %v4133_v58 = vcombine.low %v4019_v0, %v4111_v13  ;;  %v4134_v14 = vcombine.high %v4019_v0, %v4111_v13  ;;  %v5621_v18 = vpop.f32.mrb[57].mxu1  ;;  %v4068_v19 = vpop.f32.mrb[30].mxu0  ;;  %v6002_v13 = vld [vmem:[%s7995_s11 + $0x14] ss:$8 sps:$4 sm:$0xff]   ;;  %v6000_v16 = vld [vmem:[%s7995_s11 + $0x10] ss:$8 sps:$4 sm:$0xff]  }
 0xf71   : > { %v4125_v20 = vrot.slane %v4117_v11, %v7425_v9  ;;  %v4132_v23 = vrot.slane %v4118_v12, %v7425_v9  ;;  %v4114_v17 = vpop.f32.mrb[58].mxu1  ;;  %v5616_v25 = vpop.f32.mrb[31].mxu0  ;;  %v5999_v12 = vld [vmem:[%s7995_s11 + $0x4] ss:$8 sps:$4 sm:$0xff]   ;;  %v6008_v18 = vld [vmem:[%s7995_s11 + $0x34] ss:$8 sps:$4 sm:$0xff]  }
 0xf72   : > { %v4141_v27 = vrot.slane %v4133_v58, %v7425_v9  ;;  %v4148_v28 = vrot.slane %v4134_v14, %v7425_v9  ;;  %v5622_v29 = vpop.f32.mrb[59].mxu1  ;;  %4524 = vmatprep.subr.bf16.mxu1 %v5999_v12  ;;  %v6005_v58 = vld [vmem:[%s7995_s11 + $0x24] ss:$8 sps:$4 sm:$0xff]   ;;  %v6003_v14 = vld [vmem:[%s7995_s11 + $0x20] ss:$8 sps:$4 sm:$0xff]  }
 0xf73   : > { %v6006_v19 = vld [vmem:[%s7995_s11 + $0x30] ss:$8 sps:$4 sm:$0xff]   ;;  %v6014_v17 = vld [vmem:[%s7995_s11 + $0x54] ss:$8 sps:$4 sm:$0xff]   ;;  %v6015_v29 = vld [vmem:[%s7995_s11 + $0x60] ss:$8 sps:$4 sm:$0xff]  }
 0xf74   : > { %v4149_v30 = vcombine.low %v4125_v20, %v4141_v27  ;;  %v4150_v31 = vcombine.high %v4125_v20, %v4141_v27  ;;  %v4165_v33 = vcombine.low %v4132_v23, %v4148_v28  ;;  %v4166_v34 = vcombine.high %v4132_v23, %v4148_v28  ;;  %v6009_v20 = vld [vmem:[%s7995_s11 + $0x40] ss:$8 sps:$4 sm:$0xff]   ;;  %v6011_v23 = vld [vmem:[%s7995_s11 + $0x44] ss:$8 sps:$4 sm:$0xff]   ;;  %v6012_v25 = vld [vmem:[%s7995_s11 + $0x50] ss:$8 sps:$4 sm:$0xff]  }
 0xf75   : > { %v6838_v27 = vmov 0   ;;  %v6017_v28 = vld [vmem:[%s7995_s11 + $0x64] ss:$8 sps:$4 sm:$0xff]  }
 0xf76   : > { %v4157_v26 = vrot.slane %v4149_v30, %v7428_v15  ;;  %v4164_v36 = vrot.slane %v4150_v31, %v7428_v15  ;;  %v4173_v37 = vrot.slane %v4165_v33, %v7428_v15  ;;  %v4180_v39 = vrot.slane %v4166_v34, %v7428_v15  ;;  %4556 = vmatprep.mubr.bf16.mxu1 %v6838_v27  ;;  %v6020_v30 = vld [vmem:[%s7995_s11 + $0x74] ss:$8 sps:$4 sm:$0xff]   ;;  %v6018_v31 = vld [vmem:[%s7995_s11 + $0x70] ss:$8 sps:$4 sm:$0xff]   ;;  %v6021_v33 = vld [vmem:[#allocation34 + $0x40] sm:$0xff]  }
 0xf77   : > { %v6022_v34 = vld [vmem:[#allocation34] sm:$0xff]   ;;  %5365 = vmatprep.subr.bf16.mxu0 %v6021_v33 }
 0xf78   : > { %v4185_v40 = vcombine.low %v4157_v26, %v4164_v36  ;;  %v5210_v41 = vcombine.high %v4157_v26, %v4164_v36  ;;  %v4201_v42 = vcombine.low %v4173_v37, %v4180_v39  ;;  %v5211_v43 = vcombine.high %v4173_v37, %v4180_v39  ;;  %v6024_v26 = vld [vmem:[#allocation34 + $0x8] sm:$0xff]   ;;  %v6025_v36 = vld [vmem:[#allocation34 + $0x50] sm:$0xff]   ;;  %v6027_v39 = vld [vmem:[#allocation34 + $0x58] sm:$0xff]  }
 0xf79   : > { %v6026_v37 = vld [vmem:[#allocation34 + $0x10] sm:$0xff]  }
 0xf7a   : > { %v4192_v38 = vrot.slane %v4185_v40, %v7425_v9  ;;  %v4200_v56 = vrot.slane %v5210_v41, %v7425_v9  ;;  %v4208_v46 = vrot.slane %v4201_v42, %v7425_v9  ;;  %v4216_v47 = vrot.slane %v5211_v43, %v7425_v9  ;;  %v6028_v40 = vld [vmem:[#allocation34 + $0x18] sm:$0xff]   ;;  %v6029_v41 = vld [vmem:[#allocation34 + $0x60] sm:$0xff]   ;;  %v6031_v43 = vld [vmem:[#allocation34 + $0x68] sm:$0xff]  }
 0xf7b   : > { %v6030_v42 = vld [vmem:[#allocation34 + $0x20] sm:$0xff]  }
 0xf7c   : > { %v4218_v48 = vcombine.high %v4192_v38, %v4200_v56  ;;  %v4234_v21 = vcombine.high %v4208_v46, %v4216_v47  ;;  %v4217_v22 = vcombine.low %v4192_v38, %v4200_v56  ;;  %v4233_v49 = vcombine.low %v4208_v46, %v4216_v47 }
 0xf7e   : > { %v4232_v6 = vrot.slane %v4218_v48, %v7428_v15  ;;  %v4248_v50 = vrot.slane %v4234_v21, %v7428_v15  ;;  %v4225_v51 = vrot.slane %v4217_v22, %v7428_v15  ;;  %v4241_v53 = vrot.slane %v4233_v49, %v7428_v15 }
 0xf80   : > { %v4251_v52 = vcombine.low %v4232_v6, %v4248_v50  ;;  %v4250_v57 = vcombine.high %v4225_v51, %v4241_v53  ;;  %v4252_v54 = vcombine.high %v4232_v6, %v4248_v50  ;;  %v4249_v55 = vcombine.low %v4225_v51, %v4241_v53  ;;  %v5221_v6 = vld [vmem:[#allocation31] ss:$0 sm:$0xff]  ;;  %v5222_v53 = vld [vmem:[#allocation32] ss:$0 sm:$0xff] }
 0xf82   : > { %4258 = vrot.lane.b32.xlu1 %v4251_v52, %s6835_s4  ;;  %4254 = vrot.lane.b32.xlu0 %v4250_v57, %s6833_s15  ;;  %s4747_s15 = scalar_lea.sflag [#allocation4], %s1215_s1  ;;  %s6674_s4 = sshll.u32 %s6839_s22, 4  ;;  %s6675_s4 = int_to_ptr.vmem [resolvable:$false] %s6674_s4 }
 0xf83   : > { %s6676_s6 = scalar_lea.vmem %s6675_s4, 256  ;;  %p6677_p13 = scmp.lt.s32.totalorder %s7852_s18, %s6675_s4 }
 0xf86   : > { %4262 = vrot.lane.b32.xlu0 %v4252_v54, %s6834_s2  ;;  %s6670_s2 = scalar_lea.vmem %s7852_s18, 128 }
 0xf87   : > { %p6671_p10 = scmp.ne.s32.totalorder %s7852_s18, %s6670_s2  ;;  %p6678_p1 = scmp.lt.s32.totalorder %s6676_s6, %s6670_s2 }
 0xf89   : > { %p6672_p8 = pnand %p6671_p10, %p7996_p7  ;;  %p6679_p0 = por %p6678_p1, %p6677_p13 }
 0xf8b   : > { %p6673_p11 = pneg %p6672_p8 }
 0xf8d   : > { %p6680_p2 = pnand %p6679_p0, %p6673_p11 }
 0xff4   : > { %v4255_v9 = vpop.permute.xlu0 %4254  ;;  %v4259_v59 = vpop.permute.xlu1 %4258 }
 0xff5   : > { %v4265_v60 = vsel %vm2056_vm3, %v4249_v55, %v4255_v9  ;;  %v6033_v55 = vld [vmem:[#allocation34 + $0x70] sm:$0xff]  }
 0xff6   : > { %v4266_v32 = vsel %vm2624_vm7, %v4265_v60, %v4259_v59  ;;  %v6034_v9 = vld [vmem:[#allocation34 + $0x30] sm:$0xff]   ;;  %v6035_v59 = vld [vmem:[#allocation34 + $0x78] sm:$0xff]  }
 0xff7   : > { %v6036_v60 = vld [vmem:[#allocation34 + $0x38] sm:$0xff]  }
 0xff8   : > { %v4263_v61 = vpop.permute.xlu0 %4262 }
 0xff9   : > { %v4267_v24 = vsel %vm2626_vm8, %v4266_v32, %v4263_v61  ;;  %v4436_v61 = vsub.s32 0, %v7422_v4  ;;  %v4432_v32 = vld [vmem:[%s6983_s27] sm:$0x3] }
 0xffa   : > { %v4268_v15 = vpack.c.bf16 %v4267_v24, %v4267_v24  ;;  %v4440_v24 = vsub.s32 1, %v7422_v4 }
 0xffc   : > { %5640 = vmatmul.mubr.bf16.vlgmr.msra.gmra.mrb[32].mxu0 %v4268_v15  ;;  %v4437_v15 = vrot.slane %v4432_v32, %v4436_v61 }
 0xffd   : > { %5366 = vmatpush3.bf16.msra.mxu0 %v6022_v34 }
 0xffe   : > { %5367 = vmatprep.subr.bf16.mxu0 %v6023_v35 }
0x1001   : > { %5368 = vmatpush3.bf16.msra.mxu0 %v6024_v26 }
0x1002   : > { %5369 = vmatprep.subr.bf16.mxu0 %v6025_v36 }
0x1005   : > { %5370 = vmatpush3.bf16.msra.mxu0 %v6026_v37 }
0x1006   : > { %5371 = vmatprep.subr.bf16.mxu0 %v6027_v39 }
0x1009   : > { %5372 = vmatpush3.bf16.msra.mxu0 %v6028_v40 }
0x100a   : > { %5373 = vmatprep.subr.bf16.mxu0 %v6029_v41 }
0x100d   : > { %5374 = vmatpush3.bf16.msra.mxu0 %v6030_v42 }
0x100e   : > { %5375 = vmatprep.subr.bf16.mxu0 %v6031_v43 }
0x1011   : > { %5376 = vmatpush3.bf16.msra.mxu0 %v6032_v45 }
0x1012   : > { %5377 = vmatprep.subr.bf16.mxu0 %v6033_v55 }
0x1015   : > { %5378 = vmatpush3.bf16.msra.mxu0 %v6034_v9 }
0x1016   : > { %5379 = vmatprep.subr.bf16.mxu0 %v6035_v59 }
0x1019   : > { %5380 = vmatpush3.bf16.msra.mxu0 %v6036_v60 }
0x10cf   : > { %v4374_v63 = vpop.f32.mrb[32].mxu0 }
0x10d0   : > { %v4375_v0 = vadd.f32 %v5212_v62, %v4374_v63  ;;  %v5641_v1 = vpop.f32.mrb[33].mxu0  ;;  %v4441_v62 = vrot.slane %v4432_v32, %v4440_v24 }
0x10d1   : > { %v4377_v2 = vpop.f32.mrb[34].mxu0 }
0x10d2   : > { %v7817_v3 = vadd.f32 %v4375_v0, %v7576_v44  ;;  %v5642_v5 = vpop.f32.mrb[35].mxu0  ;;  %v5997_v44 = vld [vmem:[%s7995_s11] ss:$8 sps:$4 sm:$0xff]  }
0x10d3   : > { %4525 = vmatpush1.bf16.msra.mxu1 %v5997_v44  ;;  %v5239_v44 = vld [vmem:[%s6993_s12] ss:$0 sm:$0xff] }
0x10d4   : > { %4383 = vadd.xlane.f32.xlu1 %v7817_v3  ;;  %4526 = vmatprep.subr.bf16.mxu1 %v6002_v13 }
0x10d7   : > { %4527 = vmatpush1.bf16.msra.mxu1 %v6000_v16 }
0x10d8   : > { %4528 = vmatprep.subr.bf16.mxu1 %v6005_v58 }
0x10db   : > { %4529 = vmatpush1.bf16.msra.mxu1 %v6003_v14 }
0x10dc   : > { %4530 = vmatprep.subr.bf16.mxu1 %v6008_v18 }
0x10df   : > { %4531 = vmatpush1.bf16.msra.mxu1 %v6006_v19 }
0x10e0   : > { %4532 = vmatprep.subr.bf16.mxu1 %v6011_v23 }
0x10e3   : > { %4533 = vmatpush1.bf16.msra.mxu1 %v6009_v20 }
0x10e4   : > { %4534 = vmatprep.subr.bf16.mxu1 %v6014_v17 }
0x10e7   : > { %4535 = vmatpush1.bf16.msra.mxu1 %v6012_v25 }
0x10e8   : > { %4536 = vmatprep.subr.bf16.mxu1 %v6017_v28 }
0x10eb   : > { %4537 = vmatpush1.bf16.msra.mxu1 %v6015_v29 }
0x10ec   : > { %4538 = vmatprep.subr.bf16.mxu1 %v6020_v30 }
0x10ef   : > { %4539 = vmatpush1.bf16.msra.mxu1 %v6018_v31 }
0x1161   : > { %v4384_v7 = vpop.xlane.xlu1 %4383 }
0x1162   : > { %v4385_v8 = vmul.f32 0.0078125, %v4384_v7 }
0x1164   : > { %v7821_v10 = vsub.f32 %v7817_v3, %v4385_v8 }
0x1166   : > { %v4387_v11 = vmul.f32 %v7821_v10, %v7821_v10  ;;  %v4397_v50 = vmul.f32 %v5221_v6, %v7821_v10 }
0x1168   : > { %4388 = vadd.xlane.f32.xlu0 %v4387_v11 }
0x11f5   : > { %v4389_v38 = vpop.xlane.xlu0 %4388 }
0x11f6   : > { %v4390_v56 = vmul.f32 0.007874016, %v4389_v38 }
0x11f8   : > { %6077 = vrsqrt.f32 %v4390_v56  ;;  %vm4400_vm14 = vcmp.eq.f32.partialorder %v4390_v56, inf  ;;  %v4403_v48 = vand.u32 2147483648, %v4390_v56  ;;  %vm4402_vm15 = vcmp.eq.f32.partialorder %v4390_v56, 0.0 }
0x1202   : > { %v6078_v46 = vpop.eup %6077 }
0x1203   : > { %v4399_v47 = vmul.f32 %v6078_v46, %v4390_v56 }
0x1205   : > { %v4401_v21 = vsel %vm4400_vm14, %v4390_v56, %v4399_v47 }
0x1206   : > { %v4404_v22 = vsel %vm4402_vm15, %v4403_v48, %v4401_v21 }
0x1207   : > { %v4405_v49 = vadd.f32 1e-06, %v4404_v22 }
0x1209   : > { %6079 = vrcp.f32 %v4405_v49 }
0x1213   : > { %v6080_v51 = vpop.eup %6079 }
0x1214   : > { %v4407_v52 = vmul.f32 %v6080_v51, %v4397_v50 }
0x1216   : > { %v4414_v57 = vadd.f32 %v5222_v53, %v4407_v52 }
0x1218   : > { %v4415_v54 = vpack.c.bf16 %v4414_v57, %v4414_v57 }
0x121a   : > { %4557 = vmatmul.mubr.bf16.vlgmr.msra.gmra.mrb[60].mxu1 %v4415_v54 }
0x12ed   : > { %v4558_v63 = vpop.f32.mrb[60].mxu1 }
0x12ee   : > { %v4559_v0 = vadd.f32 %v4558_v63, %v4437_v15  ;;  %v4560_v1 = vpop.f32.mrb[61].mxu1 }
0x12ef   : > { %v4561_v2 = vadd.f32 %v4560_v1, %v4441_v62  ;;  %v4562_v5 = vpop.f32.mrb[62].mxu1 }
0x12f0   : > { %v4565_v7 = vmax.f32 %v4559_v0, 0.0  ;;  %v4563_v8 = vpop.f32.mrb[63].mxu1 }
0x12f1   : > { %v4566_v10 = vmax.f32 %v4561_v2, 0.0 }
0x12f2   : > { %v4567_v12 = vpack.c.bf16 %v4565_v7, %v4565_v7 }
0x12f3   : > { %v4568_v11 = vpack.c.bf16 %v4566_v10, %v4566_v10 }
0x12f5   : > { %4736 = vmatprep.mubr.bf16.mxu0 %v4568_v11 }
0x12f6   : > { %4737 = vmatmul.mubr.bf16.vlgmr.msra.gmra.mrb[36].mxu0 %v4567_v12 }
0x13c9   : > { %v5381_v4 = vpop.f32.mrb[36].mxu0 }
0x13ca   : > { %v5382_v13 = vpop.f32.mrb[37].mxu0 }
0x13cb   : > { %v5383_v16 = vadd.f32 %v5382_v13, %v5381_v4  ;;  %v5384_v58 = vpop.f32.mrb[38].mxu0 }
0x13cc   : > { %v5385_v14 = vpop.f32.mrb[39].mxu0 }
0x13cd   : > { %v4739_v18 = vadd.f32 %v5383_v16, %v5239_v44 }
0x13cf   : > { %v4744_v19 = vadd.f32 %v4739_v18, %v7817_v3 }
0x13d1   : > { %4745 = vst [vmem:[%s1217_s8] sm:$0xff] %v4744_v19 }
0x13d2   : > { %6683 = shalt.err (!%p6680_p2)
}
0x13d3   : > { %s6684_s13 = scalar_lea.hbm %s7850_s26, 128  ;;  %s6688_s9 = scalar_lea.hbm %s6998_s21, 256 }
0x13d4   : > { %p6685_p3 = scmp.ne.s32.totalorder %s7850_s26, %s6684_s13  ;;  %p6689_p5 = scmp.lt.u32.totalorder %s7850_s26, %s6998_s21 }
0x13d5   : > { %p6690_p6 = scmp.lt.u32.totalorder %s6688_s9, %s6684_s13  ;;  %p6692_p10 = scmp.lt.u32.totalorder %s6684_s13, %s7850_s26 }
0x13d6   : > { %p6686_p4 = pnand %p6685_p3, %p7996_p7 }
0x13d7   : > { %p6691_p9 = por %p6690_p6, %p6689_p5 }
0x13d8   : > { %p6687_p12 = pneg %p6686_p4 }
0x13d9   : > { %p6693_p8 = por %p6692_p10, %p6691_p9 }
0x13db   : > { %p6694_p11 = pnand %p6693_p8, %p6687_p12 }
0x13dd   : > { %6697 = shalt.err (!%p6694_p11)
}
0x13de   : > { %5727 = dma.vmem_to_hbm [thread:$0]  (%p7996_p7), %s7852_s18, 128, %s7850_s26, %s4747_s15  }
0x13df PF: > { %s7997_s1 = sld [smem:[#allocation69_spill]]  ;;  %s7998_s23 = sld [smem:[#allocation73_spill]] }
0x13e0   : > { %p5839_p13 = scmp.ge.s32.totalorder %s6776_s0, 2 }
0x13e5   : > { %s4772_s10 = sand.u32 1, %s7997_s1   ;;  %p7999_p1 = scmp.ne.s32.totalorder %s7998_s23, 0 }
0x13e6   : > { %s4773_s8 = scalar_lea.sflag [#allocation4], %s4772_s10 }
0x13e7   : > { %p5794_p0 = pnand %p5839_p13, %p7999_p1 }
0x13e9   : > { %6759 = dma.done.wait (!%p5794_p0), %s4773_s8, 128  }
0x13ea   : > { %6761 = vsyncadd (!%p5794_p0), %s4773_s8, 4294967168  ;;  %s8000_s0 = sld [smem:[#allocation71_spill]]  ;;  %s8001_s2 = sld [smem:[#allocation70_spill]] }
0x13eb   : > { %s8002_s18 = sld [smem:[#allocation72_spill]]  ;;  %s8003_s15 = smov %s6768_s16 }
0x13f0   : > { %p82_p2 = scmp.ge.s32.totalorder %s8000_s0, 4   ;;  %s8004_s16 = smov %s8001_s2 }
0x13f2   :  { %84 = sbr.rel (!%p82_p2) target bundleno = 69 (0x45), region = 293 }
0x13f9   :  { %4778 = vsyncpa [#allocation3], 1 }
0x13fa   :  { %4780 = vsyncpa [#allocation3 + $0x1], 1 }
0x13fb   :  { %4781 = vsyncpa [#allocation6], 1 }
0x13fc   :  { %4782 = vsyncpa [#allocation9], 1 }
0x13fd   :  { %4783 = vsyncpa [#allocation12], 1 }
0x13fe   :  { %4784 = vsyncpa [#allocation15], 1 }
0x13ff   :  { %4785 = vsyncpa [#allocation18], 1 }
0x1400   :  { %4786 = vsyncpa [#allocation21], 1 }
0x1401   :  { %4787 = vsyncpa [#allocation24], 1 }
0x1402   :  { %4788 = vsyncpa [#allocation27], 1 }
0x1403   :  { %4789 = vsyncpa [#allocation30], 1 }
0x1404   :  { %4790 = vsyncpa [#allocation33], 1 }
0x1405   :  { %4791 = vsyncpa [#allocation4], 1 }
0x1406   :  { %4793 = vsyncpa [#allocation4 + $0x1], 1 }

</bundles_post_ra>
